<compile_context>
chip_gen: v6e
topology: v6e:2x2x1
jax: 0.10.0
libtpu: 0.0.40
codegen_flags: <defaults>
</compile_context>

<pallas_src>
import functools

import jax
import jax.numpy as jnp
from jax import lax
from jax.experimental import pallas as pl
from jax.experimental.pallas import tpu as pltpu

_LANE = 128
_SUBLANE = 8


def _round_up(x, m):
    return (x + m - 1) // m * m


def _vmem_limit_bytes():
    """~3/4 of physical VMEM: ~48 MiB on v7x (64 MiB), ~96 MiB on v5e/v6e (128 MiB)."""
    cap = None
    try:
        info = pltpu.get_tpu_info()
        for name in ("vmem_capacity_bytes", "vmem_size_bytes", "vmem_bytes"):
            val = getattr(info, name, None)
            if isinstance(val, int) and val > 0:
                cap = int(val)
                break
    except Exception:
        cap = None
    if cap is None:
        cap = 64 * 1024 * 1024          # conservative fallback: v7x per-core VMEM
    return max(32 * 1024 * 1024, (cap * 3) // 4)


def _pick_time_block(S, b_tile, I, Hp, Op, budget_bytes):
    """Largest divisor of S whose per-grid-step VMEM footprint fits the budget."""
    fixed = (2 * I * 4 * Hp            # W_ih^T  bf16 (single buffered)
             + 2 * Hp * 4 * Hp         # W_hh^T  bf16
             + 2 * Hp * Op             # W_out^T bf16
             + 4 * 4 * b_tile * Hp     # h0/c0 inputs + h/c carry scratch (f32)
             + 4 * 4 * b_tile * Hp)    # h_n/c_n output buffers (f32, 2x safety)
    per_t = b_tile * (2 * 2 * I        # x block (bf16, double-buffered)
                      + 2 * 4 * Op     # out block (<=f32, double-buffered)
                      + 4 * 4 * Hp     # gates_x scratch (f32)
                      + 4 * Hp)        # h-history scratch (f32)
    best = 1
    for cand in range(1, min(S, 256) + 1):
        if S % cand == 0 and fixed + cand * per_t <= budget_bytes:
            best = cand
    return best


# ---------------------------------------------------------------------------
# Fully fused LSTM-block kernel: input projection + recurrence + output head.
# Grid = (batch_tiles ["parallel"], time_blocks ["arbitrary"]).
# ---------------------------------------------------------------------------
def _lstm_block_kernel(x_ref, h0_ref, c0_ref, wih_t_ref, whh_t_ref, wout_t_ref,
                       out_ref, hn_ref, cn_ref,
                       gx_scr, hs_scr, h_scr, c_scr,
                       *, t_blk, b_tile, hidden_pad, per_gate, unroll):
    tb = pl.program_id(1)                     # time-block index (sequential axis)
    Hp = hidden_pad

    @pl.when(tb == 0)
    def _():                                  # (re)load initial state per batch tile
        h_scr[...] = h0_ref[...]
        c_scr[...] = c0_ref[...]

    # Fused input projection for the whole time block: one big MXU matmul whose
    # result stays in VMEM (no HBM gates_x roundtrip).
    gx_scr[...] = jnp.dot(x_ref[...], wih_t_ref[...],
                          preferred_element_type=jnp.float32)

    def sigm(z):
        # sigmoid(z) = 0.5*tanh(0.5*z) + 0.5 : single EUP push (vs exp + divide).
        return 0.5 * jnp.tanh(0.5 * z) + 0.5

    def step(s, carry):
        h_prev, c_prev = carry                                 # f32 (b_tile, Hp)
        row = pl.multiple_of(s * b_tile, b_tile)
        gx = gx_scr[pl.ds(row, b_tile), :]                     # f32 (b_tile, 4Hp)
        h_bf = h_prev.astype(whh_t_ref.dtype)
        if per_gate:
            # Four (b_tile,Hp) matmuls; each gate consumed as soon as it pops
            # (bounds live vregs; early-gate EUP overlaps later MXU pushes).
            def gate(k):
                return gx[:, k * Hp:(k + 1) * Hp] + jnp.dot(
                    h_bf, whh_t_ref[:, k * Hp:(k + 1) * Hp],
                    preferred_element_type=jnp.float32)
            i_g = sigm(gate(0))
            f_g = sigm(gate(1))
            g_g = jnp.tanh(gate(2))
            o_g = sigm(gate(3))
        else:
            gates = gx + jnp.dot(h_bf, whh_t_ref[...],
                                 preferred_element_type=jnp.float32)
            i_g = sigm(gates[:, 0 * Hp:1 * Hp])
            f_g = sigm(gates[:, 1 * Hp:2 * Hp])
            g_g = jnp.tanh(gates[:, 2 * Hp:3 * Hp])
            o_g = sigm(gates[:, 3 * Hp:4 * Hp])
        c_new = f_g * c_prev + i_g * g_g                       # f32 state math (v5e-safe)
        h_new = o_g * jnp.tanh(c_new)
        hs_scr[pl.ds(row, b_tile), :] = h_new                  # f32 VMEM h history
        return h_new, c_new

    h_fin, c_fin = lax.fori_loop(0, t_blk, step, (h_scr[...], c_scr[...]),
                                 unroll=unroll)
    h_scr[...] = h_fin
    c_scr[...] = c_fin

    # Fused output head: (t_blk*b_tile, Hp) @ (Hp, Op) -- Op is a multiple of
    # 128, so the store is fully lane-dense; emit out_dtype directly.
    out_ref[...] = jnp.dot(hs_scr[...].astype(wout_t_ref.dtype), wout_t_ref[...],
                           preferred_element_type=jnp.float32).astype(out_ref.dtype)

    @pl.when(tb == pl.num_programs(1) - 1)
    def _():
        hn_ref[...] = h_fin
        cn_ref[...] = c_fin


# ---------------------------------------------------------------------------
# Wrapper == LstmRNN.forward(input, hidden) with verbose=False.
# ---------------------------------------------------------------------------
def lstm_rnn_forward(x, hidden, w_ih, w_hh, w_out):
    """x:(S,B,I); hidden=(h0,c0) each (1,B,H); w_ih:(4H,I) w_hh:(4H,H) w_out:(O,H)."""
    h0, c0 = hidden
    S, B, I = x.shape
    H = w_hh.shape[1]
    O = w_out.shape[0]
    out_dtype = x.dtype

    Bp = _round_up(B, _SUBLANE)
    Hp = _round_up(H, _LANE)
    Op = _round_up(O, _LANE)                  # lane-dense head output

    # Batch-tile axis: lets v7x's second TensorCore take half the batch.
    n_bt = 2 if (Bp >= 16 and Bp % 16 == 0) else 1
    b_tile = Bp // n_bt

    vmem_limit = _vmem_limit_bytes()
    t_blk = _pick_time_block(S, b_tile, I, Hp, Op,
                             budget_bytes=int(vmem_limit * 0.8))
    n_tb = S // t_blk

    # vreg-pressure-aware unrolling / per-gate split inside the time loop.
    elems = b_tile * Hp
    per_gate = elems > 4096
    if elems <= 2048:
        unroll = t_blk
    elif elems <= 8192:
        unroll = min(t_blk, 4)
    else:
        unroll = min(t_blk, 2)

    # --- pre-transpose + per-gate zero-pad weights, cast to bf16 for the MXU.
    w_ih_p = jnp.zeros((4, Hp, I), w_ih.dtype).at[:, :H, :].set(w_ih.reshape(4, H, I))
    w_ih_t = w_ih_p.reshape(4 * Hp, I).T.astype(jnp.bfloat16)               # (I, 4Hp)
    w_hh_p = jnp.zeros((4, Hp, Hp), w_hh.dtype).at[:, :H, :H].set(w_hh.reshape(4, H, H))
    w_hh_t = w_hh_p.reshape(4 * Hp, Hp).T.astype(jnp.bfloat16)              # (Hp, 4Hp)
    w_out_p = jnp.zeros((Op, Hp), w_out.dtype).at[:O, :H].set(w_out)
    w_out_t = w_out_p.T.astype(jnp.bfloat16)                                # (Hp, Op)

    # --- pre-blocked bf16 x: (n_bt, n_tb, t_blk*b_tile, I) so each grid step
    #     loads one contiguous sublane-dense slab (no in-kernel reshape).
    x_p = jnp.zeros((S, Bp, I), jnp.float32).at[:, :B, :].set(x.astype(jnp.float32))
    x_blk = (x_p.reshape(n_tb, t_blk, n_bt, b_tile, I)
                 .transpose(2, 0, 1, 3, 4)
                 .reshape(n_bt, n_tb, t_blk * b_tile, I)
                 .astype(jnp.bfloat16))

    h0_p = jnp.zeros((Bp, Hp), jnp.float32).at[:B, :H].set(
        h0.reshape(B, H).astype(jnp.float32))
    c0_p = jnp.zeros((Bp, Hp), jnp.float32).at[:B, :H].set(
        c0.reshape(B, H).astype(jnp.float32))

    kernel = functools.partial(_lstm_block_kernel, t_blk=t_blk, b_tile=b_tile,
                               hidden_pad=Hp, per_gate=per_gate, unroll=unroll)

    def run(single_buffer):
        def inv(shape, imap):
            # Loop-invariant input: single VMEM buffer (no wasted 2nd buffer).
            if single_buffer:
                return pl.BlockSpec(shape, imap, pipeline_mode=pl.Buffered(1))
            return pl.BlockSpec(shape, imap)

        grid_spec = pltpu.PrefetchScalarGridSpec(
            num_scalar_prefetch=0,
            grid=(n_bt, n_tb),
            in_specs=[
                pl.BlockSpec((None, None, t_blk * b_tile, I),
                             lambda bt, tb: (bt, tb, 0, 0)),               # x block (bf16)
                inv((b_tile, Hp), lambda bt, tb: (bt, 0)),                  # h0
                inv((b_tile, Hp), lambda bt, tb: (bt, 0)),                  # c0
                inv((I, 4 * Hp), lambda bt, tb: (0, 0)),                    # W_ih^T (bf16)
                inv((Hp, 4 * Hp), lambda bt, tb: (0, 0)),                   # W_hh^T (bf16)
                inv((Hp, Op), lambda bt, tb: (0, 0)),                       # W_out^T (bf16)
            ],
            out_specs=[
                pl.BlockSpec((None, None, t_blk * b_tile, Op),
                             lambda bt, tb: (bt, tb, 0, 0)),                # output block
                pl.BlockSpec((b_tile, Hp), lambda bt, tb: (bt, 0)),         # h_n (f32)
                pl.BlockSpec((b_tile, Hp), lambda bt, tb: (bt, 0)),         # c_n (f32)
            ],
            scratch_shapes=[
                pltpu.VMEM((t_blk * b_tile, 4 * Hp), jnp.float32),  # gates_x (VMEM only)
                pltpu.VMEM((t_blk * b_tile, Hp), jnp.float32),      # h history (f32)
                pltpu.VMEM((b_tile, Hp), jnp.float32),              # h carry
                pltpu.VMEM((b_tile, Hp), jnp.float32),              # c carry
            ],
        )
        return pl.pallas_call(
            kernel,
            out_shape=(
                jax.ShapeDtypeStruct((n_bt, n_tb, t_blk * b_tile, Op), out_dtype),
                jax.ShapeDtypeStruct((Bp, Hp), jnp.float32),
                jax.ShapeDtypeStruct((Bp, Hp), jnp.float32),
            ),
            grid_spec=grid_spec,
            compiler_params=pltpu.CompilerParams(
                dimension_semantics=("parallel", "arbitrary"),   # batch || , time is serial
                vmem_limit_bytes=vmem_limit),
        )(x_blk, h0_p, c0_p, w_ih_t, w_hh_t, w_out_t)

    try:
        out_blk, h_n, c_n = run(single_buffer=True)
    except Exception:
        # Fallback for jax versions without pipeline_mode=pl.Buffered support.
        out_blk, h_n, c_n = run(single_buffer=False)

    output = (out_blk.reshape(n_bt, n_tb, t_blk, b_tile, Op)
                     .transpose(1, 2, 0, 3, 4)
                     .reshape(S, Bp, Op)[:, :B, :O]).astype(out_dtype)
    h_n = h_n[:B, :H].reshape(1, B, H).astype(out_dtype)
    c_n = c_n[:B, :H].reshape(1, B, H).astype(out_dtype)
    return output, (h_n, c_n)


# ---------------------------------------------------------------------------
# Pure-JAX f32 reference matching torch.nn.LSTM(bias=False) + Linear(bias=False).
# ---------------------------------------------------------------------------
def _reference_forward(x, hidden, w_ih, w_hh, w_out):
    h, c = hidden[0][0], hidden[1][0]
    H = h.shape[-1]
    outs = []
    for t in range(x.shape[0]):
        gates = x[t] @ w_ih.T + h @ w_hh.T
        i = jax.nn.sigmoid(gates[:, 0 * H:1 * H])
        f = jax.nn.sigmoid(gates[:, 1 * H:2 * H])
        g = jnp.tanh(gates[:, 2 * H:3 * H])
        o = jax.nn.sigmoid(gates[:, 3 * H:4 * H])
        c = f * c + i * g
        h = o * jnp.tanh(c)
        outs.append(h @ w_out.T)
    return jnp.stack(outs, axis=0), (h[None], c[None])


if __name__ == "__main__":
    # Small shapes consistent with the module: seq=8, batch=8, input=16, hidden=32, out=16.
    S, B, I, H, O = 8, 8, 16, 32, 16
    key = jax.random.PRNGKey(0)
    kx, kh, kc, k1, k2, k3 = jax.random.split(key, 6)

    x = jax.random.normal(kx, (S, B, I), dtype=jnp.float32)
    h0 = jax.random.normal(kh, (1, B, H), dtype=jnp.float32)   # init_hidden()
    c0 = jax.random.normal(kc, (1, B, H), dtype=jnp.float32)

    # torch uses U(-1/sqrt(H), 1/sqrt(H)); mimic the scale deterministically.
    bound = 1.0 / jnp.sqrt(jnp.float32(H))
    w_ih = jax.random.uniform(k1, (4 * H, I), jnp.float32, -bound, bound)   # LSTM weight_ih_l0
    w_hh = jax.random.uniform(k2, (4 * H, H), jnp.float32, -bound, bound)   # LSTM weight_hh_l0
    w_out = jax.random.uniform(k3, (O, H), jnp.float32, -bound, bound)      # Linear weight

    output, (h_n, c_n) = lstm_rnn_forward(x, (h0, c0), w_ih, w_hh, w_out)
    jax.block_until_ready((output, h_n, c_n))

    ref_out, (ref_h, ref_c) = _reference_forward(x, (h0, c0), w_ih, w_hh, w_out)
    assert output.shape == (S, B, O) and h_n.shape == (1, B, H) and c_n.shape == (1, B, H)
    # bf16-fed MXU (f32 accumulation / f32 state) -> relaxed tolerance vs f32 reference.
    assert jnp.allclose(output, ref_out, atol=5e-2, rtol=5e-2)
    assert jnp.allclose(h_n, ref_h, atol=5e-2, rtol=5e-2)
    assert jnp.allclose(c_n, ref_c, atol=5e-2, rtol=5e-2)

    print("KERNEL_OK")
</pallas_src>

<mosaic_0001>
module attributes {stable_mosaic.version = 11 : i64} {
  func.func @_lstm_block_kernel(%arg0: i32, %arg1: i32, %arg2: memref<1x1x64x16xbf16, #tpu.memory_space<vmem>>, %arg3: memref<8x128xf32, #tpu.memory_space<vmem>>, %arg4: memref<8x128xf32, #tpu.memory_space<vmem>>, %arg5: memref<16x512xbf16, #tpu.memory_space<vmem>>, %arg6: memref<128x512xbf16, #tpu.memory_space<vmem>>, %arg7: memref<128x128xbf16, #tpu.memory_space<vmem>>, %arg8: memref<1x1x64x128xf32, #tpu.memory_space<vmem>>, %arg9: memref<8x128xf32, #tpu.memory_space<vmem>>, %arg10: memref<8x128xf32, #tpu.memory_space<vmem>>, %arg11: memref<64x512xf32, #tpu.memory_space<vmem>>, %arg12: memref<64x128xf32, #tpu.memory_space<vmem>>, %arg13: memref<8x128xf32, #tpu.memory_space<vmem>>, %arg14: memref<8x128xf32, #tpu.memory_space<vmem>>) attributes {dimension_semantics = [#tpu.dimension_semantics<parallel>, #tpu.dimension_semantics<arbitrary>], iteration_bounds = array<i64: 1, 1>, scalar_prefetch = 0 : i64, scratch_operands = 4 : i64, tpu.core_type = #tpu.core_type<tc>, window_params = [{transform_indices = @transform_0, window_bounds = array<i64: 1, 1, 64, 16>}, {pipeline_mode = #tpu.pipeline_mode<synchronous>, transform_indices = @transform_1, window_bounds = array<i64: 8, 128>}, {pipeline_mode = #tpu.pipeline_mode<synchronous>, transform_indices = @transform_2, window_bounds = array<i64: 8, 128>}, {pipeline_mode = #tpu.pipeline_mode<synchronous>, transform_indices = @transform_3, window_bounds = array<i64: 16, 512>}, {pipeline_mode = #tpu.pipeline_mode<synchronous>, transform_indices = @transform_4, window_bounds = array<i64: 128, 512>}, {pipeline_mode = #tpu.pipeline_mode<synchronous>, transform_indices = @transform_5, window_bounds = array<i64: 128, 128>}, {transform_indices = @transform_6, window_bounds = array<i64: 1, 1, 64, 128>}, {transform_indices = @transform_7, window_bounds = array<i64: 8, 128>}, {transform_indices = @transform_8, window_bounds = array<i64: 8, 128>}]} {
    %c0_i32 = arith.constant 0 : i32
    %0 = arith.cmpi eq, %arg1, %c0_i32 : i32
    %1 = arith.extui %0 : i1 to i32
    %c0_i32_0 = arith.constant 0 : i32
    %2 = arith.cmpi ne, %1, %c0_i32_0 : i32
    scf.if %2 {
      %c0_148 = arith.constant 0 : index
      %c0_149 = arith.constant 0 : index
      %350 = vector.load %arg3[%c0_148, %c0_149] : memref<8x128xf32, #tpu.memory_space<vmem>>, vector<8x128xf32>
      %c0_150 = arith.constant 0 : index
      %c0_151 = arith.constant 0 : index
      %351 = vector.load %arg13[%c0_150, %c0_151] : memref<8x128xf32, #tpu.memory_space<vmem>>, vector<8x128xf32>
      tpu.vector_store %arg13[%c0_150, %c0_151], %350 {strides = array<i32>} : memref<8x128xf32, #tpu.memory_space<vmem>>, vector<8x128xf32>,
      %c0_152 = arith.constant 0 : index
      %c0_153 = arith.constant 0 : index
      %352 = vector.load %arg4[%c0_152, %c0_153] : memref<8x128xf32, #tpu.memory_space<vmem>>, vector<8x128xf32>
      %c0_154 = arith.constant 0 : index
      %c0_155 = arith.constant 0 : index
      %353 = vector.load %arg14[%c0_154, %c0_155] : memref<8x128xf32, #tpu.memory_space<vmem>>, vector<8x128xf32>
      tpu.vector_store %arg14[%c0_154, %c0_155], %352 {strides = array<i32>} : memref<8x128xf32, #tpu.memory_space<vmem>>, vector<8x128xf32>,
    } else {
    }
    %c0 = arith.constant 0 : index
    %c0_1 = arith.constant 0 : index
    %c0_2 = arith.constant 0 : index
    %c0_3 = arith.constant 0 : index
    %3 = vector.load %arg2[%c0, %c0_1, %c0_2, %c0_3] : memref<1x1x64x16xbf16, #tpu.memory_space<vmem>>, vector<1x1x64x16xbf16>
    %4 = vector.shape_cast %3 : vector<1x1x64x16xbf16> to vector<64x16xbf16>
    %c0_4 = arith.constant 0 : index
    %c0_5 = arith.constant 0 : index
    %5 = vector.load %arg5[%c0_4, %c0_5] : memref<16x512xbf16, #tpu.memory_space<vmem>>, vector<16x512xbf16>
    %cst = arith.constant dense<0.000000e+00> : vector<64x512xf32>
    %6 = tpu.matmul %4, %5, %cst {dimension_numbers = #tpu.dot_dimension_numbers<[1], [0], [0], [1], [0, 0, 1, 1], [], []>} : vector<64x16xbf16>, vector<16x512xbf16>, vector<64x512xf32> -> vector<64x512xf32>
    %c0_6 = arith.constant 0 : index
    %c0_7 = arith.constant 0 : index
    %7 = vector.load %arg11[%c0_6, %c0_7] : memref<64x512xf32, #tpu.memory_space<vmem>>, vector<64x512xf32>
    tpu.vector_store %arg11[%c0_6, %c0_7], %6 {strides = array<i32>} : memref<64x512xf32, #tpu.memory_space<vmem>>, vector<64x512xf32>,
    %c0_8 = arith.constant 0 : index
    %c0_9 = arith.constant 0 : index
    %8 = vector.load %arg13[%c0_8, %c0_9] : memref<8x128xf32, #tpu.memory_space<vmem>>, vector<8x128xf32>
    %c0_10 = arith.constant 0 : index
    %c0_11 = arith.constant 0 : index
    %9 = vector.load %arg14[%c0_10, %c0_11] : memref<8x128xf32, #tpu.memory_space<vmem>>, vector<8x128xf32>
    %c0_i32_12 = arith.constant 0 : i32
    %c8_i32 = arith.constant 8 : i32
    %10 = arith.muli %c0_i32_12, %c8_i32 : i32
    %11 = tpu.assume_multiple %10, 8 : i32
    %12 = arith.index_cast %11 : i32 to index
    %c0_13 = arith.constant 0 : index
    %13 = vector.load %arg11[%12, %c0_13] : memref<64x512xf32, #tpu.memory_space<vmem>>, vector<8x512xf32>
    %14 = arith.truncf %8 : vector<8x128xf32> to vector<8x128xbf16>
    %c0_14 = arith.constant 0 : index
    %c0_15 = arith.constant 0 : index
    %15 = vector.load %arg6[%c0_14, %c0_15] : memref<128x512xbf16, #tpu.memory_space<vmem>>, vector<128x512xbf16>
    %cst_16 = arith.constant dense<0.000000e+00> : vector<8x512xf32>
    %16 = tpu.matmul %14, %15, %cst_16 {dimension_numbers = #tpu.dot_dimension_numbers<[1], [0], [0], [1], [0, 0, 1, 1], [], []>} : vector<8x128xbf16>, vector<128x512xbf16>, vector<8x512xf32> -> vector<8x512xf32>
    %17 = arith.addf %13, %16 : vector<8x512xf32>
    %18 = vector.extract_strided_slice %17 {offsets = [0, 0], sizes = [8, 128], strides = [1, 1]} : vector<8x512xf32> to vector<8x128xf32>
    %cst_17 = arith.constant 5.000000e-01 : f32
    %19 = vector.broadcast %cst_17 : f32 to vector<8x128xf32>
    %20 = arith.mulf %19, %18 : vector<8x128xf32>
    %21 = math.tanh %20 : vector<8x128xf32>
    %cst_18 = arith.constant 5.000000e-01 : f32
    %22 = vector.broadcast %cst_18 : f32 to vector<8x128xf32>
    %23 = arith.mulf %22, %21 : vector<8x128xf32>
    %cst_19 = arith.constant 5.000000e-01 : f32
    %24 = vector.broadcast %cst_19 : f32 to vector<8x128xf32>
    %25 = arith.addf %23, %24 : vector<8x128xf32>
    %26 = vector.extract_strided_slice %17 {offsets = [0, 128], sizes = [8, 128], strides = [1, 1]} : vector<8x512xf32> to vector<8x128xf32>
    %cst_20 = arith.constant 5.000000e-01 : f32
    %27 = vector.broadcast %cst_20 : f32 to vector<8x128xf32>
    %28 = arith.mulf %27, %26 : vector<8x128xf32>
    %29 = math.tanh %28 : vector<8x128xf32>
    %cst_21 = arith.constant 5.000000e-01 : f32
    %30 = vector.broadcast %cst_21 : f32 to vector<8x128xf32>
    %31 = arith.mulf %30, %29 : vector<8x128xf32>
    %cst_22 = arith.constant 5.000000e-01 : f32
    %32 = vector.broadcast %cst_22 : f32 to vector<8x128xf32>
    %33 = arith.addf %31, %32 : vector<8x128xf32>
    %34 = vector.extract_strided_slice %17 {offsets = [0, 256], sizes = [8, 128], strides = [1, 1]} : vector<8x512xf32> to vector<8x128xf32>
    %35 = math.tanh %34 : vector<8x128xf32>
    %36 = vector.extract_strided_slice %17 {offsets = [0, 384], sizes = [8, 128], strides = [1, 1]} : vector<8x512xf32> to vector<8x128xf32>
    %cst_23 = arith.constant 5.000000e-01 : f32
    %37 = vector.broadcast %cst_23 : f32 to vector<8x128xf32>
    %38 = arith.mulf %37, %36 : vector<8x128xf32>
    %39 = math.tanh %38 : vector<8x128xf32>
    %cst_24 = arith.constant 5.000000e-01 : f32
    %40 = vector.broadcast %cst_24 : f32 to vector<8x128xf32>
    %41 = arith.mulf %40, %39 : vector<8x128xf32>
    %cst_25 = arith.constant 5.000000e-01 : f32
    %42 = vector.broadcast %cst_25 : f32 to vector<8x128xf32>
    %43 = arith.addf %41, %42 : vector<8x128xf32>
    %44 = arith.mulf %33, %9 : vector<8x128xf32>
    %45 = arith.mulf %25, %35 : vector<8x128xf32>
    %46 = arith.addf %44, %45 : vector<8x128xf32>
    %47 = math.tanh %46 : vector<8x128xf32>
    %48 = arith.mulf %43, %47 : vector<8x128xf32>
    %49 = arith.index_cast %11 : i32 to index
    %c0_26 = arith.constant 0 : index
    %50 = vector.load %arg12[%49, %c0_26] : memref<64x128xf32, #tpu.memory_space<vmem>>, vector<8x128xf32>
    tpu.vector_store %arg12[%49, %c0_26], %48 {strides = array<i32>} : memref<64x128xf32, #tpu.memory_space<vmem>>, vector<8x128xf32>,
    %c1_i32 = arith.constant 1 : i32
    %c8_i32_27 = arith.constant 8 : i32
    %51 = arith.muli %c1_i32, %c8_i32_27 : i32
    %52 = tpu.assume_multiple %51, 8 : i32
    %53 = arith.index_cast %52 : i32 to index
    %c0_28 = arith.constant 0 : index
    %54 = vector.load %arg11[%53, %c0_28] : memref<64x512xf32, #tpu.memory_space<vmem>>, vector<8x512xf32>
    %55 = arith.truncf %48 : vector<8x128xf32> to vector<8x128xbf16>
    %c0_29 = arith.constant 0 : index
    %c0_30 = arith.constant 0 : index
    %56 = vector.load %arg6[%c0_29, %c0_30] : memref<128x512xbf16, #tpu.memory_space<vmem>>, vector<128x512xbf16>
    %cst_31 = arith.constant dense<0.000000e+00> : vector<8x512xf32>
    %57 = tpu.matmul %55, %56, %cst_31 {dimension_numbers = #tpu.dot_dimension_numbers<[1], [0], [0], [1], [0, 0, 1, 1], [], []>} : vector<8x128xbf16>, vector<128x512xbf16>, vector<8x512xf32> -> vector<8x512xf32>
    %58 = arith.addf %54, %57 : vector<8x512xf32>
    %59 = vector.extract_strided_slice %58 {offsets = [0, 0], sizes = [8, 128], strides = [1, 1]} : vector<8x512xf32> to vector<8x128xf32>
    %cst_32 = arith.constant 5.000000e-01 : f32
    %60 = vector.broadcast %cst_32 : f32 to vector<8x128xf32>
    %61 = arith.mulf %60, %59 : vector<8x128xf32>
    %62 = math.tanh %61 : vector<8x128xf32>
    %cst_33 = arith.constant 5.000000e-01 : f32
    %63 = vector.broadcast %cst_33 : f32 to vector<8x128xf32>
    %64 = arith.mulf %63, %62 : vector<8x128xf32>
    %cst_34 = arith.constant 5.000000e-01 : f32
    %65 = vector.broadcast %cst_34 : f32 to vector<8x128xf32>
    %66 = arith.addf %64, %65 : vector<8x128xf32>
    %67 = vector.extract_strided_slice %58 {offsets = [0, 128], sizes = [8, 128], strides = [1, 1]} : vector<8x512xf32> to vector<8x128xf32>
    %cst_35 = arith.constant 5.000000e-01 : f32
    %68 = vector.broadcast %cst_35 : f32 to vector<8x128xf32>
    %69 = arith.mulf %68, %67 : vector<8x128xf32>
    %70 = math.tanh %69 : vector<8x128xf32>
    %cst_36 = arith.constant 5.000000e-01 : f32
    %71 = vector.broadcast %cst_36 : f32 to vector<8x128xf32>
    %72 = arith.mulf %71, %70 : vector<8x128xf32>
    %cst_37 = arith.constant 5.000000e-01 : f32
    %73 = vector.broadcast %cst_37 : f32 to vector<8x128xf32>
    %74 = arith.addf %72, %73 : vector<8x128xf32>
    %75 = vector.extract_strided_slice %58 {offsets = [0, 256], sizes = [8, 128], strides = [1, 1]} : vector<8x512xf32> to vector<8x128xf32>
    %76 = math.tanh %75 : vector<8x128xf32>
    %77 = vector.extract_strided_slice %58 {offsets = [0, 384], sizes = [8, 128], strides = [1, 1]} : vector<8x512xf32> to vector<8x128xf32>
    %cst_38 = arith.constant 5.000000e-01 : f32
    %78 = vector.broadcast %cst_38 : f32 to vector<8x128xf32>
    %79 = arith.mulf %78, %77 : vector<8x128xf32>
    %80 = math.tanh %79 : vector<8x128xf32>
    %cst_39 = arith.constant 5.000000e-01 : f32
    %81 = vector.broadcast %cst_39 : f32 to vector<8x128xf32>
    %82 = arith.mulf %81, %80 : vector<8x128xf32>
    %cst_40 = arith.constant 5.000000e-01 : f32
    %83 = vector.broadcast %cst_40 : f32 to vector<8x128xf32>
    %84 = arith.addf %82, %83 : vector<8x128xf32>
    %85 = arith.mulf %74, %46 : vector<8x128xf32>
    %86 = arith.mulf %66, %76 : vector<8x128xf32>
    %87 = arith.addf %85, %86 : vector<8x128xf32>
    %88 = math.tanh %87 : vector<8x128xf32>
    %89 = arith.mulf %84, %88 : vector<8x128xf32>
    %90 = arith.index_cast %52 : i32 to index
    %c0_41 = arith.constant 0 : index
    %91 = vector.load %arg12[%90, %c0_41] : memref<64x128xf32, #tpu.memory_space<vmem>>, vector<8x128xf32>
    tpu.vector_store %arg12[%90, %c0_41], %89 {strides = array<i32>} : memref<64x128xf32, #tpu.memory_space<vmem>>, vector<8x128xf32>,
    %c2_i32 = arith.constant 2 : i32
    %c8_i32_42 = arith.constant 8 : i32
    %92 = arith.muli %c2_i32, %c8_i32_42 : i32
    %93 = tpu.assume_multiple %92, 8 : i32
    %94 = arith.index_cast %93 : i32 to index
    %c0_43 = arith.constant 0 : index
    %95 = vector.load %arg11[%94, %c0_43] : memref<64x512xf32, #tpu.memory_space<vmem>>, vector<8x512xf32>
    %96 = arith.truncf %89 : vector<8x128xf32> to vector<8x128xbf16>
    %c0_44 = arith.constant 0 : index
    %c0_45 = arith.constant 0 : index
    %97 = vector.load %arg6[%c0_44, %c0_45] : memref<128x512xbf16, #tpu.memory_space<vmem>>, vector<128x512xbf16>
    %cst_46 = arith.constant dense<0.000000e+00> : vector<8x512xf32>
    %98 = tpu.matmul %96, %97, %cst_46 {dimension_numbers = #tpu.dot_dimension_numbers<[1], [0], [0], [1], [0, 0, 1, 1], [], []>} : vector<8x128xbf16>, vector<128x512xbf16>, vector<8x512xf32> -> vector<8x512xf32>
    %99 = arith.addf %95, %98 : vector<8x512xf32>
    %100 = vector.extract_strided_slice %99 {offsets = [0, 0], sizes = [8, 128], strides = [1, 1]} : vector<8x512xf32> to vector<8x128xf32>
    %cst_47 = arith.constant 5.000000e-01 : f32
    %101 = vector.broadcast %cst_47 : f32 to vector<8x128xf32>
    %102 = arith.mulf %101, %100 : vector<8x128xf32>
    %103 = math.tanh %102 : vector<8x128xf32>
    %cst_48 = arith.constant 5.000000e-01 : f32
    %104 = vector.broadcast %cst_48 : f32 to vector<8x128xf32>
    %105 = arith.mulf %104, %103 : vector<8x128xf32>
    %cst_49 = arith.constant 5.000000e-01 : f32
    %106 = vector.broadcast %cst_49 : f32 to vector<8x128xf32>
    %107 = arith.addf %105, %106 : vector<8x128xf32>
    %108 = vector.extract_strided_slice %99 {offsets = [0, 128], sizes = [8, 128], strides = [1, 1]} : vector<8x512xf32> to vector<8x128xf32>
    %cst_50 = arith.constant 5.000000e-01 : f32
    %109 = vector.broadcast %cst_50 : f32 to vector<8x128xf32>
    %110 = arith.mulf %109, %108 : vector<8x128xf32>
    %111 = math.tanh %110 : vector<8x128xf32>
    %cst_51 = arith.constant 5.000000e-01 : f32
    %112 = vector.broadcast %cst_51 : f32 to vector<8x128xf32>
    %113 = arith.mulf %112, %111 : vector<8x128xf32>
    %cst_52 = arith.constant 5.000000e-01 : f32
    %114 = vector.broadcast %cst_52 : f32 to vector<8x128xf32>
    %115 = arith.addf %113, %114 : vector<8x128xf32>
    %116 = vector.extract_strided_slice %99 {offsets = [0, 256], sizes = [8, 128], strides = [1, 1]} : vector<8x512xf32> to vector<8x128xf32>
    %117 = math.tanh %116 : vector<8x128xf32>
    %118 = vector.extract_strided_slice %99 {offsets = [0, 384], sizes = [8, 128], strides = [1, 1]} : vector<8x512xf32> to vector<8x128xf32>
    %cst_53 = arith.constant 5.000000e-01 : f32
    %119 = vector.broadcast %cst_53 : f32 to vector<8x128xf32>
    %120 = arith.mulf %119, %118 : vector<8x128xf32>
    %121 = math.tanh %120 : vector<8x128xf32>
    %cst_54 = arith.constant 5.000000e-01 : f32
    %122 = vector.broadcast %cst_54 : f32 to vector<8x128xf32>
    %123 = arith.mulf %122, %121 : vector<8x128xf32>
    %cst_55 = arith.constant 5.000000e-01 : f32
    %124 = vector.broadcast %cst_55 : f32 to vector<8x128xf32>
    %125 = arith.addf %123, %124 : vector<8x128xf32>
    %126 = arith.mulf %115, %87 : vector<8x128xf32>
    %127 = arith.mulf %107, %117 : vector<8x128xf32>
    %128 = arith.addf %126, %127 : vector<8x128xf32>
    %129 = math.tanh %128 : vector<8x128xf32>
    %130 = arith.mulf %125, %129 : vector<8x128xf32>
    %131 = arith.index_cast %93 : i32 to index
    %c0_56 = arith.constant 0 : index
    %132 = vector.load %arg12[%131, %c0_56] : memref<64x128xf32, #tpu.memory_space<vmem>>, vector<8x128xf32>
    tpu.vector_store %arg12[%131, %c0_56], %130 {strides = array<i32>} : memref<64x128xf32, #tpu.memory_space<vmem>>, vector<8x128xf32>,
    %c3_i32 = arith.constant 3 : i32
    %c8_i32_57 = arith.constant 8 : i32
    %133 = arith.muli %c3_i32, %c8_i32_57 : i32
    %134 = tpu.assume_multiple %133, 8 : i32
    %135 = arith.index_cast %134 : i32 to index
    %c0_58 = arith.constant 0 : index
    %136 = vector.load %arg11[%135, %c0_58] : memref<64x512xf32, #tpu.memory_space<vmem>>, vector<8x512xf32>
    %137 = arith.truncf %130 : vector<8x128xf32> to vector<8x128xbf16>
    %c0_59 = arith.constant 0 : index
    %c0_60 = arith.constant 0 : index
    %138 = vector.load %arg6[%c0_59, %c0_60] : memref<128x512xbf16, #tpu.memory_space<vmem>>, vector<128x512xbf16>
    %cst_61 = arith.constant dense<0.000000e+00> : vector<8x512xf32>
    %139 = tpu.matmul %137, %138, %cst_61 {dimension_numbers = #tpu.dot_dimension_numbers<[1], [0], [0], [1], [0, 0, 1, 1], [], []>} : vector<8x128xbf16>, vector<128x512xbf16>, vector<8x512xf32> -> vector<8x512xf32>
    %140 = arith.addf %136, %139 : vector<8x512xf32>
    %141 = vector.extract_strided_slice %140 {offsets = [0, 0], sizes = [8, 128], strides = [1, 1]} : vector<8x512xf32> to vector<8x128xf32>
    %cst_62 = arith.constant 5.000000e-01 : f32
    %142 = vector.broadcast %cst_62 : f32 to vector<8x128xf32>
    %143 = arith.mulf %142, %141 : vector<8x128xf32>
    %144 = math.tanh %143 : vector<8x128xf32>
    %cst_63 = arith.constant 5.000000e-01 : f32
    %145 = vector.broadcast %cst_63 : f32 to vector<8x128xf32>
    %146 = arith.mulf %145, %144 : vector<8x128xf32>
    %cst_64 = arith.constant 5.000000e-01 : f32
    %147 = vector.broadcast %cst_64 : f32 to vector<8x128xf32>
    %148 = arith.addf %146, %147 : vector<8x128xf32>
    %149 = vector.extract_strided_slice %140 {offsets = [0, 128], sizes = [8, 128], strides = [1, 1]} : vector<8x512xf32> to vector<8x128xf32>
    %cst_65 = arith.constant 5.000000e-01 : f32
    %150 = vector.broadcast %cst_65 : f32 to vector<8x128xf32>
    %151 = arith.mulf %150, %149 : vector<8x128xf32>
    %152 = math.tanh %151 : vector<8x128xf32>
    %cst_66 = arith.constant 5.000000e-01 : f32
    %153 = vector.broadcast %cst_66 : f32 to vector<8x128xf32>
    %154 = arith.mulf %153, %152 : vector<8x128xf32>
    %cst_67 = arith.constant 5.000000e-01 : f32
    %155 = vector.broadcast %cst_67 : f32 to vector<8x128xf32>
    %156 = arith.addf %154, %155 : vector<8x128xf32>
    %157 = vector.extract_strided_slice %140 {offsets = [0, 256], sizes = [8, 128], strides = [1, 1]} : vector<8x512xf32> to vector<8x128xf32>
    %158 = math.tanh %157 : vector<8x128xf32>
    %159 = vector.extract_strided_slice %140 {offsets = [0, 384], sizes = [8, 128], strides = [1, 1]} : vector<8x512xf32> to vector<8x128xf32>
    %cst_68 = arith.constant 5.000000e-01 : f32
    %160 = vector.broadcast %cst_68 : f32 to vector<8x128xf32>
    %161 = arith.mulf %160, %159 : vector<8x128xf32>
    %162 = math.tanh %161 : vector<8x128xf32>
    %cst_69 = arith.constant 5.000000e-01 : f32
    %163 = vector.broadcast %cst_69 : f32 to vector<8x128xf32>
    %164 = arith.mulf %163, %162 : vector<8x128xf32>
    %cst_70 = arith.constant 5.000000e-01 : f32
    %165 = vector.broadcast %cst_70 : f32 to vector<8x128xf32>
    %166 = arith.addf %164, %165 : vector<8x128xf32>
    %167 = arith.mulf %156, %128 : vector<8x128xf32>
    %168 = arith.mulf %148, %158 : vector<8x128xf32>
    %169 = arith.addf %167, %168 : vector<8x128xf32>
    %170 = math.tanh %169 : vector<8x128xf32>
    %171 = arith.mulf %166, %170 : vector<8x128xf32>
    %172 = arith.index_cast %134 : i32 to index
    %c0_71 = arith.constant 0 : index
    %173 = vector.load %arg12[%172, %c0_71] : memref<64x128xf32, #tpu.memory_space<vmem>>, vector<8x128xf32>
    tpu.vector_store %arg12[%172, %c0_71], %171 {strides = array<i32>} : memref<64x128xf32, #tpu.memory_space<vmem>>, vector<8x128xf32>,
    %c4_i32 = arith.constant 4 : i32
    %c8_i32_72 = arith.constant 8 : i32
    %174 = arith.muli %c4_i32, %c8_i32_72 : i32
    %175 = tpu.assume_multiple %174, 8 : i32
    %176 = arith.index_cast %175 : i32 to index
    %c0_73 = arith.constant 0 : index
    %177 = vector.load %arg11[%176, %c0_73] : memref<64x512xf32, #tpu.memory_space<vmem>>, vector<8x512xf32>
    %178 = arith.truncf %171 : vector<8x128xf32> to vector<8x128xbf16>
    %c0_74 = arith.constant 0 : index
    %c0_75 = arith.constant 0 : index
    %179 = vector.load %arg6[%c0_74, %c0_75] : memref<128x512xbf16, #tpu.memory_space<vmem>>, vector<128x512xbf16>
    %cst_76 = arith.constant dense<0.000000e+00> : vector<8x512xf32>
    %180 = tpu.matmul %178, %179, %cst_76 {dimension_numbers = #tpu.dot_dimension_numbers<[1], [0], [0], [1], [0, 0, 1, 1], [], []>} : vector<8x128xbf16>, vector<128x512xbf16>, vector<8x512xf32> -> vector<8x512xf32>
    %181 = arith.addf %177, %180 : vector<8x512xf32>
    %182 = vector.extract_strided_slice %181 {offsets = [0, 0], sizes = [8, 128], strides = [1, 1]} : vector<8x512xf32> to vector<8x128xf32>
    %cst_77 = arith.constant 5.000000e-01 : f32
    %183 = vector.broadcast %cst_77 : f32 to vector<8x128xf32>
    %184 = arith.mulf %183, %182 : vector<8x128xf32>
    %185 = math.tanh %184 : vector<8x128xf32>
    %cst_78 = arith.constant 5.000000e-01 : f32
    %186 = vector.broadcast %cst_78 : f32 to vector<8x128xf32>
    %187 = arith.mulf %186, %185 : vector<8x128xf32>
    %cst_79 = arith.constant 5.000000e-01 : f32
    %188 = vector.broadcast %cst_79 : f32 to vector<8x128xf32>
    %189 = arith.addf %187, %188 : vector<8x128xf32>
    %190 = vector.extract_strided_slice %181 {offsets = [0, 128], sizes = [8, 128], strides = [1, 1]} : vector<8x512xf32> to vector<8x128xf32>
    %cst_80 = arith.constant 5.000000e-01 : f32
    %191 = vector.broadcast %cst_80 : f32 to vector<8x128xf32>
    %192 = arith.mulf %191, %190 : vector<8x128xf32>
    %193 = math.tanh %192 : vector<8x128xf32>
    %cst_81 = arith.constant 5.000000e-01 : f32
    %194 = vector.broadcast %cst_81 : f32 to vector<8x128xf32>
    %195 = arith.mulf %194, %193 : vector<8x128xf32>
    %cst_82 = arith.constant 5.000000e-01 : f32
    %196 = vector.broadcast %cst_82 : f32 to vector<8x128xf32>
    %197 = arith.addf %195, %196 : vector<8x128xf32>
    %198 = vector.extract_strided_slice %181 {offsets = [0, 256], sizes = [8, 128], strides = [1, 1]} : vector<8x512xf32> to vector<8x128xf32>
    %199 = math.tanh %198 : vector<8x128xf32>
    %200 = vector.extract_strided_slice %181 {offsets = [0, 384], sizes = [8, 128], strides = [1, 1]} : vector<8x512xf32> to vector<8x128xf32>
    %cst_83 = arith.constant 5.000000e-01 : f32
    %201 = vector.broadcast %cst_83 : f32 to vector<8x128xf32>
    %202 = arith.mulf %201, %200 : vector<8x128xf32>
    %203 = math.tanh %202 : vector<8x128xf32>
    %cst_84 = arith.constant 5.000000e-01 : f32
    %204 = vector.broadcast %cst_84 : f32 to vector<8x128xf32>
    %205 = arith.mulf %204, %203 : vector<8x128xf32>
    %cst_85 = arith.constant 5.000000e-01 : f32
    %206 = vector.broadcast %cst_85 : f32 to vector<8x128xf32>
    %207 = arith.addf %205, %206 : vector<8x128xf32>
    %208 = arith.mulf %197, %169 : vector<8x128xf32>
    %209 = arith.mulf %189, %199 : vector<8x128xf32>
    %210 = arith.addf %208, %209 : vector<8x128xf32>
    %211 = math.tanh %210 : vector<8x128xf32>
    %212 = arith.mulf %207, %211 : vector<8x128xf32>
    %213 = arith.index_cast %175 : i32 to index
    %c0_86 = arith.constant 0 : index
    %214 = vector.load %arg12[%213, %c0_86] : memref<64x128xf32, #tpu.memory_space<vmem>>, vector<8x128xf32>
    tpu.vector_store %arg12[%213, %c0_86], %212 {strides = array<i32>} : memref<64x128xf32, #tpu.memory_space<vmem>>, vector<8x128xf32>,
    %c5_i32 = arith.constant 5 : i32
    %c8_i32_87 = arith.constant 8 : i32
    %215 = arith.muli %c5_i32, %c8_i32_87 : i32
    %216 = tpu.assume_multiple %215, 8 : i32
    %217 = arith.index_cast %216 : i32 to index
    %c0_88 = arith.constant 0 : index
    %218 = vector.load %arg11[%217, %c0_88] : memref<64x512xf32, #tpu.memory_space<vmem>>, vector<8x512xf32>
    %219 = arith.truncf %212 : vector<8x128xf32> to vector<8x128xbf16>
    %c0_89 = arith.constant 0 : index
    %c0_90 = arith.constant 0 : index
    %220 = vector.load %arg6[%c0_89, %c0_90] : memref<128x512xbf16, #tpu.memory_space<vmem>>, vector<128x512xbf16>
    %cst_91 = arith.constant dense<0.000000e+00> : vector<8x512xf32>
    %221 = tpu.matmul %219, %220, %cst_91 {dimension_numbers = #tpu.dot_dimension_numbers<[1], [0], [0], [1], [0, 0, 1, 1], [], []>} : vector<8x128xbf16>, vector<128x512xbf16>, vector<8x512xf32> -> vector<8x512xf32>
    %222 = arith.addf %218, %221 : vector<8x512xf32>
    %223 = vector.extract_strided_slice %222 {offsets = [0, 0], sizes = [8, 128], strides = [1, 1]} : vector<8x512xf32> to vector<8x128xf32>
    %cst_92 = arith.constant 5.000000e-01 : f32
    %224 = vector.broadcast %cst_92 : f32 to vector<8x128xf32>
    %225 = arith.mulf %224, %223 : vector<8x128xf32>
    %226 = math.tanh %225 : vector<8x128xf32>
    %cst_93 = arith.constant 5.000000e-01 : f32
    %227 = vector.broadcast %cst_93 : f32 to vector<8x128xf32>
    %228 = arith.mulf %227, %226 : vector<8x128xf32>
    %cst_94 = arith.constant 5.000000e-01 : f32
    %229 = vector.broadcast %cst_94 : f32 to vector<8x128xf32>
    %230 = arith.addf %228, %229 : vector<8x128xf32>
    %231 = vector.extract_strided_slice %222 {offsets = [0, 128], sizes = [8, 128], strides = [1, 1]} : vector<8x512xf32> to vector<8x128xf32>
    %cst_95 = arith.constant 5.000000e-01 : f32
    %232 = vector.broadcast %cst_95 : f32 to vector<8x128xf32>
    %233 = arith.mulf %232, %231 : vector<8x128xf32>
    %234 = math.tanh %233 : vector<8x128xf32>
    %cst_96 = arith.constant 5.000000e-01 : f32
    %235 = vector.broadcast %cst_96 : f32 to vector<8x128xf32>
    %236 = arith.mulf %235, %234 : vector<8x128xf32>
    %cst_97 = arith.constant 5.000000e-01 : f32
    %237 = vector.broadcast %cst_97 : f32 to vector<8x128xf32>
    %238 = arith.addf %236, %237 : vector<8x128xf32>
    %239 = vector.extract_strided_slice %222 {offsets = [0, 256], sizes = [8, 128], strides = [1, 1]} : vector<8x512xf32> to vector<8x128xf32>
    %240 = math.tanh %239 : vector<8x128xf32>
    %241 = vector.extract_strided_slice %222 {offsets = [0, 384], sizes = [8, 128], strides = [1, 1]} : vector<8x512xf32> to vector<8x128xf32>
    %cst_98 = arith.constant 5.000000e-01 : f32
    %242 = vector.broadcast %cst_98 : f32 to vector<8x128xf32>
    %243 = arith.mulf %242, %241 : vector<8x128xf32>
    %244 = math.tanh %243 : vector<8x128xf32>
    %cst_99 = arith.constant 5.000000e-01 : f32
    %245 = vector.broadcast %cst_99 : f32 to vector<8x128xf32>
    %246 = arith.mulf %245, %244 : vector<8x128xf32>
    %cst_100 = arith.constant 5.000000e-01 : f32
    %247 = vector.broadcast %cst_100 : f32 to vector<8x128xf32>
    %248 = arith.addf %246, %247 : vector<8x128xf32>
    %249 = arith.mulf %238, %210 : vector<8x128xf32>
    %250 = arith.mulf %230, %240 : vector<8x128xf32>
    %251 = arith.addf %249, %250 : vector<8x128xf32>
    %252 = math.tanh %251 : vector<8x128xf32>
    %253 = arith.mulf %248, %252 : vector<8x128xf32>
    %254 = arith.index_cast %216 : i32 to index
    %c0_101 = arith.constant 0 : index
    %255 = vector.load %arg12[%254, %c0_101] : memref<64x128xf32, #tpu.memory_space<vmem>>, vector<8x128xf32>
    tpu.vector_store %arg12[%254, %c0_101], %253 {strides = array<i32>} : memref<64x128xf32, #tpu.memory_space<vmem>>, vector<8x128xf32>,
    %c6_i32 = arith.constant 6 : i32
    %c8_i32_102 = arith.constant 8 : i32
    %256 = arith.muli %c6_i32, %c8_i32_102 : i32
    %257 = tpu.assume_multiple %256, 8 : i32
    %258 = arith.index_cast %257 : i32 to index
    %c0_103 = arith.constant 0 : index
    %259 = vector.load %arg11[%258, %c0_103] : memref<64x512xf32, #tpu.memory_space<vmem>>, vector<8x512xf32>
    %260 = arith.truncf %253 : vector<8x128xf32> to vector<8x128xbf16>
    %c0_104 = arith.constant 0 : index
    %c0_105 = arith.constant 0 : index
    %261 = vector.load %arg6[%c0_104, %c0_105] : memref<128x512xbf16, #tpu.memory_space<vmem>>, vector<128x512xbf16>
    %cst_106 = arith.constant dense<0.000000e+00> : vector<8x512xf32>
    %262 = tpu.matmul %260, %261, %cst_106 {dimension_numbers = #tpu.dot_dimension_numbers<[1], [0], [0], [1], [0, 0, 1, 1], [], []>} : vector<8x128xbf16>, vector<128x512xbf16>, vector<8x512xf32> -> vector<8x512xf32>
    %263 = arith.addf %259, %262 : vector<8x512xf32>
    %264 = vector.extract_strided_slice %263 {offsets = [0, 0], sizes = [8, 128], strides = [1, 1]} : vector<8x512xf32> to vector<8x128xf32>
    %cst_107 = arith.constant 5.000000e-01 : f32
    %265 = vector.broadcast %cst_107 : f32 to vector<8x128xf32>
    %266 = arith.mulf %265, %264 : vector<8x128xf32>
    %267 = math.tanh %266 : vector<8x128xf32>
    %cst_108 = arith.constant 5.000000e-01 : f32
    %268 = vector.broadcast %cst_108 : f32 to vector<8x128xf32>
    %269 = arith.mulf %268, %267 : vector<8x128xf32>
    %cst_109 = arith.constant 5.000000e-01 : f32
    %270 = vector.broadcast %cst_109 : f32 to vector<8x128xf32>
    %271 = arith.addf %269, %270 : vector<8x128xf32>
    %272 = vector.extract_strided_slice %263 {offsets = [0, 128], sizes = [8, 128], strides = [1, 1]} : vector<8x512xf32> to vector<8x128xf32>
    %cst_110 = arith.constant 5.000000e-01 : f32
    %273 = vector.broadcast %cst_110 : f32 to vector<8x128xf32>
    %274 = arith.mulf %273, %272 : vector<8x128xf32>
    %275 = math.tanh %274 : vector<8x128xf32>
    %cst_111 = arith.constant 5.000000e-01 : f32
    %276 = vector.broadcast %cst_111 : f32 to vector<8x128xf32>
    %277 = arith.mulf %276, %275 : vector<8x128xf32>
    %cst_112 = arith.constant 5.000000e-01 : f32
    %278 = vector.broadcast %cst_112 : f32 to vector<8x128xf32>
    %279 = arith.addf %277, %278 : vector<8x128xf32>
    %280 = vector.extract_strided_slice %263 {offsets = [0, 256], sizes = [8, 128], strides = [1, 1]} : vector<8x512xf32> to vector<8x128xf32>
    %281 = math.tanh %280 : vector<8x128xf32>
    %282 = vector.extract_strided_slice %263 {offsets = [0, 384], sizes = [8, 128], strides = [1, 1]} : vector<8x512xf32> to vector<8x128xf32>
    %cst_113 = arith.constant 5.000000e-01 : f32
    %283 = vector.broadcast %cst_113 : f32 to vector<8x128xf32>
    %284 = arith.mulf %283, %282 : vector<8x128xf32>
    %285 = math.tanh %284 : vector<8x128xf32>
    %cst_114 = arith.constant 5.000000e-01 : f32
    %286 = vector.broadcast %cst_114 : f32 to vector<8x128xf32>
    %287 = arith.mulf %286, %285 : vector<8x128xf32>
    %cst_115 = arith.constant 5.000000e-01 : f32
    %288 = vector.broadcast %cst_115 : f32 to vector<8x128xf32>
    %289 = arith.addf %287, %288 : vector<8x128xf32>
    %290 = arith.mulf %279, %251 : vector<8x128xf32>
    %291 = arith.mulf %271, %281 : vector<8x128xf32>
    %292 = arith.addf %290, %291 : vector<8x128xf32>
    %293 = math.tanh %292 : vector<8x128xf32>
    %294 = arith.mulf %289, %293 : vector<8x128xf32>
    %295 = arith.index_cast %257 : i32 to index
    %c0_116 = arith.constant 0 : index
    %296 = vector.load %arg12[%295, %c0_116] : memref<64x128xf32, #tpu.memory_space<vmem>>, vector<8x128xf32>
    tpu.vector_store %arg12[%295, %c0_116], %294 {strides = array<i32>} : memref<64x128xf32, #tpu.memory_space<vmem>>, vector<8x128xf32>,
    %c7_i32 = arith.constant 7 : i32
    %c8_i32_117 = arith.constant 8 : i32
    %297 = arith.muli %c7_i32, %c8_i32_117 : i32
    %298 = tpu.assume_multiple %297, 8 : i32
    %299 = arith.index_cast %298 : i32 to index
    %c0_118 = arith.constant 0 : index
    %300 = vector.load %arg11[%299, %c0_118] : memref<64x512xf32, #tpu.memory_space<vmem>>, vector<8x512xf32>
    %301 = arith.truncf %294 : vector<8x128xf32> to vector<8x128xbf16>
    %c0_119 = arith.constant 0 : index
    %c0_120 = arith.constant 0 : index
    %302 = vector.load %arg6[%c0_119, %c0_120] : memref<128x512xbf16, #tpu.memory_space<vmem>>, vector<128x512xbf16>
    %cst_121 = arith.constant dense<0.000000e+00> : vector<8x512xf32>
    %303 = tpu.matmul %301, %302, %cst_121 {dimension_numbers = #tpu.dot_dimension_numbers<[1], [0], [0], [1], [0, 0, 1, 1], [], []>} : vector<8x128xbf16>, vector<128x512xbf16>, vector<8x512xf32> -> vector<8x512xf32>
    %304 = arith.addf %300, %303 : vector<8x512xf32>
    %305 = vector.extract_strided_slice %304 {offsets = [0, 0], sizes = [8, 128], strides = [1, 1]} : vector<8x512xf32> to vector<8x128xf32>
    %cst_122 = arith.constant 5.000000e-01 : f32
    %306 = vector.broadcast %cst_122 : f32 to vector<8x128xf32>
    %307 = arith.mulf %306, %305 : vector<8x128xf32>
    %308 = math.tanh %307 : vector<8x128xf32>
    %cst_123 = arith.constant 5.000000e-01 : f32
    %309 = vector.broadcast %cst_123 : f32 to vector<8x128xf32>
    %310 = arith.mulf %309, %308 : vector<8x128xf32>
    %cst_124 = arith.constant 5.000000e-01 : f32
    %311 = vector.broadcast %cst_124 : f32 to vector<8x128xf32>
    %312 = arith.addf %310, %311 : vector<8x128xf32>
    %313 = vector.extract_strided_slice %304 {offsets = [0, 128], sizes = [8, 128], strides = [1, 1]} : vector<8x512xf32> to vector<8x128xf32>
    %cst_125 = arith.constant 5.000000e-01 : f32
    %314 = vector.broadcast %cst_125 : f32 to vector<8x128xf32>
    %315 = arith.mulf %314, %313 : vector<8x128xf32>
    %316 = math.tanh %315 : vector<8x128xf32>
    %cst_126 = arith.constant 5.000000e-01 : f32
    %317 = vector.broadcast %cst_126 : f32 to vector<8x128xf32>
    %318 = arith.mulf %317, %316 : vector<8x128xf32>
    %cst_127 = arith.constant 5.000000e-01 : f32
    %319 = vector.broadcast %cst_127 : f32 to vector<8x128xf32>
    %320 = arith.addf %318, %319 : vector<8x128xf32>
    %321 = vector.extract_strided_slice %304 {offsets = [0, 256], sizes = [8, 128], strides = [1, 1]} : vector<8x512xf32> to vector<8x128xf32>
    %322 = math.tanh %321 : vector<8x128xf32>
    %323 = vector.extract_strided_slice %304 {offsets = [0, 384], sizes = [8, 128], strides = [1, 1]} : vector<8x512xf32> to vector<8x128xf32>
    %cst_128 = arith.constant 5.000000e-01 : f32
    %324 = vector.broadcast %cst_128 : f32 to vector<8x128xf32>
    %325 = arith.mulf %324, %323 : vector<8x128xf32>
    %326 = math.tanh %325 : vector<8x128xf32>
    %cst_129 = arith.constant 5.000000e-01 : f32
    %327 = vector.broadcast %cst_129 : f32 to vector<8x128xf32>
    %328 = arith.mulf %327, %326 : vector<8x128xf32>
    %cst_130 = arith.constant 5.000000e-01 : f32
    %329 = vector.broadcast %cst_130 : f32 to vector<8x128xf32>
    %330 = arith.addf %328, %329 : vector<8x128xf32>
    %331 = arith.mulf %320, %292 : vector<8x128xf32>
    %332 = arith.mulf %312, %322 : vector<8x128xf32>
    %333 = arith.addf %331, %332 : vector<8x128xf32>
    %334 = math.tanh %333 : vector<8x128xf32>
    %335 = arith.mulf %330, %334 : vector<8x128xf32>
    %336 = arith.index_cast %298 : i32 to index
    %c0_131 = arith.constant 0 : index
    %337 = vector.load %arg12[%336, %c0_131] : memref<64x128xf32, #tpu.memory_space<vmem>>, vector<8x128xf32>
    tpu.vector_store %arg12[%336, %c0_131], %335 {strides = array<i32>} : memref<64x128xf32, #tpu.memory_space<vmem>>, vector<8x128xf32>,
    %c8_i32_132 = arith.constant 8 : i32
    %c0_133 = arith.constant 0 : index
    %c0_134 = arith.constant 0 : index
    %338 = vector.load %arg13[%c0_133, %c0_134] : memref<8x128xf32, #tpu.memory_space<vmem>>, vector<8x128xf32>
    tpu.vector_store %arg13[%c0_133, %c0_134], %335 {strides = array<i32>} : memref<8x128xf32, #tpu.memory_space<vmem>>, vector<8x128xf32>,
    %c0_135 = arith.constant 0 : index
    %c0_136 = arith.constant 0 : index
    %339 = vector.load %arg14[%c0_135, %c0_136] : memref<8x128xf32, #tpu.memory_space<vmem>>, vector<8x128xf32>
    tpu.vector_store %arg14[%c0_135, %c0_136], %333 {strides = array<i32>} : memref<8x128xf32, #tpu.memory_space<vmem>>, vector<8x128xf32>,
    %c0_137 = arith.constant 0 : index
    %c0_138 = arith.constant 0 : index
    %340 = vector.load %arg12[%c0_137, %c0_138] : memref<64x128xf32, #tpu.memory_space<vmem>>, vector<64x128xf32>
    %341 = arith.truncf %340 : vector<64x128xf32> to vector<64x128xbf16>
    %c0_139 = arith.constant 0 : index
    %c0_140 = arith.constant 0 : index
    %342 = vector.load %arg7[%c0_139, %c0_140] : memref<128x128xbf16, #tpu.memory_space<vmem>>, vector<128x128xbf16>
    %cst_141 = arith.constant dense<0.000000e+00> : vector<64x128xf32>
    %343 = tpu.matmul %341, %342, %cst_141 {dimension_numbers = #tpu.dot_dimension_numbers<[1], [0], [0], [1], [0, 0, 1, 1], [], []>} : vector<64x128xbf16>, vector<128x128xbf16>, vector<64x128xf32> -> vector<64x128xf32>
    %c0_142 = arith.constant 0 : index
    %c0_143 = arith.constant 0 : index
    %c0_144 = arith.constant 0 : index
    %c0_145 = arith.constant 0 : index
    %344 = vector.load %arg8[%c0_142, %c0_143, %c0_144, %c0_145] : memref<1x1x64x128xf32, #tpu.memory_space<vmem>>, vector<1x1x64x128xf32>
    %345 = vector.shape_cast %344 : vector<1x1x64x128xf32> to vector<64x128xf32>
    %346 = vector.shape_cast %343 : vector<64x128xf32> to vector<1x1x64x128xf32>
    tpu.vector_store %arg8[%c0_142, %c0_143, %c0_144, %c0_145], %346 {strides = array<i32>} : memref<1x1x64x128xf32, #tpu.memory_space<vmem>>, vector<1x1x64x128xf32>,
    %c0_i32_146 = arith.constant 0 : i32
    %347 = arith.cmpi eq, %arg1, %c0_i32_146 : i32
    %348 = arith.extui %347 : i1 to i32
    %c0_i32_147 = arith.constant 0 : i32
    %349 = arith.cmpi ne, %348, %c0_i32_147 : i32
    scf.if %349 {
      %c0_148 = arith.constant 0 : index
      %c0_149 = arith.constant 0 : index
      %350 = vector.load %arg9[%c0_148, %c0_149] : memref<8x128xf32, #tpu.memory_space<vmem>>, vector<8x128xf32>
      tpu.vector_store %arg9[%c0_148, %c0_149], %335 {strides = array<i32>} : memref<8x128xf32, #tpu.memory_space<vmem>>, vector<8x128xf32>,
      %c0_150 = arith.constant 0 : index
      %c0_151 = arith.constant 0 : index
      %351 = vector.load %arg10[%c0_150, %c0_151] : memref<8x128xf32, #tpu.memory_space<vmem>>, vector<8x128xf32>
      tpu.vector_store %arg10[%c0_150, %c0_151], %333 {strides = array<i32>} : memref<8x128xf32, #tpu.memory_space<vmem>>, vector<8x128xf32>,
    } else {
    }
    return
  }
  func.func @transform_0(%arg0: i32, %arg1: i32) -> (i32, i32, i32, i32) {
    %c0_i32 = arith.constant 0 : i32
    %c0_i32_0 = arith.constant 0 : i32
    %c0_i32_1 = arith.constant 0 : i32
    return %arg0, %arg1, %c0_i32, %c0_i32_0 : i32, i32, i32, i32
  }
  func.func @transform_1(%arg0: i32, %arg1: i32) -> (i32, i32) {
    %c0_i32 = arith.constant 0 : i32
    %c0_i32_0 = arith.constant 0 : i32
    return %arg0, %c0_i32 : i32, i32
  }
  func.func @transform_2(%arg0: i32, %arg1: i32) -> (i32, i32) {
    %c0_i32 = arith.constant 0 : i32
    %c0_i32_0 = arith.constant 0 : i32
    return %arg0, %c0_i32 : i32, i32
  }
  func.func @transform_3(%arg0: i32, %arg1: i32) -> (i32, i32) {
    %c0_i32 = arith.constant 0 : i32
    %c0_i32_0 = arith.constant 0 : i32
    %c0_i32_1 = arith.constant 0 : i32
    return %c0_i32, %c0_i32_0 : i32, i32
  }
  func.func @transform_4(%arg0: i32, %arg1: i32) -> (i32, i32) {
    %c0_i32 = arith.constant 0 : i32
    %c0_i32_0 = arith.constant 0 : i32
    %c0_i32_1 = arith.constant 0 : i32
    return %c0_i32, %c0_i32_0 : i32, i32
  }
  func.func @transform_5(%arg0: i32, %arg1: i32) -> (i32, i32) {
    %c0_i32 = arith.constant 0 : i32
    %c0_i32_0 = arith.constant 0 : i32
    %c0_i32_1 = arith.constant 0 : i32
    return %c0_i32, %c0_i32_0 : i32, i32
  }
  func.func @transform_6(%arg0: i32, %arg1: i32) -> (i32, i32, i32, i32) {
    %c0_i32 = arith.constant 0 : i32
    %c0_i32_0 = arith.constant 0 : i32
    %c0_i32_1 = arith.constant 0 : i32
    return %arg0, %arg1, %c0_i32, %c0_i32_0 : i32, i32, i32, i32
  }
  func.func @transform_7(%arg0: i32, %arg1: i32) -> (i32, i32) {
    %c0_i32 = arith.constant 0 : i32
    %c0_i32_0 = arith.constant 0 : i32
    return %arg0, %c0_i32 : i32, i32
  }
  func.func @transform_8(%arg0: i32, %arg1: i32) -> (i32, i32) {
    %c0_i32 = arith.constant 0 : i32
    %c0_i32_0 = arith.constant 0 : i32
    return %arg0, %c0_i32 : i32, i32
  }
}

module attributes {stable_mosaic.version = 11 : i64} {
  func.func @_lstm_block_kernel(%arg0: i32, %arg1: i32, %arg2: memref<1x1x64x16xbf16, #tpu.memory_space<vmem>>, %arg3: memref<8x128xf32, #tpu.memory_space<vmem>>, %arg4: memref<8x128xf32, #tpu.memory_space<vmem>>, %arg5: memref<16x512xbf16, #tpu.memory_space<vmem>>, %arg6: memref<128x512xbf16, #tpu.memory_space<vmem>>, %arg7: memref<128x128xbf16, #tpu.memory_space<vmem>>, %arg8: memref<1x1x64x128xf32, #tpu.memory_space<vmem>>, %arg9: memref<8x128xf32, #tpu.memory_space<vmem>>, %arg10: memref<8x128xf32, #tpu.memory_space<vmem>>, %arg11: memref<64x512xf32, #tpu.memory_space<vmem>>, %arg12: memref<64x128xf32, #tpu.memory_space<vmem>>, %arg13: memref<8x128xf32, #tpu.memory_space<vmem>>, %arg14: memref<8x128xf32, #tpu.memory_space<vmem>>) attributes {dimension_semantics = [#tpu.dimension_semantics<parallel>, #tpu.dimension_semantics<arbitrary>], iteration_bounds = array<i64: 1, 1>, scalar_prefetch = 0 : i64, scratch_operands = 4 : i64, tpu.core_type = #tpu.core_type<tc>, window_params = [{transform_indices = @transform_0, window_bounds = array<i64: 1, 1, 64, 16>}, {transform_indices = @transform_1, window_bounds = array<i64: 8, 128>}, {transform_indices = @transform_2, window_bounds = array<i64: 8, 128>}, {pipeline_mode = #tpu.pipeline_mode<synchronous>, transform_indices = @transform_3, window_bounds = array<i64: 16, 512>}, {pipeline_mode = #tpu.pipeline_mode<synchronous>, transform_indices = @transform_4, window_bounds = array<i64: 128, 512>}, {pipeline_mode = #tpu.pipeline_mode<synchronous>, transform_indices = @transform_5, window_bounds = array<i64: 128, 128>}, {transform_indices = @transform_6, window_bounds = array<i64: 1, 1, 64, 128>}, {transform_indices = @transform_7, window_bounds = array<i64: 8, 128>}, {transform_indices = @transform_8, window_bounds = array<i64: 8, 128>}]} {
    %c0_i32 = arith.constant 0 : i32
    %0 = arith.cmpi eq, %arg1, %c0_i32 : i32
    %1 = arith.extui %0 : i1 to i32
    %c0_i32_0 = arith.constant 0 : i32
    %2 = arith.cmpi ne, %1, %c0_i32_0 : i32
    scf.if %2 {
      %c0_148 = arith.constant 0 : index
      %c0_149 = arith.constant 0 : index
      %350 = vector.load %arg3[%c0_148, %c0_149] : memref<8x128xf32, #tpu.memory_space<vmem>>, vector<8x128xf32>
      %c0_150 = arith.constant 0 : index
      %c0_151 = arith.constant 0 : index
      %351 = vector.load %arg13[%c0_150, %c0_151] : memref<8x128xf32, #tpu.memory_space<vmem>>, vector<8x128xf32>
      tpu.vector_store %arg13[%c0_150, %c0_151], %350 {strides = array<i32>} : memref<8x128xf32, #tpu.memory_space<vmem>>, vector<8x128xf32>,
      %c0_152 = arith.constant 0 : index
      %c0_153 = arith.constant 0 : index
      %352 = vector.load %arg4[%c0_152, %c0_153] : memref<8x128xf32, #tpu.memory_space<vmem>>, vector<8x128xf32>
      %c0_154 = arith.constant 0 : index
      %c0_155 = arith.constant 0 : index
      %353 = vector.load %arg14[%c0_154, %c0_155] : memref<8x128xf32, #tpu.memory_space<vmem>>, vector<8x128xf32>
      tpu.vector_store %arg14[%c0_154, %c0_155], %352 {strides = array<i32>} : memref<8x128xf32, #tpu.memory_space<vmem>>, vector<8x128xf32>,
    } else {
    }
    %c0 = arith.constant 0 : index
    %c0_1 = arith.constant 0 : index
    %c0_2 = arith.constant 0 : index
    %c0_3 = arith.constant 0 : index
    %3 = vector.load %arg2[%c0, %c0_1, %c0_2, %c0_3] : memref<1x1x64x16xbf16, #tpu.memory_space<vmem>>, vector<1x1x64x16xbf16>
    %4 = vector.shape_cast %3 : vector<1x1x64x16xbf16> to vector<64x16xbf16>
    %c0_4 = arith.constant 0 : index
    %c0_5 = arith.constant 0 : index
    %5 = vector.load %arg5[%c0_4, %c0_5] : memref<16x512xbf16, #tpu.memory_space<vmem>>, vector<16x512xbf16>
    %cst = arith.constant dense<0.000000e+00> : vector<64x512xf32>
    %6 = tpu.matmul %4, %5, %cst {dimension_numbers = #tpu.dot_dimension_numbers<[1], [0], [0], [1], [0, 0, 1, 1], [], []>} : vector<64x16xbf16>, vector<16x512xbf16>, vector<64x512xf32> -> vector<64x512xf32>
    %c0_6 = arith.constant 0 : index
    %c0_7 = arith.constant 0 : index
    %7 = vector.load %arg11[%c0_6, %c0_7] : memref<64x512xf32, #tpu.memory_space<vmem>>, vector<64x512xf32>
    tpu.vector_store %arg11[%c0_6, %c0_7], %6 {strides = array<i32>} : memref<64x512xf32, #tpu.memory_space<vmem>>, vector<64x512xf32>,
    %c0_8 = arith.constant 0 : index
    %c0_9 = arith.constant 0 : index
    %8 = vector.load %arg13[%c0_8, %c0_9] : memref<8x128xf32, #tpu.memory_space<vmem>>, vector<8x128xf32>
    %c0_10 = arith.constant 0 : index
    %c0_11 = arith.constant 0 : index
    %9 = vector.load %arg14[%c0_10, %c0_11] : memref<8x128xf32, #tpu.memory_space<vmem>>, vector<8x128xf32>
    %c0_i32_12 = arith.constant 0 : i32
    %c8_i32 = arith.constant 8 : i32
    %10 = arith.muli %c0_i32_12, %c8_i32 : i32
    %11 = tpu.assume_multiple %10, 8 : i32
    %12 = arith.index_cast %11 : i32 to index
    %c0_13 = arith.constant 0 : index
    %13 = vector.load %arg11[%12, %c0_13] : memref<64x512xf32, #tpu.memory_space<vmem>>, vector<8x512xf32>
    %14 = arith.truncf %8 : vector<8x128xf32> to vector<8x128xbf16>
    %c0_14 = arith.constant 0 : index
    %c0_15 = arith.constant 0 : index
    %15 = vector.load %arg6[%c0_14, %c0_15] : memref<128x512xbf16, #tpu.memory_space<vmem>>, vector<128x512xbf16>
    %cst_16 = arith.constant dense<0.000000e+00> : vector<8x512xf32>
    %16 = tpu.matmul %14, %15, %cst_16 {dimension_numbers = #tpu.dot_dimension_numbers<[1], [0], [0], [1], [0, 0, 1, 1], [], []>} : vector<8x128xbf16>, vector<128x512xbf16>, vector<8x512xf32> -> vector<8x512xf32>
    %17 = arith.addf %13, %16 : vector<8x512xf32>
    %18 = vector.extract_strided_slice %17 {offsets = [0, 0], sizes = [8, 128], strides = [1, 1]} : vector<8x512xf32> to vector<8x128xf32>
    %cst_17 = arith.constant 5.000000e-01 : f32
    %19 = vector.broadcast %cst_17 : f32 to vector<8x128xf32>
    %20 = arith.mulf %19, %18 : vector<8x128xf32>
    %21 = math.tanh %20 : vector<8x128xf32>
    %cst_18 = arith.constant 5.000000e-01 : f32
    %22 = vector.broadcast %cst_18 : f32 to vector<8x128xf32>
    %23 = arith.mulf %22, %21 : vector<8x128xf32>
    %cst_19 = arith.constant 5.000000e-01 : f32
    %24 = vector.broadcast %cst_19 : f32 to vector<8x128xf32>
    %25 = arith.addf %23, %24 : vector<8x128xf32>
    %26 = vector.extract_strided_slice %17 {offsets = [0, 128], sizes = [8, 128], strides = [1, 1]} : vector<8x512xf32> to vector<8x128xf32>
    %cst_20 = arith.constant 5.000000e-01 : f32
    %27 = vector.broadcast %cst_20 : f32 to vector<8x128xf32>
    %28 = arith.mulf %27, %26 : vector<8x128xf32>
    %29 = math.tanh %28 : vector<8x128xf32>
    %cst_21 = arith.constant 5.000000e-01 : f32
    %30 = vector.broadcast %cst_21 : f32 to vector<8x128xf32>
    %31 = arith.mulf %30, %29 : vector<8x128xf32>
    %cst_22 = arith.constant 5.000000e-01 : f32
    %32 = vector.broadcast %cst_22 : f32 to vector<8x128xf32>
    %33 = arith.addf %31, %32 : vector<8x128xf32>
    %34 = vector.extract_strided_slice %17 {offsets = [0, 256], sizes = [8, 128], strides = [1, 1]} : vector<8x512xf32> to vector<8x128xf32>
    %35 = math.tanh %34 : vector<8x128xf32>
    %36 = vector.extract_strided_slice %17 {offsets = [0, 384], sizes = [8, 128], strides = [1, 1]} : vector<8x512xf32> to vector<8x128xf32>
    %cst_23 = arith.constant 5.000000e-01 : f32
    %37 = vector.broadcast %cst_23 : f32 to vector<8x128xf32>
    %38 = arith.mulf %37, %36 : vector<8x128xf32>
    %39 = math.tanh %38 : vector<8x128xf32>
    %cst_24 = arith.constant 5.000000e-01 : f32
    %40 = vector.broadcast %cst_24 : f32 to vector<8x128xf32>
    %41 = arith.mulf %40, %39 : vector<8x128xf32>
    %cst_25 = arith.constant 5.000000e-01 : f32
    %42 = vector.broadcast %cst_25 : f32 to vector<8x128xf32>
    %43 = arith.addf %41, %42 : vector<8x128xf32>
    %44 = arith.mulf %33, %9 : vector<8x128xf32>
    %45 = arith.mulf %25, %35 : vector<8x128xf32>
    %46 = arith.addf %44, %45 : vector<8x128xf32>
    %47 = math.tanh %46 : vector<8x128xf32>
    %48 = arith.mulf %43, %47 : vector<8x128xf32>
    %49 = arith.index_cast %11 : i32 to index
    %c0_26 = arith.constant 0 : index
    %50 = vector.load %arg12[%49, %c0_26] : memref<64x128xf32, #tpu.memory_space<vmem>>, vector<8x128xf32>
    tpu.vector_store %arg12[%49, %c0_26], %48 {strides = array<i32>} : memref<64x128xf32, #tpu.memory_space<vmem>>, vector<8x128xf32>,
    %c1_i32 = arith.constant 1 : i32
    %c8_i32_27 = arith.constant 8 : i32
    %51 = arith.muli %c1_i32, %c8_i32_27 : i32
    %52 = tpu.assume_multiple %51, 8 : i32
    %53 = arith.index_cast %52 : i32 to index
    %c0_28 = arith.constant 0 : index
    %54 = vector.load %arg11[%53, %c0_28] : memref<64x512xf32, #tpu.memory_space<vmem>>, vector<8x512xf32>
    %55 = arith.truncf %48 : vector<8x128xf32> to vector<8x128xbf16>
    %c0_29 = arith.constant 0 : index
    %c0_30 = arith.constant 0 : index
    %56 = vector.load %arg6[%c0_29, %c0_30] : memref<128x512xbf16, #tpu.memory_space<vmem>>, vector<128x512xbf16>
    %cst_31 = arith.constant dense<0.000000e+00> : vector<8x512xf32>
    %57 = tpu.matmul %55, %56, %cst_31 {dimension_numbers = #tpu.dot_dimension_numbers<[1], [0], [0], [1], [0, 0, 1, 1], [], []>} : vector<8x128xbf16>, vector<128x512xbf16>, vector<8x512xf32> -> vector<8x512xf32>
    %58 = arith.addf %54, %57 : vector<8x512xf32>
    %59 = vector.extract_strided_slice %58 {offsets = [0, 0], sizes = [8, 128], strides = [1, 1]} : vector<8x512xf32> to vector<8x128xf32>
    %cst_32 = arith.constant 5.000000e-01 : f32
    %60 = vector.broadcast %cst_32 : f32 to vector<8x128xf32>
    %61 = arith.mulf %60, %59 : vector<8x128xf32>
    %62 = math.tanh %61 : vector<8x128xf32>
    %cst_33 = arith.constant 5.000000e-01 : f32
    %63 = vector.broadcast %cst_33 : f32 to vector<8x128xf32>
    %64 = arith.mulf %63, %62 : vector<8x128xf32>
    %cst_34 = arith.constant 5.000000e-01 : f32
    %65 = vector.broadcast %cst_34 : f32 to vector<8x128xf32>
    %66 = arith.addf %64, %65 : vector<8x128xf32>
    %67 = vector.extract_strided_slice %58 {offsets = [0, 128], sizes = [8, 128], strides = [1, 1]} : vector<8x512xf32> to vector<8x128xf32>
    %cst_35 = arith.constant 5.000000e-01 : f32
    %68 = vector.broadcast %cst_35 : f32 to vector<8x128xf32>
    %69 = arith.mulf %68, %67 : vector<8x128xf32>
    %70 = math.tanh %69 : vector<8x128xf32>
    %cst_36 = arith.constant 5.000000e-01 : f32
    %71 = vector.broadcast %cst_36 : f32 to vector<8x128xf32>
    %72 = arith.mulf %71, %70 : vector<8x128xf32>
    %cst_37 = arith.constant 5.000000e-01 : f32
    %73 = vector.broadcast %cst_37 : f32 to vector<8x128xf32>
    %74 = arith.addf %72, %73 : vector<8x128xf32>
    %75 = vector.extract_strided_slice %58 {offsets = [0, 256], sizes = [8, 128], strides = [1, 1]} : vector<8x512xf32> to vector<8x128xf32>
    %76 = math.tanh %75 : vector<8x128xf32>
    %77 = vector.extract_strided_slice %58 {offsets = [0, 384], sizes = [8, 128], strides = [1, 1]} : vector<8x512xf32> to vector<8x128xf32>
    %cst_38 = arith.constant 5.000000e-01 : f32
    %78 = vector.broadcast %cst_38 : f32 to vector<8x128xf32>
    %79 = arith.mulf %78, %77 : vector<8x128xf32>
    %80 = math.tanh %79 : vector<8x128xf32>
    %cst_39 = arith.constant 5.000000e-01 : f32
    %81 = vector.broadcast %cst_39 : f32 to vector<8x128xf32>
    %82 = arith.mulf %81, %80 : vector<8x128xf32>
    %cst_40 = arith.constant 5.000000e-01 : f32
    %83 = vector.broadcast %cst_40 : f32 to vector<8x128xf32>
    %84 = arith.addf %82, %83 : vector<8x128xf32>
    %85 = arith.mulf %74, %46 : vector<8x128xf32>
    %86 = arith.mulf %66, %76 : vector<8x128xf32>
    %87 = arith.addf %85, %86 : vector<8x128xf32>
    %88 = math.tanh %87 : vector<8x128xf32>
    %89 = arith.mulf %84, %88 : vector<8x128xf32>
    %90 = arith.index_cast %52 : i32 to index
    %c0_41 = arith.constant 0 : index
    %91 = vector.load %arg12[%90, %c0_41] : memref<64x128xf32, #tpu.memory_space<vmem>>, vector<8x128xf32>
    tpu.vector_store %arg12[%90, %c0_41], %89 {strides = array<i32>} : memref<64x128xf32, #tpu.memory_space<vmem>>, vector<8x128xf32>,
    %c2_i32 = arith.constant 2 : i32
    %c8_i32_42 = arith.constant 8 : i32
    %92 = arith.muli %c2_i32, %c8_i32_42 : i32
    %93 = tpu.assume_multiple %92, 8 : i32
    %94 = arith.index_cast %93 : i32 to index
    %c0_43 = arith.constant 0 : index
    %95 = vector.load %arg11[%94, %c0_43] : memref<64x512xf32, #tpu.memory_space<vmem>>, vector<8x512xf32>
    %96 = arith.truncf %89 : vector<8x128xf32> to vector<8x128xbf16>
    %c0_44 = arith.constant 0 : index
    %c0_45 = arith.constant 0 : index
    %97 = vector.load %arg6[%c0_44, %c0_45] : memref<128x512xbf16, #tpu.memory_space<vmem>>, vector<128x512xbf16>
    %cst_46 = arith.constant dense<0.000000e+00> : vector<8x512xf32>
    %98 = tpu.matmul %96, %97, %cst_46 {dimension_numbers = #tpu.dot_dimension_numbers<[1], [0], [0], [1], [0, 0, 1, 1], [], []>} : vector<8x128xbf16>, vector<128x512xbf16>, vector<8x512xf32> -> vector<8x512xf32>
    %99 = arith.addf %95, %98 : vector<8x512xf32>
    %100 = vector.extract_strided_slice %99 {offsets = [0, 0], sizes = [8, 128], strides = [1, 1]} : vector<8x512xf32> to vector<8x128xf32>
    %cst_47 = arith.constant 5.000000e-01 : f32
    %101 = vector.broadcast %cst_47 : f32 to vector<8x128xf32>
    %102 = arith.mulf %101, %100 : vector<8x128xf32>
    %103 = math.tanh %102 : vector<8x128xf32>
    %cst_48 = arith.constant 5.000000e-01 : f32
    %104 = vector.broadcast %cst_48 : f32 to vector<8x128xf32>
    %105 = arith.mulf %104, %103 : vector<8x128xf32>
    %cst_49 = arith.constant 5.000000e-01 : f32
    %106 = vector.broadcast %cst_49 : f32 to vector<8x128xf32>
    %107 = arith.addf %105, %106 : vector<8x128xf32>
    %108 = vector.extract_strided_slice %99 {offsets = [0, 128], sizes = [8, 128], strides = [1, 1]} : vector<8x512xf32> to vector<8x128xf32>
    %cst_50 = arith.constant 5.000000e-01 : f32
    %109 = vector.broadcast %cst_50 : f32 to vector<8x128xf32>
    %110 = arith.mulf %109, %108 : vector<8x128xf32>
    %111 = math.tanh %110 : vector<8x128xf32>
    %cst_51 = arith.constant 5.000000e-01 : f32
    %112 = vector.broadcast %cst_51 : f32 to vector<8x128xf32>
    %113 = arith.mulf %112, %111 : vector<8x128xf32>
    %cst_52 = arith.constant 5.000000e-01 : f32
    %114 = vector.broadcast %cst_52 : f32 to vector<8x128xf32>
    %115 = arith.addf %113, %114 : vector<8x128xf32>
    %116 = vector.extract_strided_slice %99 {offsets = [0, 256], sizes = [8, 128], strides = [1, 1]} : vector<8x512xf32> to vector<8x128xf32>
    %117 = math.tanh %116 : vector<8x128xf32>
    %118 = vector.extract_strided_slice %99 {offsets = [0, 384], sizes = [8, 128], strides = [1, 1]} : vector<8x512xf32> to vector<8x128xf32>
    %cst_53 = arith.constant 5.000000e-01 : f32
    %119 = vector.broadcast %cst_53 : f32 to vector<8x128xf32>
    %120 = arith.mulf %119, %118 : vector<8x128xf32>
    %121 = math.tanh %120 : vector<8x128xf32>
    %cst_54 = arith.constant 5.000000e-01 : f32
    %122 = vector.broadcast %cst_54 : f32 to vector<8x128xf32>
    %123 = arith.mulf %122, %121 : vector<8x128xf32>
    %cst_55 = arith.constant 5.000000e-01 : f32
    %124 = vector.broadcast %cst_55 : f32 to vector<8x128xf32>
    %125 = arith.addf %123, %124 : vector<8x128xf32>
    %126 = arith.mulf %115, %87 : vector<8x128xf32>
    %127 = arith.mulf %107, %117 : vector<8x128xf32>
    %128 = arith.addf %126, %127 : vector<8x128xf32>
    %129 = math.tanh %128 : vector<8x128xf32>
    %130 = arith.mulf %125, %129 : vector<8x128xf32>
    %131 = arith.index_cast %93 : i32 to index
    %c0_56 = arith.constant 0 : index
    %132 = vector.load %arg12[%131, %c0_56] : memref<64x128xf32, #tpu.memory_space<vmem>>, vector<8x128xf32>
    tpu.vector_store %arg12[%131, %c0_56], %130 {strides = array<i32>} : memref<64x128xf32, #tpu.memory_space<vmem>>, vector<8x128xf32>,
    %c3_i32 = arith.constant 3 : i32
    %c8_i32_57 = arith.constant 8 : i32
    %133 = arith.muli %c3_i32, %c8_i32_57 : i32
    %134 = tpu.assume_multiple %133, 8 : i32
    %135 = arith.index_cast %134 : i32 to index
    %c0_58 = arith.constant 0 : index
    %136 = vector.load %arg11[%135, %c0_58] : memref<64x512xf32, #tpu.memory_space<vmem>>, vector<8x512xf32>
    %137 = arith.truncf %130 : vector<8x128xf32> to vector<8x128xbf16>
    %c0_59 = arith.constant 0 : index
    %c0_60 = arith.constant 0 : index
    %138 = vector.load %arg6[%c0_59, %c0_60] : memref<128x512xbf16, #tpu.memory_space<vmem>>, vector<128x512xbf16>
    %cst_61 = arith.constant dense<0.000000e+00> : vector<8x512xf32>
    %139 = tpu.matmul %137, %138, %cst_61 {dimension_numbers = #tpu.dot_dimension_numbers<[1], [0], [0], [1], [0, 0, 1, 1], [], []>} : vector<8x128xbf16>, vector<128x512xbf16>, vector<8x512xf32> -> vector<8x512xf32>
    %140 = arith.addf %136, %139 : vector<8x512xf32>
    %141 = vector.extract_strided_slice %140 {offsets = [0, 0], sizes = [8, 128], strides = [1, 1]} : vector<8x512xf32> to vector<8x128xf32>
    %cst_62 = arith.constant 5.000000e-01 : f32
    %142 = vector.broadcast %cst_62 : f32 to vector<8x128xf32>
    %143 = arith.mulf %142, %141 : vector<8x128xf32>
    %144 = math.tanh %143 : vector<8x128xf32>
    %cst_63 = arith.constant 5.000000e-01 : f32
    %145 = vector.broadcast %cst_63 : f32 to vector<8x128xf32>
    %146 = arith.mulf %145, %144 : vector<8x128xf32>
    %cst_64 = arith.constant 5.000000e-01 : f32
    %147 = vector.broadcast %cst_64 : f32 to vector<8x128xf32>
    %148 = arith.addf %146, %147 : vector<8x128xf32>
    %149 = vector.extract_strided_slice %140 {offsets = [0, 128], sizes = [8, 128], strides = [1, 1]} : vector<8x512xf32> to vector<8x128xf32>
    %cst_65 = arith.constant 5.000000e-01 : f32
    %150 = vector.broadcast %cst_65 : f32 to vector<8x128xf32>
    %151 = arith.mulf %150, %149 : vector<8x128xf32>
    %152 = math.tanh %151 : vector<8x128xf32>
    %cst_66 = arith.constant 5.000000e-01 : f32
    %153 = vector.broadcast %cst_66 : f32 to vector<8x128xf32>
    %154 = arith.mulf %153, %152 : vector<8x128xf32>
    %cst_67 = arith.constant 5.000000e-01 : f32
    %155 = vector.broadcast %cst_67 : f32 to vector<8x128xf32>
    %156 = arith.addf %154, %155 : vector<8x128xf32>
    %157 = vector.extract_strided_slice %140 {offsets = [0, 256], sizes = [8, 128], strides = [1, 1]} : vector<8x512xf32> to vector<8x128xf32>
    %158 = math.tanh %157 : vector<8x128xf32>
    %159 = vector.extract_strided_slice %140 {offsets = [0, 384], sizes = [8, 128], strides = [1, 1]} : vector<8x512xf32> to vector<8x128xf32>
    %cst_68 = arith.constant 5.000000e-01 : f32
    %160 = vector.broadcast %cst_68 : f32 to vector<8x128xf32>
    %161 = arith.mulf %160, %159 : vector<8x128xf32>
    %162 = math.tanh %161 : vector<8x128xf32>
    %cst_69 = arith.constant 5.000000e-01 : f32
    %163 = vector.broadcast %cst_69 : f32 to vector<8x128xf32>
    %164 = arith.mulf %163, %162 : vector<8x128xf32>
    %cst_70 = arith.constant 5.000000e-01 : f32
    %165 = vector.broadcast %cst_70 : f32 to vector<8x128xf32>
    %166 = arith.addf %164, %165 : vector<8x128xf32>
    %167 = arith.mulf %156, %128 : vector<8x128xf32>
    %168 = arith.mulf %148, %158 : vector<8x128xf32>
    %169 = arith.addf %167, %168 : vector<8x128xf32>
    %170 = math.tanh %169 : vector<8x128xf32>
    %171 = arith.mulf %166, %170 : vector<8x128xf32>
    %172 = arith.index_cast %134 : i32 to index
    %c0_71 = arith.constant 0 : index
    %173 = vector.load %arg12[%172, %c0_71] : memref<64x128xf32, #tpu.memory_space<vmem>>, vector<8x128xf32>
    tpu.vector_store %arg12[%172, %c0_71], %171 {strides = array<i32>} : memref<64x128xf32, #tpu.memory_space<vmem>>, vector<8x128xf32>,
    %c4_i32 = arith.constant 4 : i32
    %c8_i32_72 = arith.constant 8 : i32
    %174 = arith.muli %c4_i32, %c8_i32_72 : i32
    %175 = tpu.assume_multiple %174, 8 : i32
    %176 = arith.index_cast %175 : i32 to index
    %c0_73 = arith.constant 0 : index
    %177 = vector.load %arg11[%176, %c0_73] : memref<64x512xf32, #tpu.memory_space<vmem>>, vector<8x512xf32>
    %178 = arith.truncf %171 : vector<8x128xf32> to vector<8x128xbf16>
    %c0_74 = arith.constant 0 : index
    %c0_75 = arith.constant 0 : index
    %179 = vector.load %arg6[%c0_74, %c0_75] : memref<128x512xbf16, #tpu.memory_space<vmem>>, vector<128x512xbf16>
    %cst_76 = arith.constant dense<0.000000e+00> : vector<8x512xf32>
    %180 = tpu.matmul %178, %179, %cst_76 {dimension_numbers = #tpu.dot_dimension_numbers<[1], [0], [0], [1], [0, 0, 1, 1], [], []>} : vector<8x128xbf16>, vector<128x512xbf16>, vector<8x512xf32> -> vector<8x512xf32>
    %181 = arith.addf %177, %180 : vector<8x512xf32>
    %182 = vector.extract_strided_slice %181 {offsets = [0, 0], sizes = [8, 128], strides = [1, 1]} : vector<8x512xf32> to vector<8x128xf32>
    %cst_77 = arith.constant 5.000000e-01 : f32
    %183 = vector.broadcast %cst_77 : f32 to vector<8x128xf32>
    %184 = arith.mulf %183, %182 : vector<8x128xf32>
    %185 = math.tanh %184 : vector<8x128xf32>
    %cst_78 = arith.constant 5.000000e-01 : f32
    %186 = vector.broadcast %cst_78 : f32 to vector<8x128xf32>
    %187 = arith.mulf %186, %185 : vector<8x128xf32>
    %cst_79 = arith.constant 5.000000e-01 : f32
    %188 = vector.broadcast %cst_79 : f32 to vector<8x128xf32>
    %189 = arith.addf %187, %188 : vector<8x128xf32>
    %190 = vector.extract_strided_slice %181 {offsets = [0, 128], sizes = [8, 128], strides = [1, 1]} : vector<8x512xf32> to vector<8x128xf32>
    %cst_80 = arith.constant 5.000000e-01 : f32
    %191 = vector.broadcast %cst_80 : f32 to vector<8x128xf32>
    %192 = arith.mulf %191, %190 : vector<8x128xf32>
    %193 = math.tanh %192 : vector<8x128xf32>
    %cst_81 = arith.constant 5.000000e-01 : f32
    %194 = vector.broadcast %cst_81 : f32 to vector<8x128xf32>
    %195 = arith.mulf %194, %193 : vector<8x128xf32>
    %cst_82 = arith.constant 5.000000e-01 : f32
    %196 = vector.broadcast %cst_82 : f32 to vector<8x128xf32>
    %197 = arith.addf %195, %196 : vector<8x128xf32>
    %198 = vector.extract_strided_slice %181 {offsets = [0, 256], sizes = [8, 128], strides = [1, 1]} : vector<8x512xf32> to vector<8x128xf32>
    %199 = math.tanh %198 : vector<8x128xf32>
    %200 = vector.extract_strided_slice %181 {offsets = [0, 384], sizes = [8, 128], strides = [1, 1]} : vector<8x512xf32> to vector<8x128xf32>
    %cst_83 = arith.constant 5.000000e-01 : f32
    %201 = vector.broadcast %cst_83 : f32 to vector<8x128xf32>
    %202 = arith.mulf %201, %200 : vector<8x128xf32>
    %203 = math.tanh %202 : vector<8x128xf32>
    %cst_84 = arith.constant 5.000000e-01 : f32
    %204 = vector.broadcast %cst_84 : f32 to vector<8x128xf32>
    %205 = arith.mulf %204, %203 : vector<8x128xf32>
    %cst_85 = arith.constant 5.000000e-01 : f32
    %206 = vector.broadcast %cst_85 : f32 to vector<8x128xf32>
    %207 = arith.addf %205, %206 : vector<8x128xf32>
    %208 = arith.mulf %197, %169 : vector<8x128xf32>
    %209 = arith.mulf %189, %199 : vector<8x128xf32>
    %210 = arith.addf %208, %209 : vector<8x128xf32>
    %211 = math.tanh %210 : vector<8x128xf32>
    %212 = arith.mulf %207, %211 : vector<8x128xf32>
    %213 = arith.index_cast %175 : i32 to index
    %c0_86 = arith.constant 0 : index
    %214 = vector.load %arg12[%213, %c0_86] : memref<64x128xf32, #tpu.memory_space<vmem>>, vector<8x128xf32>
    tpu.vector_store %arg12[%213, %c0_86], %212 {strides = array<i32>} : memref<64x128xf32, #tpu.memory_space<vmem>>, vector<8x128xf32>,
    %c5_i32 = arith.constant 5 : i32
    %c8_i32_87 = arith.constant 8 : i32
    %215 = arith.muli %c5_i32, %c8_i32_87 : i32
    %216 = tpu.assume_multiple %215, 8 : i32
    %217 = arith.index_cast %216 : i32 to index
    %c0_88 = arith.constant 0 : index
    %218 = vector.load %arg11[%217, %c0_88] : memref<64x512xf32, #tpu.memory_space<vmem>>, vector<8x512xf32>
    %219 = arith.truncf %212 : vector<8x128xf32> to vector<8x128xbf16>
    %c0_89 = arith.constant 0 : index
    %c0_90 = arith.constant 0 : index
    %220 = vector.load %arg6[%c0_89, %c0_90] : memref<128x512xbf16, #tpu.memory_space<vmem>>, vector<128x512xbf16>
    %cst_91 = arith.constant dense<0.000000e+00> : vector<8x512xf32>
    %221 = tpu.matmul %219, %220, %cst_91 {dimension_numbers = #tpu.dot_dimension_numbers<[1], [0], [0], [1], [0, 0, 1, 1], [], []>} : vector<8x128xbf16>, vector<128x512xbf16>, vector<8x512xf32> -> vector<8x512xf32>
    %222 = arith.addf %218, %221 : vector<8x512xf32>
    %223 = vector.extract_strided_slice %222 {offsets = [0, 0], sizes = [8, 128], strides = [1, 1]} : vector<8x512xf32> to vector<8x128xf32>
    %cst_92 = arith.constant 5.000000e-01 : f32
    %224 = vector.broadcast %cst_92 : f32 to vector<8x128xf32>
    %225 = arith.mulf %224, %223 : vector<8x128xf32>
    %226 = math.tanh %225 : vector<8x128xf32>
    %cst_93 = arith.constant 5.000000e-01 : f32
    %227 = vector.broadcast %cst_93 : f32 to vector<8x128xf32>
    %228 = arith.mulf %227, %226 : vector<8x128xf32>
    %cst_94 = arith.constant 5.000000e-01 : f32
    %229 = vector.broadcast %cst_94 : f32 to vector<8x128xf32>
    %230 = arith.addf %228, %229 : vector<8x128xf32>
    %231 = vector.extract_strided_slice %222 {offsets = [0, 128], sizes = [8, 128], strides = [1, 1]} : vector<8x512xf32> to vector<8x128xf32>
    %cst_95 = arith.constant 5.000000e-01 : f32
    %232 = vector.broadcast %cst_95 : f32 to vector<8x128xf32>
    %233 = arith.mulf %232, %231 : vector<8x128xf32>
    %234 = math.tanh %233 : vector<8x128xf32>
    %cst_96 = arith.constant 5.000000e-01 : f32
    %235 = vector.broadcast %cst_96 : f32 to vector<8x128xf32>
    %236 = arith.mulf %235, %234 : vector<8x128xf32>
    %cst_97 = arith.constant 5.000000e-01 : f32
    %237 = vector.broadcast %cst_97 : f32 to vector<8x128xf32>
    %238 = arith.addf %236, %237 : vector<8x128xf32>
    %239 = vector.extract_strided_slice %222 {offsets = [0, 256], sizes = [8, 128], strides = [1, 1]} : vector<8x512xf32> to vector<8x128xf32>
    %240 = math.tanh %239 : vector<8x128xf32>
    %241 = vector.extract_strided_slice %222 {offsets = [0, 384], sizes = [8, 128], strides = [1, 1]} : vector<8x512xf32> to vector<8x128xf32>
    %cst_98 = arith.constant 5.000000e-01 : f32
    %242 = vector.broadcast %cst_98 : f32 to vector<8x128xf32>
    %243 = arith.mulf %242, %241 : vector<8x128xf32>
    %244 = math.tanh %243 : vector<8x128xf32>
    %cst_99 = arith.constant 5.000000e-01 : f32
    %245 = vector.broadcast %cst_99 : f32 to vector<8x128xf32>
    %246 = arith.mulf %245, %244 : vector<8x128xf32>
    %cst_100 = arith.constant 5.000000e-01 : f32
    %247 = vector.broadcast %cst_100 : f32 to vector<8x128xf32>
    %248 = arith.addf %246, %247 : vector<8x128xf32>
    %249 = arith.mulf %238, %210 : vector<8x128xf32>
    %250 = arith.mulf %230, %240 : vector<8x128xf32>
    %251 = arith.addf %249, %250 : vector<8x128xf32>
    %252 = math.tanh %251 : vector<8x128xf32>
    %253 = arith.mulf %248, %252 : vector<8x128xf32>
    %254 = arith.index_cast %216 : i32 to index
    %c0_101 = arith.constant 0 : index
    %255 = vector.load %arg12[%254, %c0_101] : memref<64x128xf32, #tpu.memory_space<vmem>>, vector<8x128xf32>
    tpu.vector_store %arg12[%254, %c0_101], %253 {strides = array<i32>} : memref<64x128xf32, #tpu.memory_space<vmem>>, vector<8x128xf32>,
    %c6_i32 = arith.constant 6 : i32
    %c8_i32_102 = arith.constant 8 : i32
    %256 = arith.muli %c6_i32, %c8_i32_102 : i32
    %257 = tpu.assume_multiple %256, 8 : i32
    %258 = arith.index_cast %257 : i32 to index
    %c0_103 = arith.constant 0 : index
    %259 = vector.load %arg11[%258, %c0_103] : memref<64x512xf32, #tpu.memory_space<vmem>>, vector<8x512xf32>
    %260 = arith.truncf %253 : vector<8x128xf32> to vector<8x128xbf16>
    %c0_104 = arith.constant 0 : index
    %c0_105 = arith.constant 0 : index
    %261 = vector.load %arg6[%c0_104, %c0_105] : memref<128x512xbf16, #tpu.memory_space<vmem>>, vector<128x512xbf16>
    %cst_106 = arith.constant dense<0.000000e+00> : vector<8x512xf32>
    %262 = tpu.matmul %260, %261, %cst_106 {dimension_numbers = #tpu.dot_dimension_numbers<[1], [0], [0], [1], [0, 0, 1, 1], [], []>} : vector<8x128xbf16>, vector<128x512xbf16>, vector<8x512xf32> -> vector<8x512xf32>
    %263 = arith.addf %259, %262 : vector<8x512xf32>
    %264 = vector.extract_strided_slice %263 {offsets = [0, 0], sizes = [8, 128], strides = [1, 1]} : vector<8x512xf32> to vector<8x128xf32>
    %cst_107 = arith.constant 5.000000e-01 : f32
    %265 = vector.broadcast %cst_107 : f32 to vector<8x128xf32>
    %266 = arith.mulf %265, %264 : vector<8x128xf32>
    %267 = math.tanh %266 : vector<8x128xf32>
    %cst_108 = arith.constant 5.000000e-01 : f32
    %268 = vector.broadcast %cst_108 : f32 to vector<8x128xf32>
    %269 = arith.mulf %268, %267 : vector<8x128xf32>
    %cst_109 = arith.constant 5.000000e-01 : f32
    %270 = vector.broadcast %cst_109 : f32 to vector<8x128xf32>
    %271 = arith.addf %269, %270 : vector<8x128xf32>
    %272 = vector.extract_strided_slice %263 {offsets = [0, 128], sizes = [8, 128], strides = [1, 1]} : vector<8x512xf32> to vector<8x128xf32>
    %cst_110 = arith.constant 5.000000e-01 : f32
    %273 = vector.broadcast %cst_110 : f32 to vector<8x128xf32>
    %274 = arith.mulf %273, %272 : vector<8x128xf32>
    %275 = math.tanh %274 : vector<8x128xf32>
    %cst_111 = arith.constant 5.000000e-01 : f32
    %276 = vector.broadcast %cst_111 : f32 to vector<8x128xf32>
    %277 = arith.mulf %276, %275 : vector<8x128xf32>
    %cst_112 = arith.constant 5.000000e-01 : f32
    %278 = vector.broadcast %cst_112 : f32 to vector<8x128xf32>
    %279 = arith.addf %277, %278 : vector<8x128xf32>
    %280 = vector.extract_strided_slice %263 {offsets = [0, 256], sizes = [8, 128], strides = [1, 1]} : vector<8x512xf32> to vector<8x128xf32>
    %281 = math.tanh %280 : vector<8x128xf32>
    %282 = vector.extract_strided_slice %263 {offsets = [0, 384], sizes = [8, 128], strides = [1, 1]} : vector<8x512xf32> to vector<8x128xf32>
    %cst_113 = arith.constant 5.000000e-01 : f32
    %283 = vector.broadcast %cst_113 : f32 to vector<8x128xf32>
    %284 = arith.mulf %283, %282 : vector<8x128xf32>
    %285 = math.tanh %284 : vector<8x128xf32>
    %cst_114 = arith.constant 5.000000e-01 : f32
    %286 = vector.broadcast %cst_114 : f32 to vector<8x128xf32>
    %287 = arith.mulf %286, %285 : vector<8x128xf32>
    %cst_115 = arith.constant 5.000000e-01 : f32
    %288 = vector.broadcast %cst_115 : f32 to vector<8x128xf32>
    %289 = arith.addf %287, %288 : vector<8x128xf32>
    %290 = arith.mulf %279, %251 : vector<8x128xf32>
    %291 = arith.mulf %271, %281 : vector<8x128xf32>
    %292 = arith.addf %290, %291 : vector<8x128xf32>
    %293 = math.tanh %292 : vector<8x128xf32>
    %294 = arith.mulf %289, %293 : vector<8x128xf32>
    %295 = arith.index_cast %257 : i32 to index
    %c0_116 = arith.constant 0 : index
    %296 = vector.load %arg12[%295, %c0_116] : memref<64x128xf32, #tpu.memory_space<vmem>>, vector<8x128xf32>
    tpu.vector_store %arg12[%295, %c0_116], %294 {strides = array<i32>} : memref<64x128xf32, #tpu.memory_space<vmem>>, vector<8x128xf32>,
    %c7_i32 = arith.constant 7 : i32
    %c8_i32_117 = arith.constant 8 : i32
    %297 = arith.muli %c7_i32, %c8_i32_117 : i32
    %298 = tpu.assume_multiple %297, 8 : i32
    %299 = arith.index_cast %298 : i32 to index
    %c0_118 = arith.constant 0 : index
    %300 = vector.load %arg11[%299, %c0_118] : memref<64x512xf32, #tpu.memory_space<vmem>>, vector<8x512xf32>
    %301 = arith.truncf %294 : vector<8x128xf32> to vector<8x128xbf16>
    %c0_119 = arith.constant 0 : index
    %c0_120 = arith.constant 0 : index
    %302 = vector.load %arg6[%c0_119, %c0_120] : memref<128x512xbf16, #tpu.memory_space<vmem>>, vector<128x512xbf16>
    %cst_121 = arith.constant dense<0.000000e+00> : vector<8x512xf32>
    %303 = tpu.matmul %301, %302, %cst_121 {dimension_numbers = #tpu.dot_dimension_numbers<[1], [0], [0], [1], [0, 0, 1, 1], [], []>} : vector<8x128xbf16>, vector<128x512xbf16>, vector<8x512xf32> -> vector<8x512xf32>
    %304 = arith.addf %300, %303 : vector<8x512xf32>
    %305 = vector.extract_strided_slice %304 {offsets = [0, 0], sizes = [8, 128], strides = [1, 1]} : vector<8x512xf32> to vector<8x128xf32>
    %cst_122 = arith.constant 5.000000e-01 : f32
    %306 = vector.broadcast %cst_122 : f32 to vector<8x128xf32>
    %307 = arith.mulf %306, %305 : vector<8x128xf32>
    %308 = math.tanh %307 : vector<8x128xf32>
    %cst_123 = arith.constant 5.000000e-01 : f32
    %309 = vector.broadcast %cst_123 : f32 to vector<8x128xf32>
    %310 = arith.mulf %309, %308 : vector<8x128xf32>
    %cst_124 = arith.constant 5.000000e-01 : f32
    %311 = vector.broadcast %cst_124 : f32 to vector<8x128xf32>
    %312 = arith.addf %310, %311 : vector<8x128xf32>
    %313 = vector.extract_strided_slice %304 {offsets = [0, 128], sizes = [8, 128], strides = [1, 1]} : vector<8x512xf32> to vector<8x128xf32>
    %cst_125 = arith.constant 5.000000e-01 : f32
    %314 = vector.broadcast %cst_125 : f32 to vector<8x128xf32>
    %315 = arith.mulf %314, %313 : vector<8x128xf32>
    %316 = math.tanh %315 : vector<8x128xf32>
    %cst_126 = arith.constant 5.000000e-01 : f32
    %317 = vector.broadcast %cst_126 : f32 to vector<8x128xf32>
    %318 = arith.mulf %317, %316 : vector<8x128xf32>
    %cst_127 = arith.constant 5.000000e-01 : f32
    %319 = vector.broadcast %cst_127 : f32 to vector<8x128xf32>
    %320 = arith.addf %318, %319 : vector<8x128xf32>
    %321 = vector.extract_strided_slice %304 {offsets = [0, 256], sizes = [8, 128], strides = [1, 1]} : vector<8x512xf32> to vector<8x128xf32>
    %322 = math.tanh %321 : vector<8x128xf32>
    %323 = vector.extract_strided_slice %304 {offsets = [0, 384], sizes = [8, 128], strides = [1, 1]} : vector<8x512xf32> to vector<8x128xf32>
    %cst_128 = arith.constant 5.000000e-01 : f32
    %324 = vector.broadcast %cst_128 : f32 to vector<8x128xf32>
    %325 = arith.mulf %324, %323 : vector<8x128xf32>
    %326 = math.tanh %325 : vector<8x128xf32>
    %cst_129 = arith.constant 5.000000e-01 : f32
    %327 = vector.broadcast %cst_129 : f32 to vector<8x128xf32>
    %328 = arith.mulf %327, %326 : vector<8x128xf32>
    %cst_130 = arith.constant 5.000000e-01 : f32
    %329 = vector.broadcast %cst_130 : f32 to vector<8x128xf32>
    %330 = arith.addf %328, %329 : vector<8x128xf32>
    %331 = arith.mulf %320, %292 : vector<8x128xf32>
    %332 = arith.mulf %312, %322 : vector<8x128xf32>
    %333 = arith.addf %331, %332 : vector<8x128xf32>
    %334 = math.tanh %333 : vector<8x128xf32>
    %335 = arith.mulf %330, %334 : vector<8x128xf32>
    %336 = arith.index_cast %298 : i32 to index
    %c0_131 = arith.constant 0 : index
    %337 = vector.load %arg12[%336, %c0_131] : memref<64x128xf32, #tpu.memory_space<vmem>>, vector<8x128xf32>
    tpu.vector_store %arg12[%336, %c0_131], %335 {strides = array<i32>} : memref<64x128xf32, #tpu.memory_space<vmem>>, vector<8x128xf32>,
    %c8_i32_132 = arith.constant 8 : i32
    %c0_133 = arith.constant 0 : index
    %c0_134 = arith.constant 0 : index
    %338 = vector.load %arg13[%c0_133, %c0_134] : memref<8x128xf32, #tpu.memory_space<vmem>>, vector<8x128xf32>
    tpu.vector_store %arg13[%c0_133, %c0_134], %335 {strides = array<i32>} : memref<8x128xf32, #tpu.memory_space<vmem>>, vector<8x128xf32>,
    %c0_135 = arith.constant 0 : index
    %c0_136 = arith.constant 0 : index
    %339 = vector.load %arg14[%c0_135, %c0_136] : memref<8x128xf32, #tpu.memory_space<vmem>>, vector<8x128xf32>
    tpu.vector_store %arg14[%c0_135, %c0_136], %333 {strides = array<i32>} : memref<8x128xf32, #tpu.memory_space<vmem>>, vector<8x128xf32>,
    %c0_137 = arith.constant 0 : index
    %c0_138 = arith.constant 0 : index
    %340 = vector.load %arg12[%c0_137, %c0_138] : memref<64x128xf32, #tpu.memory_space<vmem>>, vector<64x128xf32>
    %341 = arith.truncf %340 : vector<64x128xf32> to vector<64x128xbf16>
    %c0_139 = arith.constant 0 : index
    %c0_140 = arith.constant 0 : index
    %342 = vector.load %arg7[%c0_139, %c0_140] : memref<128x128xbf16, #tpu.memory_space<vmem>>, vector<128x128xbf16>
    %cst_141 = arith.constant dense<0.000000e+00> : vector<64x128xf32>
    %343 = tpu.matmul %341, %342, %cst_141 {dimension_numbers = #tpu.dot_dimension_numbers<[1], [0], [0], [1], [0, 0, 1, 1], [], []>} : vector<64x128xbf16>, vector<128x128xbf16>, vector<64x128xf32> -> vector<64x128xf32>
    %c0_142 = arith.constant 0 : index
    %c0_143 = arith.constant 0 : index
    %c0_144 = arith.constant 0 : index
    %c0_145 = arith.constant 0 : index
    %344 = vector.load %arg8[%c0_142, %c0_143, %c0_144, %c0_145] : memref<1x1x64x128xf32, #tpu.memory_space<vmem>>, vector<1x1x64x128xf32>
    %345 = vector.shape_cast %344 : vector<1x1x64x128xf32> to vector<64x128xf32>
    %346 = vector.shape_cast %343 : vector<64x128xf32> to vector<1x1x64x128xf32>
    tpu.vector_store %arg8[%c0_142, %c0_143, %c0_144, %c0_145], %346 {strides = array<i32>} : memref<1x1x64x128xf32, #tpu.memory_space<vmem>>, vector<1x1x64x128xf32>,
    %c0_i32_146 = arith.constant 0 : i32
    %347 = arith.cmpi eq, %arg1, %c0_i32_146 : i32
    %348 = arith.extui %347 : i1 to i32
    %c0_i32_147 = arith.constant 0 : i32
    %349 = arith.cmpi ne, %348, %c0_i32_147 : i32
    scf.if %349 {
      %c0_148 = arith.constant 0 : index
      %c0_149 = arith.constant 0 : index
      %350 = vector.load %arg9[%c0_148, %c0_149] : memref<8x128xf32, #tpu.memory_space<vmem>>, vector<8x128xf32>
      tpu.vector_store %arg9[%c0_148, %c0_149], %335 {strides = array<i32>} : memref<8x128xf32, #tpu.memory_space<vmem>>, vector<8x128xf32>,
      %c0_150 = arith.constant 0 : index
      %c0_151 = arith.constant 0 : index
      %351 = vector.load %arg10[%c0_150, %c0_151] : memref<8x128xf32, #tpu.memory_space<vmem>>, vector<8x128xf32>
      tpu.vector_store %arg10[%c0_150, %c0_151], %333 {strides = array<i32>} : memref<8x128xf32, #tpu.memory_space<vmem>>, vector<8x128xf32>,
    } else {
    }
    return
  }
  func.func @transform_0(%arg0: i32, %arg1: i32) -> (i32, i32, i32, i32) {
    %c0_i32 = arith.constant 0 : i32
    %c0_i32_0 = arith.constant 0 : i32
    %c0_i32_1 = arith.constant 0 : i32
    return %arg0, %arg1, %c0_i32, %c0_i32_0 : i32, i32, i32, i32
  }
  func.func @transform_1(%arg0: i32, %arg1: i32) -> (i32, i32) {
    %c0_i32 = arith.constant 0 : i32
    %c0_i32_0 = arith.constant 0 : i32
    return %arg0, %c0_i32 : i32, i32
  }
  func.func @transform_2(%arg0: i32, %arg1: i32) -> (i32, i32) {
    %c0_i32 = arith.constant 0 : i32
    %c0_i32_0 = arith.constant 0 : i32
    return %arg0, %c0_i32 : i32, i32
  }
  func.func @transform_3(%arg0: i32, %arg1: i32) -> (i32, i32) {
    %c0_i32 = arith.constant 0 : i32
    %c0_i32_0 = arith.constant 0 : i32
    %c0_i32_1 = arith.constant 0 : i32
    return %c0_i32, %c0_i32_0 : i32, i32
  }
  func.func @transform_4(%arg0: i32, %arg1: i32) -> (i32, i32) {
    %c0_i32 = arith.constant 0 : i32
    %c0_i32_0 = arith.constant 0 : i32
    %c0_i32_1 = arith.constant 0 : i32
    return %c0_i32, %c0_i32_0 : i32, i32
  }
  func.func @transform_5(%arg0: i32, %arg1: i32) -> (i32, i32) {
    %c0_i32 = arith.constant 0 : i32
    %c0_i32_0 = arith.constant 0 : i32
    %c0_i32_1 = arith.constant 0 : i32
    return %c0_i32, %c0_i32_0 : i32, i32
  }
  func.func @transform_6(%arg0: i32, %arg1: i32) -> (i32, i32, i32, i32) {
    %c0_i32 = arith.constant 0 : i32
    %c0_i32_0 = arith.constant 0 : i32
    %c0_i32_1 = arith.constant 0 : i32
    return %arg0, %arg1, %c0_i32, %c0_i32_0 : i32, i32, i32, i32
  }
  func.func @transform_7(%arg0: i32, %arg1: i32) -> (i32, i32) {
    %c0_i32 = arith.constant 0 : i32
    %c0_i32_0 = arith.constant 0 : i32
    return %arg0, %c0_i32 : i32, i32
  }
  func.func @transform_8(%arg0: i32, %arg1: i32) -> (i32, i32) {
    %c0_i32 = arith.constant 0 : i32
    %c0_i32_0 = arith.constant 0 : i32
    return %arg0, %c0_i32 : i32, i32
  }
}

</mosaic_0001>

<bundles_post_ra>
// kernel: tpu_custom_call.1
= control target key start
LH: loop header
LB: loop body
LE: loop exit
PB: predicated region body
PF: predicated region fallthrough
CT: control target
= control target key end

     0   :  { %14 = vsyncpa [#allocation7], 0  ;;  %s4287_s0 = inlined_call_operand.vmem [shape: bf16[1,1,64,16], index: 0, kind: input, shape index: {}]   ;;  %s4288_s1 = inlined_call_operand.vmem [shape: f32[8,128], index: 1, kind: input, shape index: {}]   ;;  %s4289_s2 = inlined_call_operand.hbm [shape: f32[8,128], index: 2, kind: input, shape index: {}]   ;;  %s4290_s3 = inlined_call_operand.vmem [shape: bf16[16,512], index: 3, kind: input, shape index: {}]   ;;  %s4291_s4 = inlined_call_operand.hbm [shape: bf16[128,512], index: 4, kind: input, shape index: {}]   ;;  %s4292_s5 = inlined_call_operand.hbm [shape: bf16[128,128], index: 5, kind: input, shape index: {}]   ;;  %s4293_s6 = inlined_call_operand.hbm [shape: f32[1,1,64,128], index: 6, kind: output, shape index: {0}]   ;;  %s4294_s7 = inlined_call_operand.hbm [shape: f32[8,128], index: 7, kind: output, shape index: {1}]   ;;  %s4295_s8 = inlined_call_operand.hbm [shape: f32[8,128], index: 8, kind: output, shape index: {2}]  }
   0x1   :  { %15 = vsyncpa [#allocation10], 0 }
   0x2   :  { %16 = vsyncpa [#allocation8], 0 }
   0x3   :  { %17 = vsyncpa [#allocation14], 0  ;;  %s3627_s27 = smov [#allocation9]  }
   0x4   :  { %s39_s28 = sshll.u32 %s3627_s27, 4  ;;  %s40_s28 = int_to_ptr.vmem [resolvable:$true] %s39_s28 }
   0x5   :  { %s3507_s29 = scalar_lea.vmem %s40_s28, 4096  ;;  %p3512_p1 = scmp.lt.s32.totalorder %s40_s28, %s40_s28 }
   0x6   :  { %p3508_p0 = scmp.ne.s32.totalorder %s40_s28, %s3507_s29  ;;  %p3513_p2 = scmp.lt.s32.totalorder %s3507_s29, %s3507_s29 }
   0x8   :  { %p3514_p3 = por %p3513_p2, %p3512_p1 }
   0xa   :  { %p3515_p4 = pnand %p3514_p3, %p3508_p0 }
   0xc   :  { %3518 = shalt.err (!%p3515_p4)
}
   0xd   :  { %s3628_s30 = smov 256   ;;  %s3629_s9 = smov 16  }
   0xe   :  { %45 = dma.hbm_to_vmem [thread:$0]  %s4291_s4, 4096, %s40_s28, [#allocation10], %s3628_s30, %s3628_s30, %s3629_s9  }
   0xf   :  { %s3630_s12 = smov [#allocation6]   ;;  %s3631_s14 = smov [#allocation11]  }
  0x10   :  { %s28_s13 = sshll.u32 %s3630_s12, 4  ;;  %s51_s15 = sshll.u32 %s3631_s14, 4  ;;  %s29_s13 = int_to_ptr.vmem [resolvable:$true] %s28_s13  ;;  %s52_s15 = int_to_ptr.vmem [resolvable:$true] %s51_s15 }
  0x11   :  { %s3527_s16 = scalar_lea.vmem %s29_s13, 128  ;;  %p3532_p6 = scmp.lt.s32.totalorder %s29_s13, %s29_s13 }
  0x12   :  { %p3528_p5 = scmp.ne.s32.totalorder %s29_s13, %s3527_s16  ;;  %p3533_p7 = scmp.lt.s32.totalorder %s3527_s16, %s3527_s16 }
  0x14   :  { %p3534_p8 = por %p3533_p7, %p3532_p6 }
  0x16   :  { %p3535_p9 = pnand %p3534_p8, %p3528_p5 }
  0x18   :  { %3538 = shalt.err (!%p3535_p9)
}
  0x19   :  { %31 = dma.hbm_to_vmem [thread:$0]  %s4289_s2, 128, %s29_s13, [#allocation7]  }
  0x1a   :  { %s3547_s19 = scalar_lea.vmem %s52_s15, 1024  ;;  %p3552_p11 = scmp.lt.s32.totalorder %s52_s15, %s52_s15 }
  0x1b   :  { %p3548_p10 = scmp.ne.s32.totalorder %s52_s15, %s3547_s19  ;;  %p3553_p12 = scmp.lt.s32.totalorder %s3547_s19, %s3547_s19 }
  0x1d   :  { %p3554_p13 = por %p3553_p12, %p3552_p11 }
  0x1f   :  { %p3555_p0 = pnand %p3554_p13, %p3548_p10 }
  0x21   :  { %3558 = shalt.err (!%p3555_p0)
}
  0x22   :  { %s3632_s4 = smov 64   ;;  %s3633_s20 = smov 4  }
  0x23   :  { %57 = dma.hbm_to_vmem [thread:$0]  %s4292_s5, 1024, %s52_s15, [#allocation10], %s3632_s4, %s3632_s4, %s3633_s20  }
  0x24   :  { %3619 = dma.done.wait [#allocation7], 128  }
  0x25   :  { %3620 = vsyncadd [#allocation7], 4294967168 }
  0x26   :  { %3621 = dma.done.wait [#allocation10], 5120  }
  0x27   :  { %3622 = vsyncadd [#allocation10], 4294962176  ;;  %v4296_v0 = vmov 0   ;;  %v3305_v1 = vld [vmem:[%s4290_s3 + $0xc] ss:$16 sps:$4 sm:$0xff]   ;;  %v3308_v3 = vld [vmem:[%s4287_s0] sm:$0xff]  }
  0x28   :  { %246 = vmatprep.mubr.bf16.mxu1 %v4296_v0  ;;  %173 = vmatprep.mubr.bf16.mxu0 %v4296_v0  ;;  %v3307_v2 = vld [vmem:[%s4290_s3 + $0x8] ss:$16 sps:$4 sm:$0xff]   ;;  %vm128_vm0 = vcmask 130048   ;;  %v3707_v5 = vld [vmem:[#allocation9 + $0xe4] ss:$16 sps:$4 sm:$0xff]   ;;  %v3322_v16 = vld [vmem:[%s4287_s0 + $0x10] sm:$0xff]  }
  0x29   :  { %228 = vmatprep.subr.bf16.mxu1 %v3305_v1  ;;  %v3705_v4 = vld [vmem:[#allocation9 + $0xe0] ss:$16 sps:$4 sm:$0xff]   ;;  %v3709_v6 = vld [vmem:[#allocation9 + $0xc4] ss:$16 sps:$4 sm:$0xff]   ;;  %v3333_v13 = vld [vmem:[%s4290_s3 + $0x4] ss:$16 sps:$4 sm:$0xff]  }
  0x2a   :  { %229 = vmatpush1.bf16.msra.mxu1 %v3307_v2  ;;  %v3714_v7 = vld [vmem:[#allocation9 + $0xc0] ss:$16 sps:$4 sm:$0xff]   ;;  %v3718_v8 = vld [vmem:[#allocation9 + $0xa4] ss:$16 sps:$4 sm:$0xff]   ;;  %155 = vmatprep.subr.bf16.mxu0 %v3333_v13  ;;  %v3338_v15 = vld [vmem:[%s4290_s3] ss:$16 sps:$4 sm:$0xff]  }
  0x2b   :  { %521 = vmatprep.subr.bf16.mxu1 %v3707_v5  ;;  %v3315_v9 = vld [vmem:[%s4287_s0 + $0x8] sm:$0xff]   ;;  %156 = vmatpush1.bf16.msra.mxu0 %v3338_v15  ;;  %v3329_v21 = vld [vmem:[%s4287_s0 + $0x18] sm:$0xff]   ;;  %v72_v25 = vld [vmem:[%s4288_s1] sm:$0xff]  ;;  %s3635_s0 = smov [#allocation13]  }
  0x2c   :  { %v3724_v10 = vld [vmem:[#allocation9 + $0xa0] ss:$16 sps:$4 sm:$0xff]   ;;  %v3727_v11 = vld [vmem:[#allocation9 + $0x84] ss:$16 sps:$4 sm:$0xff]   ;;  %826 = vmatprep.subr.bf16.mxu0 %v3707_v5  ;;  %v3782_v26 = vld [vmem:[#allocation9 + $0xec] ss:$16 sps:$4 sm:$0xff]   ;;  %v328_v28 = vpack.c.bf16 %v72_v25, %v72_v25 }
  0x2d   :  { %2988 = vmatmul.mubr.msk.bf16.vlgmr.msra.gmra.mxu1 %vm128_vm0, %v3308_v3  ;;  %v3730_v12 = vld [vmem:[#allocation9 + $0x80] ss:$16 sps:$4 sm:$0xff]   ;;  %v3738_v14 = vld [vmem:[#allocation9 + $0x64] ss:$16 sps:$4 sm:$0xff]   ;;  %v3789_v27 = vld [vmem:[#allocation9 + $0xe8] ss:$16 sps:$4 sm:$0xff]  }
  0x2e   :  { %522 = vmatpush1.bf16.msra.mxu1 %v3705_v4  ;;  %256 = vmatprep.mubr.bf16.mxu1 %v4296_v0  ;;  %v3747_v17 = vld [vmem:[#allocation9 + $0x60] ss:$16 sps:$4 sm:$0xff]   ;;  %v3750_v18 = vld [vmem:[#allocation9 + $0x44] ss:$16 sps:$4 sm:$0xff]   ;;  %v3793_v29 = vld [vmem:[#allocation9 + $0xcc] ss:$16 sps:$4 sm:$0xff]  }
  0x2f   :  { %523 = vmatprep.subr.bf16.mxu1 %v3709_v6  ;;  %2984 = vmatmul.mubr.msk.bf16.vlgmr.msra.gmra.mxu0 %vm128_vm0, %v3308_v3  ;;  %v3756_v19 = vld [vmem:[#allocation9 + $0x40] ss:$16 sps:$4 sm:$0xff]   ;;  %v3760_v20 = vld [vmem:[#allocation9 + $0x24] ss:$16 sps:$4 sm:$0xff]   ;;  %v3798_v30 = vld [vmem:[#allocation9 + $0xc8] ss:$16 sps:$4 sm:$0xff]  }
  0x30   :  { %827 = vmatpush1.bf16.msra.mxu0 %v3705_v4  ;;  %183 = vmatprep.mubr.bf16.mxu0 %v4296_v0  ;;  %v3769_v22 = vld [vmem:[#allocation9 + $0x20] ss:$16 sps:$4 sm:$0xff]   ;;  %v3772_v23 = vld [vmem:[#allocation9 + $0x4] ss:$16 sps:$4 sm:$0xff]   ;;  %v3801_v31 = vld [vmem:[#allocation9 + $0xac] ss:$16 sps:$4 sm:$0xff]  }
  0x31   :  { %828 = vmatprep.subr.bf16.mxu0 %v3709_v6  ;;  %v3775_v24 = vld [vmem:[#allocation9] ss:$16 sps:$4 sm:$0xff]   ;;  %v3808_v32 = vld [vmem:[#allocation9 + $0xa8] ss:$16 sps:$4 sm:$0xff]   ;;  %v3814_v33 = vld [vmem:[#allocation9 + $0x8c] ss:$16 sps:$4 sm:$0xff]  }
  0x32   :  { %524 = vmatpush1.bf16.msra.mxu1 %v3714_v7  ;;  %v3820_v34 = vld [vmem:[#allocation9 + $0x88] ss:$16 sps:$4 sm:$0xff]   ;;  %v3824_v35 = vld [vmem:[#allocation9 + $0x6c] ss:$16 sps:$4 sm:$0xff]   ;;  %s2942_s1 = sshll.u32 %s3635_s0, 4  ;;  %s2943_s1 = int_to_ptr.vmem [resolvable:$true] %s2942_s1 }
  0x33   :  { %525 = vmatprep.subr.bf16.mxu1 %v3718_v8  ;;  %v3829_v36 = vld [vmem:[#allocation9 + $0x68] ss:$16 sps:$4 sm:$0xff]   ;;  %v3832_v37 = vld [vmem:[#allocation9 + $0x4c] ss:$16 sps:$4 sm:$0xff]   ;;  %s3559_s16 = scalar_lea.vmem %s2943_s1, 128  ;;  %p3564_p2 = scmp.lt.s32.totalorder %s2943_s1, %s2943_s1 }
  0x34   :  { %829 = vmatpush1.bf16.msra.mxu0 %v3714_v7  ;;  %v3837_v38 = vld [vmem:[#allocation9 + $0x48] ss:$16 sps:$4 sm:$0xff]   ;;  %v3840_v39 = vld [vmem:[#allocation9 + $0x2c] ss:$16 sps:$4 sm:$0xff]   ;;  %p3560_p1 = scmp.ne.s32.totalorder %s2943_s1, %s3559_s16  ;;  %p3565_p3 = scmp.lt.s32.totalorder %s3559_s16, %s3559_s16 }
  0x35   :  { %2989 = vmatmul.mubr.msk.bf16.gmra.mxu1 %vm128_vm0, %v3315_v9  ;;  %830 = vmatprep.subr.bf16.mxu0 %v3718_v8  ;;  %v3843_v40 = vld [vmem:[#allocation9 + $0x28] ss:$16 sps:$4 sm:$0xff]   ;;  %v3846_v41 = vld [vmem:[#allocation9 + $0xc] ss:$16 sps:$4 sm:$0xff]  }
  0x36   :  { %526 = vmatpush1.bf16.msra.mxu1 %v3724_v10  ;;  %266 = vmatprep.mubr.bf16.mxu1 %v4296_v0  ;;  %v3849_v42 = vld [vmem:[#allocation9 + $0x8] ss:$16 sps:$4 sm:$0xff]   ;;  %p3566_p4 = por %p3565_p3, %p3564_p2 }
  0x37   :  { %527 = vmatprep.subr.bf16.mxu1 %v3727_v11  ;;  %2985 = vmatmul.mubr.msk.bf16.gmra.mxu0 %vm128_vm0, %v3315_v9 }
  0x38   :  { %831 = vmatpush1.bf16.msra.mxu0 %v3724_v10  ;;  %193 = vmatprep.mubr.bf16.mxu0 %v4296_v0  ;;  %p3567_p5 = pnand %p3566_p4, %p3560_p1 }
  0x39   :  { %832 = vmatprep.subr.bf16.mxu0 %v3727_v11 }
  0x3a   :  { %528 = vmatpush1.bf16.msra.mxu1 %v3730_v12 }
  0x3b   :  { %529 = vmatprep.subr.bf16.mxu1 %v3738_v14 }
  0x3c   :  { %833 = vmatpush1.bf16.msra.mxu0 %v3730_v12 }
  0x3d   :  { %2990 = vmatmul.mubr.msk.bf16.gmra.mxu1 %vm128_vm0, %v3322_v16  ;;  %834 = vmatprep.subr.bf16.mxu0 %v3738_v14 }
  0x3e   :  { %530 = vmatpush1.bf16.msra.mxu1 %v3747_v17  ;;  %276 = vmatprep.mubr.bf16.mxu1 %v4296_v0 }
  0x3f   :  { %531 = vmatprep.subr.bf16.mxu1 %v3750_v18  ;;  %2986 = vmatmul.mubr.msk.bf16.gmra.mxu0 %vm128_vm0, %v3322_v16 }
  0x40   :  { %835 = vmatpush1.bf16.msra.mxu0 %v3747_v17  ;;  %203 = vmatprep.mubr.bf16.mxu0 %v4296_v0 }
  0x41   :  { %836 = vmatprep.subr.bf16.mxu0 %v3750_v18 }
  0x42   :  { %532 = vmatpush1.bf16.msra.mxu1 %v3756_v19 }
  0x43   :  { %533 = vmatprep.subr.bf16.mxu1 %v3760_v20 }
  0x44   :  { %837 = vmatpush1.bf16.msra.mxu0 %v3756_v19 }
  0x45   :  { %2991 = vmatmul.mubr.msk.bf16.gmra.mxu1 %vm128_vm0, %v3329_v21  ;;  %838 = vmatprep.subr.bf16.mxu0 %v3760_v20 }
  0x46   :  { %534 = vmatpush1.bf16.msra.mxu1 %v3769_v22  ;;  %553 = vmatprep.mubr.bf16.mxu1 %v4296_v0 }
  0x47   :  { %535 = vmatprep.subr.bf16.mxu1 %v3772_v23  ;;  %2987 = vmatmul.mubr.msk.bf16.gmra.mxu0 %vm128_vm0, %v3329_v21 }
  0x48   :  { %858 = vmatprep.mubr.bf16.mxu0 %v4296_v0  ;;  %839 = vmatpush1.bf16.msra.mxu0 %v3769_v22 }
  0x49   :  { %840 = vmatprep.subr.bf16.mxu0 %v3772_v23 }
  0x4a   :  { %536 = vmatpush1.bf16.msra.mxu1 %v3775_v24 }
  0x4b   :  { %562 = vmatprep.subr.bf16.mxu1 %v3782_v26 }
  0x4c   :  { %841 = vmatpush1.bf16.msra.mxu0 %v3775_v24 }
  0x4d   :  { %554 = vmatmul.mubr.bf16.vlgmr.msra.gmra.mxu1 %v328_v28  ;;  %1132 = vmatprep.subr.bf16.mxu0 %v3707_v5 }
  0x4e   :  { %563 = vmatpush1.bf16.msra.mxu1 %v3789_v27  ;;  %594 = vmatprep.mubr.bf16.mxu1 %v4296_v0 }
  0x4f   :  { %564 = vmatprep.subr.bf16.mxu1 %v3793_v29 }
  0x52   :  { %565 = vmatpush1.bf16.msra.mxu1 %v3798_v30 }
  0x53   :  { %566 = vmatprep.subr.bf16.mxu1 %v3801_v31 }
  0x56   :  { %567 = vmatpush1.bf16.msra.mxu1 %v3808_v32 }
  0x57   :  { %568 = vmatprep.subr.bf16.mxu1 %v3814_v33 }
  0x5a   :  { %569 = vmatpush1.bf16.msra.mxu1 %v3820_v34 }
  0x5b   :  { %570 = vmatprep.subr.bf16.mxu1 %v3824_v35 }
  0x5e   :  { %571 = vmatpush1.bf16.msra.mxu1 %v3829_v36 }
  0x5f   :  { %572 = vmatprep.subr.bf16.mxu1 %v3832_v37 }
  0x62   :  { %573 = vmatpush1.bf16.msra.mxu1 %v3837_v38 }
  0x63   :  { %574 = vmatprep.subr.bf16.mxu1 %v3840_v39 }
  0x66   :  { %575 = vmatpush1.bf16.msra.mxu1 %v3843_v40 }
  0x67   :  { %576 = vmatprep.subr.bf16.mxu1 %v3846_v41 }
  0x6a   :  { %577 = vmatpush1.bf16.msra.mxu1 %v3849_v42 }
  0x6b   :  { %867 = vmatprep.subr.bf16.mxu1 %v3782_v26 }
  0x6d   :  { %595 = vmatmul.mubr.bf16.vlgmr.msra.gmra.mxu1 %v328_v28 }
  0x6e   :  { %868 = vmatpush1.bf16.msra.mxu1 %v3789_v27  ;;  %899 = vmatprep.mubr.bf16.mxu1 %v4296_v0 }
  0x6f   :  { %869 = vmatprep.subr.bf16.mxu1 %v3793_v29 }
  0x72   :  { %870 = vmatpush1.bf16.msra.mxu1 %v3798_v30 }
  0x73   :  { %871 = vmatprep.subr.bf16.mxu1 %v3801_v31 }
  0x76   :  { %872 = vmatpush1.bf16.msra.mxu1 %v3808_v32 }
  0x77   :  { %873 = vmatprep.subr.bf16.mxu1 %v3814_v33 }
  0x7a   :  { %874 = vmatpush1.bf16.msra.mxu1 %v3820_v34 }
  0x7b   :  { %875 = vmatprep.subr.bf16.mxu1 %v3824_v35 }
  0x7e   :  { %876 = vmatpush1.bf16.msra.mxu1 %v3829_v36 }
  0x7f   :  { %877 = vmatprep.subr.bf16.mxu1 %v3832_v37 }
  0x82   :  { %878 = vmatpush1.bf16.msra.mxu1 %v3837_v38 }
  0x83   :  { %879 = vmatprep.subr.bf16.mxu1 %v3840_v39 }
  0x86   :  { %880 = vmatpush1.bf16.msra.mxu1 %v3843_v40 }
  0x87   :  { %881 = vmatprep.subr.bf16.mxu1 %v3846_v41 }
  0x8a   :  { %882 = vmatpush1.bf16.msra.mxu1 %v3849_v42 }
  0x8b   :  { %1173 = vmatprep.subr.bf16.mxu1 %v3782_v26 }
  0xed   :  { %v248_v43 = vpop.f32.mrf.mxu1 }
  0xef   :  { %v250_v44 = vpop.f32.mrf.mxu1  ;;  %v175_v63 = vpop.f32.mrf.mxu0 }
  0xf1   :  { %v3871_v45 = vpop.f32.mrf.mxu1  ;;  %v177_v1 = vpop.f32.mrf.mxu0 }
  0xf3   :  { %v3873_v46 = vpop.f32.mrf.mxu1 }
  0xf5   :  { %v3875_v47 = vpop.f32.mrf.mxu1 }
  0xf7   :  { %v3877_v48 = vpop.f32.mrf.mxu1 }
  0xf9   :  { %v3879_v49 = vpop.f32.mrf.mxu1 }
  0xfb   :  { %v3881_v50 = vpop.f32.mrf.mxu1 }
  0xfd   :  { %v3883_v51 = vpop.f32.mrf.mxu1 }
  0xfe   :  { %4299 = vst [vmem:[#allocation20_spill] sm:$0xff] %v3883_v51 }
  0xff   :  { %v3885_v52 = vpop.f32.mrf.mxu1 }
 0x100   :  { %4300 = vst [vmem:[#allocation21_spill] sm:$0xff] %v3885_v52 }
 0x101   :  { %v3887_v53 = vpop.f32.mrf.mxu1 }
 0x102   :  { %4301 = vst [vmem:[#allocation22_spill] sm:$0xff] %v3887_v53 }
 0x103   :  { %v3889_v54 = vpop.f32.mrf.mxu1 }
 0x104   :  { %4302 = vst [vmem:[#allocation23_spill] sm:$0xff] %v3889_v54 }
 0x105   :  { %v3891_v55 = vpop.f32.mrf.mxu1 }
 0x106   :  { %4303 = vst [vmem:[#allocation24_spill] sm:$0xff] %v3891_v55 }
 0x107   :  { %v3893_v56 = vpop.f32.mrf.mxu1 }
 0x108   :  { %4304 = vst [vmem:[#allocation25_spill] sm:$0xff] %v3893_v56 }
 0x109   :  { %v3895_v57 = vpop.f32.mrf.mxu1 }
 0x10a   :  { %4305 = vst [vmem:[#allocation26_spill] sm:$0xff] %v3895_v57 }
 0x10b   :  { %v3897_v58 = vpop.f32.mrf.mxu1 }
 0x10c   :  { %4306 = vst [vmem:[#allocation27_spill] sm:$0xff] %v3897_v58 }
 0x10d   :  { %v555_v59 = vpop.f32.mrf.mxu1 }
 0x10e   :  { %v603_v3 = vadd.f32 %v555_v59, %v175_v63 }
 0x10f   :  { %v557_v60 = vpop.f32.mrf.mxu1 }
 0x110   :  { %v604_v2 = vadd.f32 %v557_v60, %v177_v1  ;;  %v607_v13 = vmul.f32 0.5, %v603_v3  ;;  %v74_v60 = vld [vmem:[#allocation6] sm:$0xff] }
 0x111   :  { %v559_v61 = vpop.f32.mrf.mxu1 }
 0x112   :  { %v611_v9 = vmul.f32 0.5, %v604_v2 }
 0x113   :  { %v560_v62 = vpop.f32.mrf.mxu1 }
 0x114   :  { %3419 = vtanh.f32 %v611_v9 }
 0x115   :  { %3421 = vtanh.f32 %v607_v13 }
 0x121   :  { %v3420_v0 = vpop.eup %3419 }
 0x122   :  { %v3422_v57 = vpop.eup %3421  ;;  %v613_v56 = vmul.f32 0.5, %v3420_v0 }
 0x123   :  { %v609_v62 = vmul.f32 0.5, %v3422_v57 }
 0x124   :  { %v614_v55 = vadd.f32 0.5, %v613_v56  ;;  %v179_v56 = vpop.f32.mrf.mxu0 }
 0x125   :  { %v610_v59 = vadd.f32 0.5, %v609_v62 }
 0x126   :  { %v620_v1 = vmul.f32 %v614_v55, %v74_v60  ;;  %v4308_v55 = vmov 0   ;;  %v181_v57 = vpop.f32.mrf.mxu0 }
 0x12d   :  { %v596_v15 = vpop.f32.mrf.mxu1 }
 0x12e   :  { %v605_v16 = vadd.f32 %v596_v15, %v248_v43  ;;  %v3940_v15 = vpop.f32.mrf.mxu0 }
 0x12f   :  { %v598_v21 = vpop.f32.mrf.mxu1 }
 0x130   :  { %3423 = vtanh.f32 %v605_v16  ;;  %v606_v28 = vadd.f32 %v598_v21, %v250_v44  ;;  %v3942_v16 = vpop.f32.mrf.mxu0 }
 0x131   :  { %v600_v25 = vpop.f32.mrf.mxu1 }
 0x132   :  { %v616_v61 = vmul.f32 0.5, %v606_v28  ;;  %v3944_v21 = vpop.f32.mrf.mxu0 }
 0x133   :  { %v601_v58 = vpop.f32.mrf.mxu1 }
 0x134   :  { %3425 = vtanh.f32 %v616_v61  ;;  %v3946_v25 = vpop.f32.mrf.mxu0 }
 0x136   :  { %v3948_v28 = vpop.f32.mrf.mxu0 }
 0x138   :  { %v3950_v61 = vpop.f32.mrf.mxu0 }
 0x13a   :  { %v3952_v62 = vpop.f32.mrf.mxu0 }
 0x13b   :  { %4309 = vst [vmem:[#allocation29_spill] sm:$0xff] %v3952_v62 }
 0x13c   :  { %v3954_v60 = vpop.f32.mrf.mxu0 }
 0x13d   :  { %v3424_v63 = vpop.eup %3423  ;;  %4310 = vst [vmem:[#allocation30_spill] sm:$0xff] %v3954_v60 }
 0x13e   :  { %v621_v2 = vmul.f32 %v3424_v63, %v610_v59 }
 0x140   :  { %v3899_v3 = vadd.f32 %v621_v2, %v620_v1 }
 0x141   :  { %v3426_v43 = vpop.eup %3425 }
 0x142   :  { %3427 = vtanh.f32 %v3899_v3  ;;  %v618_v9 = vmul.f32 0.5, %v3426_v43 }
 0x144   :  { %v619_v44 = vadd.f32 0.5, %v618_v9 }
 0x14f   :  { %v3428_v13 = vpop.eup %3427 }
 0x150   :  { %v3902_v58 = vmul.f32 %v3428_v13, %v619_v44 }
 0x152   :  { %4307 = vst [vmem:[#allocation28_spill] sm:$0xff] %v3902_v58  ;;  %v633_v0 = vpack.c.bf16 %v3902_v58, %v3902_v58 }
 0x154   :  { %859 = vmatmul.mubr.bf16.vlgmr.msra.gmra.mxu0 %v633_v0  ;;  %900 = vmatmul.mubr.bf16.vlgmr.msra.gmra.mxu1 %v633_v0 }
 0x155   :  { %1133 = vmatpush1.bf16.msra.mxu0 %v3705_v4  ;;  %1174 = vmatpush1.bf16.msra.mxu1 %v3789_v27 }
 0x156   :  { %1134 = vmatprep.subr.bf16.mxu0 %v3709_v6  ;;  %1175 = vmatprep.subr.bf16.mxu1 %v3793_v29 }
 0x157   :  { %1164 = vmatprep.mubr.bf16.mxu0 %v4308_v55  ;;  %1205 = vmatprep.mubr.bf16.mxu1 %v4308_v55 }
 0x159   :  { %1135 = vmatpush1.bf16.msra.mxu0 %v3714_v7  ;;  %1176 = vmatpush1.bf16.msra.mxu1 %v3798_v30 }
 0x15a   :  { %1136 = vmatprep.subr.bf16.mxu0 %v3718_v8  ;;  %1177 = vmatprep.subr.bf16.mxu1 %v3801_v31 }
 0x15d   :  { %1137 = vmatpush1.bf16.msra.mxu0 %v3724_v10  ;;  %1178 = vmatpush1.bf16.msra.mxu1 %v3808_v32 }
 0x15e   :  { %1138 = vmatprep.subr.bf16.mxu0 %v3727_v11  ;;  %1179 = vmatprep.subr.bf16.mxu1 %v3814_v33 }
 0x161   :  { %1139 = vmatpush1.bf16.msra.mxu0 %v3730_v12  ;;  %1180 = vmatpush1.bf16.msra.mxu1 %v3820_v34 }
 0x162   :  { %1140 = vmatprep.subr.bf16.mxu0 %v3738_v14  ;;  %1181 = vmatprep.subr.bf16.mxu1 %v3824_v35 }
 0x165   :  { %1141 = vmatpush1.bf16.msra.mxu0 %v3747_v17  ;;  %1182 = vmatpush1.bf16.msra.mxu1 %v3829_v36 }
 0x166   :  { %1142 = vmatprep.subr.bf16.mxu0 %v3750_v18  ;;  %1183 = vmatprep.subr.bf16.mxu1 %v3832_v37 }
 0x169   :  { %1143 = vmatpush1.bf16.msra.mxu0 %v3756_v19  ;;  %1184 = vmatpush1.bf16.msra.mxu1 %v3837_v38 }
 0x16a   :  { %1144 = vmatprep.subr.bf16.mxu0 %v3760_v20  ;;  %1185 = vmatprep.subr.bf16.mxu1 %v3840_v39 }
 0x16d   :  { %1145 = vmatpush1.bf16.msra.mxu0 %v3769_v22  ;;  %1186 = vmatpush1.bf16.msra.mxu1 %v3843_v40 }
 0x16e   :  { %1146 = vmatprep.subr.bf16.mxu0 %v3772_v23  ;;  %1187 = vmatprep.subr.bf16.mxu1 %v3846_v41 }
 0x171   :  { %1147 = vmatpush1.bf16.msra.mxu0 %v3775_v24  ;;  %1188 = vmatpush1.bf16.msra.mxu1 %v3849_v42 }
 0x172   :  { %1438 = vmatprep.subr.bf16.mxu0 %v3707_v5  ;;  %1479 = vmatprep.subr.bf16.mxu1 %v3782_v26  ;;  %v3956_v5 = vpop.f32.mrf.mxu0 }
 0x173   :  { %4311 = vst [vmem:[#allocation31_spill] sm:$0xff] %v3956_v5 }
 0x174   :  { %v3958_v26 = vpop.f32.mrf.mxu0 }
 0x175   :  { %4312 = vst [vmem:[#allocation32_spill] sm:$0xff] %v3958_v26 }
 0x176   :  { %v3960_v59 = vpop.f32.mrf.mxu0 }
 0x177   :  { %4313 = vst [vmem:[#allocation33_spill] sm:$0xff] %v3960_v59 }
 0x178   :  { %v3962_v63 = vpop.f32.mrf.mxu0 }
 0x179   :  { %4314 = vst [vmem:[#allocation34_spill] sm:$0xff] %v3962_v63 }
 0x214   :  { %v860_v1 = vpop.f32.mrf.mxu0  ;;  %v901_v2 = vpop.f32.mrf.mxu1 }
 0x215   :  { %v908_v43 = vadd.f32 %v860_v1, %v179_v56  ;;  %v910_v5 = vadd.f32 %v901_v2, %v3871_v45  ;;  %v4044_v2 = vld [vmem:[#allocation9 + $0xa4] ss:$16 sps:$4 sm:$0xff]  }
 0x216   :  { %v862_v9 = vpop.f32.mrf.mxu0  ;;  %v903_v44 = vpop.f32.mrf.mxu1 }
 0x217   :  { %v912_v13 = vmul.f32 0.5, %v908_v43  ;;  %v909_v0 = vadd.f32 %v862_v9, %v181_v57  ;;  %v911_v59 = vadd.f32 %v903_v44, %v3873_v46  ;;  %v4046_v9 = vld [vmem:[#allocation9 + $0xac] ss:$16 sps:$4 sm:$0xff]   ;;  %v4048_v44 = vld [vmem:[#allocation9 + $0xa0] ss:$16 sps:$4 sm:$0xff]  }
 0x218   :  { %v864_v58 = vpop.f32.mrf.mxu0  ;;  %v905_v54 = vpop.f32.mrf.mxu1 }
 0x219   :  { %3429 = vtanh.f32 %v912_v13  ;;  %v916_v53 = vmul.f32 0.5, %v909_v0  ;;  %v921_v63 = vmul.f32 0.5, %v911_v59  ;;  %v4036_v59 = vld [vmem:[#allocation9 + $0xc0] ss:$16 sps:$4 sm:$0xff]   ;;  %v4050_v13 = vld [vmem:[#allocation9 + $0xa8] ss:$16 sps:$4 sm:$0xff]  }
 0x21a   :  { %v865_v60 = vpop.f32.mrf.mxu0  ;;  %v906_v62 = vpop.f32.mrf.mxu1  ;;  %v4056_v0 = vld [vmem:[#allocation9 + $0x84] ss:$16 sps:$4 sm:$0xff]  }
 0x21b   :  { %3431 = vtanh.f32 %v916_v53 }
 0x21c   :  { %3433 = vtanh.f32 %v910_v5 }
 0x21d   :  { %3435 = vtanh.f32 %v921_v63  ;;  %v4038_v63 = vld [vmem:[#allocation9 + $0xc8] ss:$16 sps:$4 sm:$0xff]  }
 0x226   :  { %v3430_v26 = vpop.eup %3429 }
 0x227   :  { %v914_v52 = vmul.f32 0.5, %v3430_v26  ;;  %v4034_v26 = vld [vmem:[#allocation9 + $0xcc] ss:$16 sps:$4 sm:$0xff]  }
 0x228   :  { %v3432_v56 = vpop.eup %3431 }
 0x229   :  { %v915_v1 = vadd.f32 0.5, %v914_v52  ;;  %v918_v51 = vmul.f32 0.5, %v3432_v56  ;;  %v3434_v58 = vpop.eup %3433  ;;  %v4058_v56 = vld [vmem:[#allocation9 + $0x8c] ss:$16 sps:$4 sm:$0xff]  }
 0x22a   :  { %v3436_v45 = vpop.eup %3435 }
 0x22b   :  { %v919_v57 = vadd.f32 0.5, %v918_v51  ;;  %v926_v43 = vmul.f32 %v3434_v58, %v915_v1  ;;  %v923_v53 = vmul.f32 0.5, %v3436_v45  ;;  %v4022_v51 = vld [vmem:[#allocation9 + $0xec] ss:$16 sps:$4 sm:$0xff]   ;;  %v4060_v1 = vld [vmem:[#allocation9 + $0x80] ss:$16 sps:$4 sm:$0xff]  }
 0x22c   :  { %v4068_v58 = vld [vmem:[#allocation9 + $0x64] ss:$16 sps:$4 sm:$0xff]  }
 0x22d   :  { %v925_v54 = vmul.f32 %v919_v57, %v3899_v3  ;;  %v924_v62 = vadd.f32 0.5, %v923_v53  ;;  %v4024_v3 = vld [vmem:[#allocation9 + $0xe0] ss:$16 sps:$4 sm:$0xff]   ;;  %v4062_v57 = vld [vmem:[#allocation9 + $0x88] ss:$16 sps:$4 sm:$0xff]  }
 0x22e   :  { %v4080_v45 = vld [vmem:[#allocation9 + $0x44] ss:$16 sps:$4 sm:$0xff]   ;;  %v4082_v53 = vld [vmem:[#allocation9 + $0x4c] ss:$16 sps:$4 sm:$0xff]  }
 0x22f   :  { %v3967_v60 = vadd.f32 %v926_v43, %v925_v54  ;;  %v4070_v54 = vld [vmem:[#allocation9 + $0x6c] ss:$16 sps:$4 sm:$0xff]   ;;  %v4072_v43 = vld [vmem:[#allocation9 + $0x60] ss:$16 sps:$4 sm:$0xff]  }
 0x231   :  { %3437 = vtanh.f32 %v3967_v60 }
 0x23e   :  { %v3438_v46 = vpop.eup %3437 }
 0x23f   :  { %v3970_v5 = vmul.f32 %v3438_v46, %v924_v62  ;;  %v4084_v62 = vld [vmem:[#allocation9 + $0x40] ss:$16 sps:$4 sm:$0xff]   ;;  %v4086_v46 = vld [vmem:[#allocation9 + $0x48] ss:$16 sps:$4 sm:$0xff]  }
 0x241   :  { %v939_v52 = vpack.c.bf16 %v3970_v5, %v3970_v5 }
 0x243   :  { %1165 = vmatmul.mubr.bf16.vlgmr.msra.gmra.mxu0 %v939_v52  ;;  %1206 = vmatmul.mubr.bf16.vlgmr.msra.gmra.mxu1 %v939_v52  ;;  %v4092_v52 = vld [vmem:[#allocation9 + $0x24] ss:$16 sps:$4 sm:$0xff]  }
 0x244   :  { %1439 = vmatpush1.bf16.msra.mxu0 %v3705_v4  ;;  %1480 = vmatpush1.bf16.msra.mxu1 %v3789_v27 }
 0x245   :  { %1440 = vmatprep.subr.bf16.mxu0 %v3709_v6  ;;  %1481 = vmatprep.subr.bf16.mxu1 %v3793_v29 }
 0x246   :  { %1470 = vmatprep.mubr.bf16.mxu0 %v4308_v55  ;;  %1511 = vmatprep.mubr.bf16.mxu1 %v4308_v55 }
 0x248   :  { %1441 = vmatpush1.bf16.msra.mxu0 %v3714_v7  ;;  %1482 = vmatpush1.bf16.msra.mxu1 %v3798_v30 }
 0x249   :  { %1442 = vmatprep.subr.bf16.mxu0 %v3718_v8  ;;  %1483 = vmatprep.subr.bf16.mxu1 %v3801_v31 }
 0x24c   :  { %1443 = vmatpush1.bf16.msra.mxu0 %v3724_v10  ;;  %1484 = vmatpush1.bf16.msra.mxu1 %v3808_v32 }
 0x24d   :  { %1444 = vmatprep.subr.bf16.mxu0 %v3727_v11  ;;  %1485 = vmatprep.subr.bf16.mxu1 %v3814_v33 }
 0x250   :  { %1445 = vmatpush1.bf16.msra.mxu0 %v3730_v12  ;;  %1486 = vmatpush1.bf16.msra.mxu1 %v3820_v34 }
 0x251   :  { %1446 = vmatprep.subr.bf16.mxu0 %v3738_v14  ;;  %1487 = vmatprep.subr.bf16.mxu1 %v3824_v35 }
 0x254   :  { %1447 = vmatpush1.bf16.msra.mxu0 %v3747_v17  ;;  %1488 = vmatpush1.bf16.msra.mxu1 %v3829_v36 }
 0x255   :  { %1448 = vmatprep.subr.bf16.mxu0 %v3750_v18  ;;  %1489 = vmatprep.subr.bf16.mxu1 %v3832_v37 }
 0x258   :  { %1449 = vmatpush1.bf16.msra.mxu0 %v3756_v19  ;;  %1490 = vmatpush1.bf16.msra.mxu1 %v3837_v38 }
 0x259   :  { %1450 = vmatprep.subr.bf16.mxu0 %v3760_v20  ;;  %1491 = vmatprep.subr.bf16.mxu1 %v3840_v39 }
 0x25c   :  { %1451 = vmatpush1.bf16.msra.mxu0 %v3769_v22  ;;  %1492 = vmatpush1.bf16.msra.mxu1 %v3843_v40 }
 0x25d   :  { %1452 = vmatprep.subr.bf16.mxu0 %v3772_v23  ;;  %1493 = vmatprep.subr.bf16.mxu1 %v3846_v41 }
 0x260   :  { %1453 = vmatpush1.bf16.msra.mxu0 %v3775_v24  ;;  %1494 = vmatpush1.bf16.msra.mxu1 %v3849_v42 }
 0x261   :  { %1785 = vmatprep.subr.bf16.mxu1 %v4022_v51 }
 0x303   :  { %v1166_v4 = vpop.f32.mrf.mxu0  ;;  %v1207_v6 = vpop.f32.mrf.mxu1 }
 0x304   :  { %v1214_v7 = vadd.f32 %v1166_v4, %v3940_v15  ;;  %v1216_v22 = vadd.f32 %v1207_v6, %v3875_v47  ;;  %v4026_v15 = vld [vmem:[#allocation9 + $0xe8] ss:$16 sps:$4 sm:$0xff]   ;;  %v4094_v4 = vld [vmem:[#allocation9 + $0x2c] ss:$16 sps:$4 sm:$0xff]   ;;  %v4096_v6 = vld [vmem:[#allocation9 + $0x20] ss:$16 sps:$4 sm:$0xff]  }
 0x305   :  { %v1168_v8 = vpop.f32.mrf.mxu0  ;;  %v1209_v10 = vpop.f32.mrf.mxu1 }
 0x306   :  { %v1218_v11 = vmul.f32 0.5, %v1214_v7  ;;  %v1215_v12 = vadd.f32 %v1168_v8, %v3942_v16  ;;  %v1217_v23 = vadd.f32 %v1209_v10, %v3877_v48  ;;  %v4020_v48 = vld [vmem:[#allocation9 + $0xe4] ss:$16 sps:$4 sm:$0xff]   ;;  %v4098_v7 = vld [vmem:[#allocation9 + $0x28] ss:$16 sps:$4 sm:$0xff]  }
 0x307   :  { %v1170_v14 = vpop.f32.mrf.mxu0  ;;  %v1211_v17 = vpop.f32.mrf.mxu1  ;;  %1744 = vmatprep.subr.bf16.mxu0 %v4020_v48  ;;  %v4032_v16 = vld [vmem:[#allocation9 + $0xc4] ss:$16 sps:$4 sm:$0xff]   ;;  %v4106_v10 = vld [vmem:[#allocation9 + $0xc] ss:$16 sps:$4 sm:$0xff]  }
 0x308   :  { %3439 = vtanh.f32 %v1218_v11  ;;  %v1222_v18 = vmul.f32 0.5, %v1215_v12  ;;  %v1227_v24 = vmul.f32 0.5, %v1217_v23  ;;  %v4104_v8 = vld [vmem:[#allocation9 + $0x4] ss:$16 sps:$4 sm:$0xff]   ;;  %v4108_v11 = vld [vmem:[#allocation9] ss:$16 sps:$4 sm:$0xff]  }
 0x309   :  { %v1171_v19 = vpop.f32.mrf.mxu0  ;;  %v1212_v20 = vpop.f32.mrf.mxu1  ;;  %v4110_v12 = vld [vmem:[#allocation9 + $0x8] ss:$16 sps:$4 sm:$0xff]  }
 0x30a   :  { %3441 = vtanh.f32 %v1222_v18 }
 0x30b   :  { %3443 = vtanh.f32 %v1216_v22 }
 0x30c   :  { %3445 = vtanh.f32 %v1227_v24 }
 0x315   :  { %v3440_v27 = vpop.eup %3439 }
 0x316   :  { %v1220_v29 = vmul.f32 0.5, %v3440_v27 }
 0x317   :  { %v3442_v30 = vpop.eup %3441 }
 0x318   :  { %v1221_v31 = vadd.f32 0.5, %v1220_v29  ;;  %v1224_v32 = vmul.f32 0.5, %v3442_v30  ;;  %v3444_v34 = vpop.eup %3443 }
 0x319   :  { %v3446_v38 = vpop.eup %3445 }
 0x31a   :  { %v1225_v33 = vadd.f32 0.5, %v1224_v32  ;;  %v1232_v36 = vmul.f32 %v3444_v34, %v1221_v31  ;;  %v1229_v39 = vmul.f32 0.5, %v3446_v38 }
 0x31c   :  { %v1231_v35 = vmul.f32 %v1225_v33, %v3967_v60  ;;  %v1230_v40 = vadd.f32 0.5, %v1229_v39  ;;  %v4074_v60 = vld [vmem:[#allocation9 + $0x68] ss:$16 sps:$4 sm:$0xff]  }
 0x31e   :  { %v4011_v37 = vadd.f32 %v1232_v36, %v1231_v35 }
 0x320   :  { %3447 = vtanh.f32 %v4011_v37 }
 0x32d   :  { %v3448_v41 = vpop.eup %3447 }
 0x32e   :  { %v4014_v42 = vmul.f32 %v3448_v41, %v1230_v40 }
 0x330   :  { %v1245_v47 = vpack.c.bf16 %v4014_v42, %v4014_v42 }
 0x332   :  { %1471 = vmatmul.mubr.bf16.vlgmr.msra.gmra.mxu0 %v1245_v47  ;;  %1512 = vmatmul.mubr.bf16.vlgmr.msra.gmra.mxu1 %v1245_v47 }
 0x333   :  { %1776 = vmatprep.mubr.bf16.mxu0 %v4308_v55  ;;  %1817 = vmatprep.mubr.bf16.mxu1 %v4308_v55 }
 0x334   :  { %1745 = vmatpush1.bf16.msra.mxu0 %v4024_v3  ;;  %1786 = vmatpush1.bf16.msra.mxu1 %v4026_v15 }
 0x335   :  { %1746 = vmatprep.subr.bf16.mxu0 %v4032_v16  ;;  %1787 = vmatprep.subr.bf16.mxu1 %v4034_v26 }
 0x338   :  { %1747 = vmatpush1.bf16.msra.mxu0 %v4036_v59  ;;  %1788 = vmatpush1.bf16.msra.mxu1 %v4038_v63 }
 0x339   :  { %1748 = vmatprep.subr.bf16.mxu0 %v4044_v2  ;;  %1789 = vmatprep.subr.bf16.mxu1 %v4046_v9 }
 0x33c   :  { %1749 = vmatpush1.bf16.msra.mxu0 %v4048_v44  ;;  %1790 = vmatpush1.bf16.msra.mxu1 %v4050_v13 }
 0x33d   :  { %1750 = vmatprep.subr.bf16.mxu0 %v4056_v0  ;;  %1791 = vmatprep.subr.bf16.mxu1 %v4058_v56 }
 0x340   :  { %1751 = vmatpush1.bf16.msra.mxu0 %v4060_v1  ;;  %1792 = vmatpush1.bf16.msra.mxu1 %v4062_v57 }
 0x341   :  { %1752 = vmatprep.subr.bf16.mxu0 %v4068_v58  ;;  %1793 = vmatprep.subr.bf16.mxu1 %v4070_v54 }
 0x344   :  { %1753 = vmatpush1.bf16.msra.mxu0 %v4072_v43  ;;  %1794 = vmatpush1.bf16.msra.mxu1 %v4074_v60 }
 0x345   :  { %1754 = vmatprep.subr.bf16.mxu0 %v4080_v45  ;;  %1795 = vmatprep.subr.bf16.mxu1 %v4082_v53 }
 0x348   :  { %1755 = vmatpush1.bf16.msra.mxu0 %v4084_v62  ;;  %1796 = vmatpush1.bf16.msra.mxu1 %v4086_v46 }
 0x349   :  { %1756 = vmatprep.subr.bf16.mxu0 %v4092_v52  ;;  %1797 = vmatprep.subr.bf16.mxu1 %v4094_v4 }
 0x34c   :  { %1757 = vmatpush1.bf16.msra.mxu0 %v4096_v6  ;;  %1798 = vmatpush1.bf16.msra.mxu1 %v4098_v7 }
 0x34d   :  { %1758 = vmatprep.subr.bf16.mxu0 %v4104_v8  ;;  %1799 = vmatprep.subr.bf16.mxu1 %v4106_v10 }
 0x350   :  { %1759 = vmatpush1.bf16.msra.mxu0 %v4108_v11  ;;  %1800 = vmatpush1.bf16.msra.mxu1 %v4110_v12 }
 0x351   :  { %2050 = vmatprep.subr.bf16.mxu0 %v4020_v48  ;;  %2091 = vmatprep.subr.bf16.mxu1 %v4022_v51 }
 0x3f2   :  { %v1472_v14 = vpop.f32.mrf.mxu0  ;;  %v1513_v17 = vpop.f32.mrf.mxu1 }
 0x3f3   :  { %v1520_v18 = vadd.f32 %v1472_v14, %v3944_v21  ;;  %v1522_v32 = vadd.f32 %v1513_v17, %v3879_v49 }
 0x3f4   :  { %v1474_v19 = vpop.f32.mrf.mxu0  ;;  %v1515_v20 = vpop.f32.mrf.mxu1 }
 0x3f5   :  { %v1524_v22 = vmul.f32 0.5, %v1520_v18  ;;  %v1521_v23 = vadd.f32 %v1474_v19, %v3946_v25  ;;  %v1523_v33 = vadd.f32 %v1515_v20, %v3881_v50 }
 0x3f6   :  { %v1476_v24 = vpop.f32.mrf.mxu0  ;;  %v1517_v27 = vpop.f32.mrf.mxu1 }
 0x3f7   :  { %3449 = vtanh.f32 %v1524_v22  ;;  %v1528_v29 = vmul.f32 0.5, %v1521_v23  ;;  %v1533_v34 = vmul.f32 0.5, %v1523_v33 }
 0x3f8   :  { %v1477_v30 = vpop.f32.mrf.mxu0  ;;  %v1518_v31 = vpop.f32.mrf.mxu1 }
 0x3f9   :  { %3451 = vtanh.f32 %v1528_v29 }
 0x3fa   :  { %3453 = vtanh.f32 %v1522_v32 }
 0x3fb   :  { %3455 = vtanh.f32 %v1533_v34 }
 0x404   :  { %v3450_v35 = vpop.eup %3449 }
 0x405   :  { %v1526_v21 = vmul.f32 0.5, %v3450_v35 }
 0x406   :  { %v3452_v36 = vpop.eup %3451 }
 0x407   :  { %v1527_v38 = vadd.f32 0.5, %v1526_v21  ;;  %v1530_v39 = vmul.f32 0.5, %v3452_v36  ;;  %v3454_v40 = vpop.eup %3453  ;;  %v4315_v21 = vld [vmem:[#allocation20_spill] sm:$0xff] }
 0x408   :  { %v3456_v49 = vpop.eup %3455 }
 0x409   :  { %v1531_v25 = vadd.f32 0.5, %v1530_v39  ;;  %v1538_v47 = vmul.f32 %v3454_v40, %v1527_v38  ;;  %v1535_v17 = vmul.f32 0.5, %v3456_v49  ;;  %v4316_v38 = vld [vmem:[#allocation21_spill] sm:$0xff] }
 0x40b   :  { %v1537_v41 = vmul.f32 %v1531_v25, %v4011_v37  ;;  %v1536_v18 = vadd.f32 0.5, %v1535_v17 }
 0x40d   :  { %v4123_v14 = vadd.f32 %v1538_v47, %v1537_v41 }
 0x40f   :  { %3457 = vtanh.f32 %v4123_v14 }
 0x41c   :  { %v3458_v50 = vpop.eup %3457 }
 0x41d   :  { %v4126_v19 = vmul.f32 %v3458_v50, %v1536_v18 }
 0x41f   :  { %v1551_v20 = vpack.c.bf16 %v4126_v19, %v4126_v19 }
 0x421   :  { %1777 = vmatmul.mubr.bf16.vlgmr.msra.gmra.mxu0 %v1551_v20  ;;  %1818 = vmatmul.mubr.bf16.vlgmr.msra.gmra.mxu1 %v1551_v20 }
 0x422   :  { %2051 = vmatpush1.bf16.msra.mxu0 %v4024_v3  ;;  %2092 = vmatpush1.bf16.msra.mxu1 %v4026_v15 }
 0x423   :  { %2052 = vmatprep.subr.bf16.mxu0 %v4032_v16  ;;  %2093 = vmatprep.subr.bf16.mxu1 %v4034_v26 }
 0x424   :  { %2082 = vmatprep.mubr.bf16.mxu0 %v4308_v55  ;;  %2123 = vmatprep.mubr.bf16.mxu1 %v4308_v55 }
 0x426   :  { %2053 = vmatpush1.bf16.msra.mxu0 %v4036_v59  ;;  %2094 = vmatpush1.bf16.msra.mxu1 %v4038_v63 }
 0x427   :  { %2054 = vmatprep.subr.bf16.mxu0 %v4044_v2  ;;  %2095 = vmatprep.subr.bf16.mxu1 %v4046_v9 }
 0x42a   :  { %2055 = vmatpush1.bf16.msra.mxu0 %v4048_v44  ;;  %2096 = vmatpush1.bf16.msra.mxu1 %v4050_v13 }
 0x42b   :  { %2056 = vmatprep.subr.bf16.mxu0 %v4056_v0  ;;  %2097 = vmatprep.subr.bf16.mxu1 %v4058_v56 }
 0x42e   :  { %2057 = vmatpush1.bf16.msra.mxu0 %v4060_v1  ;;  %2098 = vmatpush1.bf16.msra.mxu1 %v4062_v57 }
 0x42f   :  { %2058 = vmatprep.subr.bf16.mxu0 %v4068_v58  ;;  %2099 = vmatprep.subr.bf16.mxu1 %v4070_v54 }
 0x432   :  { %2059 = vmatpush1.bf16.msra.mxu0 %v4072_v43  ;;  %2100 = vmatpush1.bf16.msra.mxu1 %v4074_v60 }
 0x433   :  { %2060 = vmatprep.subr.bf16.mxu0 %v4080_v45  ;;  %2101 = vmatprep.subr.bf16.mxu1 %v4082_v53 }
 0x436   :  { %2061 = vmatpush1.bf16.msra.mxu0 %v4084_v62  ;;  %2102 = vmatpush1.bf16.msra.mxu1 %v4086_v46 }
 0x437   :  { %2062 = vmatprep.subr.bf16.mxu0 %v4092_v52  ;;  %2103 = vmatprep.subr.bf16.mxu1 %v4094_v4 }
 0x43a   :  { %2063 = vmatpush1.bf16.msra.mxu0 %v4096_v6  ;;  %2104 = vmatpush1.bf16.msra.mxu1 %v4098_v7 }
 0x43b   :  { %2064 = vmatprep.subr.bf16.mxu0 %v4104_v8  ;;  %2105 = vmatprep.subr.bf16.mxu1 %v4106_v10 }
 0x43e   :  { %2065 = vmatpush1.bf16.msra.mxu0 %v4108_v11  ;;  %2106 = vmatpush1.bf16.msra.mxu1 %v4110_v12 }
 0x43f   :  { %2356 = vmatprep.subr.bf16.mxu0 %v4020_v48  ;;  %2397 = vmatprep.subr.bf16.mxu1 %v4022_v51 }
 0x4e1   :  { %v1778_v37 = vpop.f32.mrf.mxu0  ;;  %v1819_v22 = vpop.f32.mrf.mxu1 }
 0x4e2   :  { %v1826_v23 = vadd.f32 %v1778_v37, %v3948_v28  ;;  %v1828_v36 = vadd.f32 %v1819_v22, %v4315_v21  ;;  %v4318_v21 = vld [vmem:[#allocation30_spill] sm:$0xff] }
 0x4e3   :  { %v1780_v24 = vpop.f32.mrf.mxu0  ;;  %v1821_v27 = vpop.f32.mrf.mxu1 }
 0x4e4   :  { %v1830_v29 = vmul.f32 0.5, %v1826_v23  ;;  %v1827_v30 = vadd.f32 %v1780_v24, %v3950_v61  ;;  %v1829_v39 = vadd.f32 %v1821_v27, %v4316_v38 }
 0x4e5   :  { %v1782_v31 = vpop.f32.mrf.mxu0  ;;  %v1823_v32 = vpop.f32.mrf.mxu1 }
 0x4e6   :  { %3459 = vtanh.f32 %v1830_v29  ;;  %v1834_v33 = vmul.f32 0.5, %v1827_v30  ;;  %v1839_v25 = vmul.f32 0.5, %v1829_v39  ;;  %v4317_v31 = vld [vmem:[#allocation29_spill] sm:$0xff] }
 0x4e7   :  { %v1783_v34 = vpop.f32.mrf.mxu0  ;;  %v1824_v35 = vpop.f32.mrf.mxu1 }
 0x4e8   :  { %3461 = vtanh.f32 %v1834_v33 }
 0x4e9   :  { %3463 = vtanh.f32 %v1828_v36 }
 0x4ea   :  { %3465 = vtanh.f32 %v1839_v25 }
 0x4f3   :  { %v3460_v40 = vpop.eup %3459 }
 0x4f4   :  { %v1832_v28 = vmul.f32 0.5, %v3460_v40 }
 0x4f5   :  { %v3462_v41 = vpop.eup %3461 }
 0x4f6   :  { %v1833_v47 = vadd.f32 0.5, %v1832_v28  ;;  %v1836_v49 = vmul.f32 0.5, %v3462_v41  ;;  %v3464_v17 = vpop.eup %3463  ;;  %v4319_v41 = vld [vmem:[#allocation22_spill] sm:$0xff] }
 0x4f7   :  { %v3466_v37 = vpop.eup %3465 }
 0x4f8   :  { %v1837_v61 = vadd.f32 0.5, %v1836_v49  ;;  %v1844_v50 = vmul.f32 %v3464_v17, %v1833_v47  ;;  %v1841_v22 = vmul.f32 0.5, %v3466_v37 }
 0x4fa   :  { %v1843_v18 = vmul.f32 %v1837_v61, %v4123_v14  ;;  %v1842_v23 = vadd.f32 0.5, %v1841_v22 }
 0x4fc   :  { %v4169_v20 = vadd.f32 %v1844_v50, %v1843_v18 }
 0x4fe   :  { %3467 = vtanh.f32 %v4169_v20 }
 0x50b   :  { %v3468_v24 = vpop.eup %3467 }
 0x50c   :  { %v4172_v27 = vmul.f32 %v3468_v24, %v1842_v23 }
 0x50e   :  { %v1857_v29 = vpack.c.bf16 %v4172_v27, %v4172_v27 }
 0x510   :  { %2083 = vmatmul.mubr.bf16.vlgmr.msra.gmra.mxu0 %v1857_v29  ;;  %2124 = vmatmul.mubr.bf16.vlgmr.msra.gmra.mxu1 %v1857_v29 }
 0x511   :  { %2357 = vmatpush1.bf16.msra.mxu0 %v4024_v3  ;;  %2398 = vmatpush1.bf16.msra.mxu1 %v4026_v15 }
 0x512   :  { %2358 = vmatprep.subr.bf16.mxu0 %v4032_v16  ;;  %2399 = vmatprep.subr.bf16.mxu1 %v4034_v26 }
 0x513   :  { %2388 = vmatprep.mubr.bf16.mxu0 %v4308_v55  ;;  %2429 = vmatprep.mubr.bf16.mxu1 %v4308_v55 }
 0x515   :  { %2359 = vmatpush1.bf16.msra.mxu0 %v4036_v59  ;;  %2400 = vmatpush1.bf16.msra.mxu1 %v4038_v63 }
 0x516   :  { %2360 = vmatprep.subr.bf16.mxu0 %v4044_v2  ;;  %2401 = vmatprep.subr.bf16.mxu1 %v4046_v9 }
 0x519   :  { %2361 = vmatpush1.bf16.msra.mxu0 %v4048_v44  ;;  %2402 = vmatpush1.bf16.msra.mxu1 %v4050_v13 }
 0x51a   :  { %2362 = vmatprep.subr.bf16.mxu0 %v4056_v0  ;;  %2403 = vmatprep.subr.bf16.mxu1 %v4058_v56 }
 0x51d   :  { %2363 = vmatpush1.bf16.msra.mxu0 %v4060_v1  ;;  %2404 = vmatpush1.bf16.msra.mxu1 %v4062_v57 }
 0x51e   :  { %2364 = vmatprep.subr.bf16.mxu0 %v4068_v58  ;;  %2405 = vmatprep.subr.bf16.mxu1 %v4070_v54 }
 0x521   :  { %2365 = vmatpush1.bf16.msra.mxu0 %v4072_v43  ;;  %2406 = vmatpush1.bf16.msra.mxu1 %v4074_v60 }
 0x522   :  { %2366 = vmatprep.subr.bf16.mxu0 %v4080_v45  ;;  %2407 = vmatprep.subr.bf16.mxu1 %v4082_v53 }
 0x525   :  { %2367 = vmatpush1.bf16.msra.mxu0 %v4084_v62  ;;  %2408 = vmatpush1.bf16.msra.mxu1 %v4086_v46 }
 0x526   :  { %2368 = vmatprep.subr.bf16.mxu0 %v4092_v52  ;;  %2409 = vmatprep.subr.bf16.mxu1 %v4094_v4 }
 0x529   :  { %2369 = vmatpush1.bf16.msra.mxu0 %v4096_v6  ;;  %2410 = vmatpush1.bf16.msra.mxu1 %v4098_v7 }
 0x52a   :  { %2370 = vmatprep.subr.bf16.mxu0 %v4104_v8  ;;  %2411 = vmatprep.subr.bf16.mxu1 %v4106_v10 }
 0x52d   :  { %2371 = vmatpush1.bf16.msra.mxu0 %v4108_v11  ;;  %2412 = vmatpush1.bf16.msra.mxu1 %v4110_v12 }
 0x52e   :  { %2662 = vmatprep.subr.bf16.mxu0 %v4020_v48  ;;  %2703 = vmatprep.subr.bf16.mxu1 %v4022_v51  ;;  %v4320_v48 = vld [vmem:[#allocation23_spill] sm:$0xff] }
 0x5d0   :  { %v2084_v14 = vpop.f32.mrf.mxu0  ;;  %v2125_v30 = vpop.f32.mrf.mxu1 }
 0x5d1   :  { %v2132_v32 = vadd.f32 %v2084_v14, %v4317_v31  ;;  %v2134_v47 = vadd.f32 %v2125_v30, %v4319_v41  ;;  %v3413_v41 = vld [vmem:[#allocation11 + $0x28] sm:$0xff]  }
 0x5d2   :  { %v2086_v33 = vpop.f32.mrf.mxu0  ;;  %v2127_v34 = vpop.f32.mrf.mxu1 }
 0x5d3   :  { %v2136_v35 = vmul.f32 0.5, %v2132_v32  ;;  %v2133_v36 = vadd.f32 %v2086_v33, %v4318_v21  ;;  %v2135_v51 = vadd.f32 %v2127_v34, %v4320_v48  ;;  %v3415_v48 = vld [vmem:[#allocation11 + $0x18] sm:$0xff]  }
 0x5d4   :  { %v2088_v38 = vpop.f32.mrf.mxu0  ;;  %v2129_v39 = vpop.f32.mrf.mxu1 }
 0x5d5   :  { %3469 = vtanh.f32 %v2136_v35  ;;  %v2140_v25 = vmul.f32 0.5, %v2133_v36  ;;  %v2145_v49 = vmul.f32 0.5, %v2135_v51  ;;  %v3416_v51 = vld [vmem:[#allocation11 + $0x10] sm:$0xff]  }
 0x5d6   :  { %v2089_v40 = vpop.f32.mrf.mxu0  ;;  %v2130_v28 = vpop.f32.mrf.mxu1 }
 0x5d7   :  { %3471 = vtanh.f32 %v2140_v25  ;;  %v3412_v25 = vld [vmem:[#allocation11 + $0x30] sm:$0xff]  }
 0x5d8   :  { %3473 = vtanh.f32 %v2134_v47  ;;  %v4325_v40 = vld [vmem:[#allocation28_spill] sm:$0xff]  ;;  %v3414_v47 = vld [vmem:[#allocation11 + $0x20] sm:$0xff]  }
 0x5d9   :  { %3475 = vtanh.f32 %v2145_v49  ;;  %v2778_v28 = vpack.c.bf16 %v3970_v5, %v4325_v40  ;;  %v3417_v49 = vld [vmem:[#allocation11 + $0x8] sm:$0xff]   ;;  %v3418_v5 = vld [vmem:[#allocation11] sm:$0xff]  }
 0x5e2   :  { %v3470_v61 = vpop.eup %3469 }
 0x5e3   :  { %v2138_v17 = vmul.f32 0.5, %v3470_v61  ;;  %v2779_v61 = vpack.c.bf16 %v4126_v19, %v4014_v42  ;;  %v4328_v19 = vld [vmem:[#allocation26_spill] sm:$0xff] }
 0x5e4   :  { %v3472_v18 = vpop.eup %3471 }
 0x5e5   :  { %v2139_v50 = vadd.f32 0.5, %v2138_v17  ;;  %v2142_v37 = vmul.f32 0.5, %v3472_v18  ;;  %v3474_v23 = vpop.eup %3473 }
 0x5e6   :  { %v3476_v30 = vpop.eup %3475 }
 0x5e7   :  { %v2143_v22 = vadd.f32 0.5, %v2142_v37  ;;  %v2150_v29 = vmul.f32 %v3474_v23, %v2139_v50  ;;  %v2147_v31 = vmul.f32 0.5, %v3476_v30  ;;  %v4326_v37 = vld [vmem:[#allocation33_spill] sm:$0xff] }
 0x5e9   :  { %v2149_v24 = vmul.f32 %v2143_v22, %v4169_v20  ;;  %v2148_v32 = vadd.f32 0.5, %v2147_v31 }
 0x5eb   :  { %v4215_v14 = vadd.f32 %v2150_v29, %v2149_v24 }
 0x5ed   :  { %3477 = vtanh.f32 %v4215_v14 }
 0x5fa   :  { %v3478_v33 = vpop.eup %3477 }
 0x5fb   :  { %v4218_v34 = vmul.f32 %v3478_v33, %v2148_v32 }
 0x5fd   :  { %v2163_v35 = vpack.c.bf16 %v4218_v34, %v4218_v34  ;;  %v2780_v17 = vpack.c.bf16 %v4218_v34, %v4172_v27  ;;  %v4329_v27 = vld [vmem:[#allocation27_spill] sm:$0xff] }
 0x5ff   :  { %2389 = vmatmul.mubr.bf16.vlgmr.msra.gmra.mxu0 %v2163_v35  ;;  %2430 = vmatmul.mubr.bf16.vlgmr.msra.gmra.mxu1 %v2163_v35 }
 0x600   :  { %2663 = vmatpush1.bf16.msra.mxu0 %v4024_v3  ;;  %2704 = vmatpush1.bf16.msra.mxu1 %v4026_v15 }
 0x601   :  { %2664 = vmatprep.subr.bf16.mxu0 %v4032_v16  ;;  %2705 = vmatprep.subr.bf16.mxu1 %v4034_v26  ;;  %v4321_v16 = vld [vmem:[#allocation31_spill] sm:$0xff] }
 0x602   :  { %2694 = vmatprep.mubr.bf16.mxu0 %v4308_v55  ;;  %2735 = vmatprep.mubr.bf16.mxu1 %v4308_v55  ;;  %v3411_v55 = vld [vmem:[#allocation11 + $0x38] sm:$0xff]  }
 0x604   :  { %2665 = vmatpush1.bf16.msra.mxu0 %v4036_v59  ;;  %2706 = vmatpush1.bf16.msra.mxu1 %v4038_v63 }
 0x605   :  { %2666 = vmatprep.subr.bf16.mxu0 %v4044_v2  ;;  %2707 = vmatprep.subr.bf16.mxu1 %v4046_v9  ;;  %v4322_v9 = vld [vmem:[#allocation32_spill] sm:$0xff] }
 0x608   :  { %2667 = vmatpush1.bf16.msra.mxu0 %v4048_v44  ;;  %2708 = vmatpush1.bf16.msra.mxu1 %v4050_v13 }
 0x609   :  { %2668 = vmatprep.subr.bf16.mxu0 %v4056_v0  ;;  %2709 = vmatprep.subr.bf16.mxu1 %v4058_v56 }
 0x60c   :  { %2669 = vmatpush1.bf16.msra.mxu0 %v4060_v1  ;;  %2710 = vmatpush1.bf16.msra.mxu1 %v4062_v57 }
 0x60d   :  { %2670 = vmatprep.subr.bf16.mxu0 %v4068_v58  ;;  %2711 = vmatprep.subr.bf16.mxu1 %v4070_v54  ;;  %v4323_v58 = vld [vmem:[#allocation24_spill] sm:$0xff] }
 0x610   :  { %2671 = vmatpush1.bf16.msra.mxu0 %v4072_v43  ;;  %2712 = vmatpush1.bf16.msra.mxu1 %v4074_v60  ;;  %v4324_v43 = vld [vmem:[#allocation25_spill] sm:$0xff] }
 0x611   :  { %2672 = vmatprep.subr.bf16.mxu0 %v4080_v45  ;;  %2713 = vmatprep.subr.bf16.mxu1 %v4082_v53 }
 0x614   :  { %2673 = vmatpush1.bf16.msra.mxu0 %v4084_v62  ;;  %2714 = vmatpush1.bf16.msra.mxu1 %v4086_v46 }
 0x615   :  { %2674 = vmatprep.subr.bf16.mxu0 %v4092_v52  ;;  %2715 = vmatprep.subr.bf16.mxu1 %v4094_v4 }
 0x618   :  { %2675 = vmatpush1.bf16.msra.mxu0 %v4096_v6  ;;  %2716 = vmatpush1.bf16.msra.mxu1 %v4098_v7 }
 0x619   :  { %2676 = vmatprep.subr.bf16.mxu0 %v4104_v8  ;;  %2717 = vmatprep.subr.bf16.mxu1 %v4106_v10 }
 0x61c   :  { %2677 = vmatpush1.bf16.msra.mxu0 %v4108_v11  ;;  %2718 = vmatpush1.bf16.msra.mxu1 %v4110_v12 }
 0x61d   :  { %3268 = vmatprep.subr.bf16.mxu0 %v3411_v55 }
 0x6bf   :  { %v2390_v3 = vpop.f32.mrf.mxu0  ;;  %v2431_v15 = vpop.f32.mrf.mxu1 }
 0x6c0   :  { %v2438_v26 = vadd.f32 %v2390_v3, %v4321_v16  ;;  %v2440_v54 = vadd.f32 %v2431_v15, %v4323_v58 }
 0x6c1   :  { %v2392_v59 = vpop.f32.mrf.mxu0  ;;  %v2433_v63 = vpop.f32.mrf.mxu1 }
 0x6c2   :  { %v2442_v2 = vmul.f32 0.5, %v2438_v26  ;;  %v2439_v44 = vadd.f32 %v2392_v59, %v4322_v9  ;;  %v2441_v60 = vadd.f32 %v2433_v63, %v4324_v43 }
 0x6c3   :  { %v2394_v13 = vpop.f32.mrf.mxu0  ;;  %v2435_v0 = vpop.f32.mrf.mxu1 }
 0x6c4   :  { %3479 = vtanh.f32 %v2442_v2  ;;  %v2446_v56 = vmul.f32 0.5, %v2439_v44  ;;  %v2451_v45 = vmul.f32 0.5, %v2441_v60 }
 0x6c5   :  { %v2395_v1 = vpop.f32.mrf.mxu0  ;;  %v2436_v57 = vpop.f32.mrf.mxu1 }
 0x6c6   :  { %3481 = vtanh.f32 %v2446_v56 }
 0x6c7   :  { %3483 = vtanh.f32 %v2440_v54 }
 0x6c8   :  { %3485 = vtanh.f32 %v2451_v45 }
 0x6d1   :  { %v3480_v53 = vpop.eup %3479 }
 0x6d2   :  { %v2444_v62 = vmul.f32 0.5, %v3480_v53 }
 0x6d3   :  { %v3482_v46 = vpop.eup %3481 }
 0x6d4   :  { %v2445_v52 = vadd.f32 0.5, %v2444_v62  ;;  %v2448_v4 = vmul.f32 0.5, %v3482_v46  ;;  %v3484_v7 = vpop.eup %3483 }
 0x6d5   :  { %v3486_v12 = vpop.eup %3485 }
 0x6d6   :  { %v2449_v6 = vadd.f32 0.5, %v2448_v4  ;;  %v2456_v10 = vmul.f32 %v3484_v7, %v2445_v52  ;;  %v2453_v20 = vmul.f32 0.5, %v3486_v12 }
 0x6d8   :  { %v2455_v8 = vmul.f32 %v2449_v6, %v4215_v14  ;;  %v2454_v21 = vadd.f32 0.5, %v2453_v20  ;;  %v4327_v14 = vld [vmem:[#allocation34_spill] sm:$0xff] }
 0x6da   :  { %v4259_v11 = vadd.f32 %v2456_v10, %v2455_v8 }
 0x6dc   :  { %3487 = vtanh.f32 %v4259_v11 }
 0x6e9   :  { %v3488_v36 = vpop.eup %3487 }
 0x6ea   :  { %v4262_v38 = vmul.f32 %v3488_v36, %v2454_v21 }
 0x6ec   :  { %v2469_v39 = vpack.c.bf16 %v4262_v38, %v4262_v38 }
 0x6ee   :  { %2695 = vmatmul.mubr.bf16.vlgmr.msra.gmra.mxu0 %v2469_v39  ;;  %2736 = vmatmul.mubr.bf16.vlgmr.msra.gmra.mxu1 %v2469_v39 }
 0x6ef   :  { %3269 = vmatpush3.bf16.msra.mxu0 %v3411_v55  ;;  %3284 = vmatprep.mubr.bf16.mxu0 %v2778_v28 }
 0x6f0   :  { %3270 = vmatprep.subr.bf16.mxu0 %v3412_v25 }
 0x6f3   :  { %3271 = vmatpush3.bf16.msra.mxu0 %v3412_v25 }
 0x6f4   :  { %3272 = vmatprep.subr.bf16.mxu0 %v3413_v41 }
 0x6f7   :  { %3273 = vmatpush3.bf16.msra.mxu0 %v3413_v41 }
 0x6f8   :  { %3274 = vmatprep.subr.bf16.mxu0 %v3414_v47 }
 0x6fb   :  { %3275 = vmatpush3.bf16.msra.mxu0 %v3414_v47 }
 0x6fc   :  { %3276 = vmatprep.subr.bf16.mxu0 %v3415_v48 }
 0x6ff   :  { %3277 = vmatpush3.bf16.msra.mxu0 %v3415_v48 }
 0x700   :  { %3278 = vmatprep.subr.bf16.mxu0 %v3416_v51 }
 0x703   :  { %3279 = vmatpush3.bf16.msra.mxu0 %v3416_v51 }
 0x704   :  { %3280 = vmatprep.subr.bf16.mxu0 %v3417_v49 }
 0x707   :  { %3281 = vmatpush3.bf16.msra.mxu0 %v3417_v49 }
 0x708   :  { %3282 = vmatprep.subr.bf16.mxu0 %v3418_v5 }
 0x70b   :  { %3283 = vmatpush3.bf16.msra.mxu0 %v3418_v5 }
 0x70e   :  { %3285 = vmatmul.mubr.bf16.vlgmr.msra.gmra.mxu0 %v2779_v61 }
 0x70f   :  { %3288 = vmatprep.mubr.bf16.mxu0 %v2780_v17 }
 0x7ae   :  { %v2696_v18 = vpop.f32.mrf.mxu0  ;;  %v2737_v50 = vpop.f32.mrf.mxu1 }
 0x7af   :  { %v2744_v22 = vadd.f32 %v2696_v18, %v4326_v37  ;;  %v2746_v55 = vadd.f32 %v2737_v50, %v4328_v19 }
 0x7b0   :  { %v2698_v23 = vpop.f32.mrf.mxu0  ;;  %v2739_v24 = vpop.f32.mrf.mxu1 }
 0x7b1   :  { %v2748_v29 = vmul.f32 0.5, %v2744_v22  ;;  %v2745_v30 = vadd.f32 %v2698_v23, %v4327_v14  ;;  %v2747_v34 = vadd.f32 %v2739_v24, %v4329_v27 }
 0x7b2   :  { %v2700_v31 = vpop.f32.mrf.mxu0  ;;  %v2741_v32 = vpop.f32.mrf.mxu1 }
 0x7b3   :  { %3489 = vtanh.f32 %v2748_v29  ;;  %v2752_v33 = vmul.f32 0.5, %v2745_v30  ;;  %v2757_v3 = vmul.f32 0.5, %v2747_v34 }
 0x7b4   :  { %v2701_v35 = vpop.f32.mrf.mxu0  ;;  %v2742_v42 = vpop.f32.mrf.mxu1 }
 0x7b5   :  { %3491 = vtanh.f32 %v2752_v33 }
 0x7b6   :  { %3493 = vtanh.f32 %v2746_v55 }
 0x7b7   :  { %3495 = vtanh.f32 %v2757_v3 }
 0x7c0   :  { %v3490_v15 = vpop.eup %3489 }
 0x7c1   :  { %v2750_v16 = vmul.f32 0.5, %v3490_v15 }
 0x7c2   :  { %v3492_v26 = vpop.eup %3491 }
 0x7c3   :  { %v2751_v59 = vadd.f32 0.5, %v2750_v16  ;;  %v2754_v63 = vmul.f32 0.5, %v3492_v26  ;;  %v3494_v9 = vpop.eup %3493 }
 0x7c4   :  { %v3496_v1 = vpop.eup %3495 }
 0x7c5   :  { %v2755_v2 = vadd.f32 0.5, %v2754_v63  ;;  %v2762_v13 = vmul.f32 %v3494_v9, %v2751_v59  ;;  %v2759_v54 = vmul.f32 0.5, %v3496_v1 }
 0x7c7   :  { %v2761_v44 = vmul.f32 %v2755_v2, %v4259_v11  ;;  %v2760_v60 = vadd.f32 0.5, %v2759_v54 }
 0x7c9   :  { %v2763_v0 = vadd.f32 %v2762_v13, %v2761_v44 }
 0x7cb   :  { %3497 = vtanh.f32 %v2763_v0  ;;  %2923 = vst [vmem:[#allocation15] sm:$0xff] %v2763_v0 }
 0x7ce   :  { %v3286_v56 = vpop.f32.mrf.mxu0 }
 0x7cf   :  { %2913 = vst [vmem:[#allocation12 + $0x10] sm:$0xff] %v3286_v56 }
 0x7d0   :  { %v2880_v57 = vpop.f32.mrf.mxu0 }
 0x7d1   :  { %2911 = vst [vmem:[#allocation12] sm:$0xff] %v2880_v57 }
 0x7d2   :  { %v3287_v58 = vpop.f32.mrf.mxu0 }
 0x7d3   :  { %2914 = vst [vmem:[#allocation12 + $0x18] sm:$0xff] %v3287_v58 }
 0x7d4   :  { %v2883_v43 = vpop.f32.mrf.mxu0 }
 0x7d5   :  { %2912 = vst [vmem:[#allocation12 + $0x8] sm:$0xff] %v2883_v43 }
 0x7d8   :  { %v3498_v45 = vpop.eup %3497 }
 0x7d9   :  { %v2765_v53 = vmul.f32 %v3498_v45, %v2760_v60 }
 0x7db   :  { %v2781_v62 = vpack.c.bf16 %v2765_v53, %v4262_v38  ;;  %2922 = vst [vmem:[#allocation13] sm:$0xff] %v2765_v53 }
 0x7dd   :  { %3289 = vmatmul.mubr.bf16.gmra.mxu0 %v2781_v62 }
 0x7de   :  { %3570 = shalt.err (!%p3567_p5)
}
 0x7df   :  { %2945 = dma.vmem_to_hbm [thread:$0]  %s2943_s1, 128, %s4294_s7, [#allocation14]  }
 0x7e0   :  { %s3636_s19 = smov [#allocation15]  }
 0x7e1   :  { %s2952_s4 = sshll.u32 %s3636_s19, 4  ;;  %s2953_s4 = int_to_ptr.vmem [resolvable:$true] %s2952_s4 }
 0x7e2   :  { %s3579_s20 = scalar_lea.vmem %s2953_s4, 128  ;;  %p3584_p7 = scmp.lt.s32.totalorder %s2953_s4, %s2953_s4 }
 0x7e3   :  { %p3580_p6 = scmp.ne.s32.totalorder %s2953_s4, %s3579_s20  ;;  %p3585_p8 = scmp.lt.s32.totalorder %s3579_s20, %s3579_s20 }
 0x7e5   :  { %p3586_p9 = por %p3585_p8, %p3584_p7 }
 0x7e7   :  { %p3587_p10 = pnand %p3586_p9, %p3580_p6 }
 0x7e9   :  { %3590 = shalt.err (!%p3587_p10)
}
 0x7ea   :  { %2955 = dma.vmem_to_hbm [thread:$0]  %s2953_s4, 128, %s4295_s8, [#allocation14]  }
 0x7eb   :  { %s3637_s2 = smov [#allocation12]  }
 0x7ec   :  { %s2929_s23 = sshll.u32 %s3637_s2, 4  ;;  %s2930_s23 = int_to_ptr.vmem [resolvable:$true] %s2929_s23 }
 0x7ed   :  { %s3599_s7 = scalar_lea.vmem %s2930_s23, 1024  ;;  %p3604_p12 = scmp.lt.s32.totalorder %s2930_s23, %s2930_s23 }
 0x7ee   :  { %p3600_p11 = scmp.ne.s32.totalorder %s2930_s23, %s3599_s7  ;;  %p3605_p13 = scmp.lt.s32.totalorder %s3599_s7, %s3599_s7 }
 0x7f0   :  { %p3606_p0 = por %p3605_p13, %p3604_p12 }
 0x7f2   :  { %p3607_p1 = pnand %p3606_p0, %p3600_p11 }
 0x89d   :  { %v3290_v46 = vpop.f32.mrf.mxu0 }
 0x89e   :  { %2917 = vst [vmem:[#allocation12 + $0x30] sm:$0xff] %v3290_v46 }
 0x89f   :  { %v2896_v52 = vpop.f32.mrf.mxu0 }
 0x8a0   :  { %2915 = vst [vmem:[#allocation12 + $0x20] sm:$0xff] %v2896_v52 }
 0x8a1   :  { %v3291_v4 = vpop.f32.mrf.mxu0 }
 0x8a2   :  { %2918 = vst [vmem:[#allocation12 + $0x38] sm:$0xff] %v3291_v4 }
 0x8a3   :  { %v2899_v6 = vpop.f32.mrf.mxu0 }
 0x8a4   :  { %2916 = vst [vmem:[#allocation12 + $0x28] sm:$0xff] %v2899_v6 }
 0x8a5   :  { %3610 = shalt.err (!%p3607_p1)
}
 0x8a6   :  { %s3638_s24 = smov 128   ;;  %s3639_s8 = smov 8  }
 0x8a7   :  { %2935 = dma.vmem_to_hbm [thread:$0]  %s2930_s23, 1024, %s4293_s6, [#allocation8], %s3638_s24, %s3638_s24, %s3639_s8  }
 0x8a8   :  { %3623 = dma.done.wait [#allocation8], 1024  }
 0x8a9   :  { %3624 = vsyncadd [#allocation8], 4294966272 }
 0x8aa   :  { %3625 = dma.done.wait [#allocation14], 256  }
 0x8ab   :  { %3626 = vsyncadd [#allocation14], 4294967040 }
 0x8ac   :  { %2965 = vsyncpa [#allocation7], 1 }
 0x8ad   :  { %2966 = vsyncpa [#allocation10], 1 }
 0x8ae   :  { %2967 = vsyncpa [#allocation8], 1 }
 0x8af   :  { %2968 = vsyncpa [#allocation14], 1 }

// kernel: tpu_custom_call.1
= control target key start
LH: loop header
LB: loop body
LE: loop exit
PB: predicated region body
PF: predicated region fallthrough
CT: control target
= control target key end

     0   :  { %14 = vsyncpa [#allocation7], 0  ;;  %s4287_s0 = inlined_call_operand.vmem [shape: bf16[1,1,64,16], index: 0, kind: input, shape index: {}]   ;;  %s4288_s1 = inlined_call_operand.vmem [shape: f32[8,128], index: 1, kind: input, shape index: {}]   ;;  %s4289_s2 = inlined_call_operand.hbm [shape: f32[8,128], index: 2, kind: input, shape index: {}]   ;;  %s4290_s3 = inlined_call_operand.vmem [shape: bf16[16,512], index: 3, kind: input, shape index: {}]   ;;  %s4291_s4 = inlined_call_operand.hbm [shape: bf16[128,512], index: 4, kind: input, shape index: {}]   ;;  %s4292_s5 = inlined_call_operand.hbm [shape: bf16[128,128], index: 5, kind: input, shape index: {}]   ;;  %s4293_s6 = inlined_call_operand.hbm [shape: f32[1,1,64,128], index: 6, kind: output, shape index: {0}]   ;;  %s4294_s7 = inlined_call_operand.hbm [shape: f32[8,128], index: 7, kind: output, shape index: {1}]   ;;  %s4295_s8 = inlined_call_operand.hbm [shape: f32[8,128], index: 8, kind: output, shape index: {2}]  }
   0x1   :  { %15 = vsyncpa [#allocation10], 0 }
   0x2   :  { %16 = vsyncpa [#allocation8], 0 }
   0x3   :  { %17 = vsyncpa [#allocation14], 0  ;;  %s3627_s27 = smov [#allocation9]  }
   0x4   :  { %s39_s28 = sshll.u32 %s3627_s27, 4  ;;  %s40_s28 = int_to_ptr.vmem [resolvable:$true] %s39_s28 }
   0x5   :  { %s3507_s29 = scalar_lea.vmem %s40_s28, 4096  ;;  %p3512_p1 = scmp.lt.s32.totalorder %s40_s28, %s40_s28 }
   0x6   :  { %p3508_p0 = scmp.ne.s32.totalorder %s40_s28, %s3507_s29  ;;  %p3513_p2 = scmp.lt.s32.totalorder %s3507_s29, %s3507_s29 }
   0x8   :  { %p3514_p3 = por %p3513_p2, %p3512_p1 }
   0xa   :  { %p3515_p4 = pnand %p3514_p3, %p3508_p0 }
   0xc   :  { %3518 = shalt.err (!%p3515_p4)
}
   0xd   :  { %s3628_s30 = smov 256   ;;  %s3629_s9 = smov 16  }
   0xe   :  { %45 = dma.hbm_to_vmem [thread:$0]  %s4291_s4, 4096, %s40_s28, [#allocation10], %s3628_s30, %s3628_s30, %s3629_s9  }
   0xf   :  { %s3630_s12 = smov [#allocation6]   ;;  %s3631_s14 = smov [#allocation11]  }
  0x10   :  { %s28_s13 = sshll.u32 %s3630_s12, 4  ;;  %s51_s15 = sshll.u32 %s3631_s14, 4  ;;  %s29_s13 = int_to_ptr.vmem [resolvable:$true] %s28_s13  ;;  %s52_s15 = int_to_ptr.vmem [resolvable:$true] %s51_s15 }
  0x11   :  { %s3527_s16 = scalar_lea.vmem %s29_s13, 128  ;;  %p3532_p6 = scmp.lt.s32.totalorder %s29_s13, %s29_s13 }
  0x12   :  { %p3528_p5 = scmp.ne.s32.totalorder %s29_s13, %s3527_s16  ;;  %p3533_p7 = scmp.lt.s32.totalorder %s3527_s16, %s3527_s16 }
  0x14   :  { %p3534_p8 = por %p3533_p7, %p3532_p6 }
  0x16   :  { %p3535_p9 = pnand %p3534_p8, %p3528_p5 }
  0x18   :  { %3538 = shalt.err (!%p3535_p9)
}
  0x19   :  { %31 = dma.hbm_to_vmem [thread:$0]  %s4289_s2, 128, %s29_s13, [#allocation7]  }
  0x1a   :  { %s3547_s19 = scalar_lea.vmem %s52_s15, 1024  ;;  %p3552_p11 = scmp.lt.s32.totalorder %s52_s15, %s52_s15 }
  0x1b   :  { %p3548_p10 = scmp.ne.s32.totalorder %s52_s15, %s3547_s19  ;;  %p3553_p12 = scmp.lt.s32.totalorder %s3547_s19, %s3547_s19 }
  0x1d   :  { %p3554_p13 = por %p3553_p12, %p3552_p11 }
  0x1f   :  { %p3555_p0 = pnand %p3554_p13, %p3548_p10 }
  0x21   :  { %3558 = shalt.err (!%p3555_p0)
}
  0x22   :  { %s3632_s4 = smov 64   ;;  %s3633_s20 = smov 4  }
  0x23   :  { %57 = dma.hbm_to_vmem [thread:$0]  %s4292_s5, 1024, %s52_s15, [#allocation10], %s3632_s4, %s3632_s4, %s3633_s20  }
  0x24   :  { %3619 = dma.done.wait [#allocation7], 128  }
  0x25   :  { %3620 = vsyncadd [#allocation7], 4294967168 }
  0x26   :  { %3621 = dma.done.wait [#allocation10], 5120  }
  0x27   :  { %3622 = vsyncadd [#allocation10], 4294962176  ;;  %v4296_v0 = vmov 0   ;;  %v3305_v1 = vld [vmem:[%s4290_s3 + $0xc] ss:$16 sps:$4 sm:$0xff]   ;;  %v3308_v3 = vld [vmem:[%s4287_s0] sm:$0xff]  }
  0x28   :  { %246 = vmatprep.mubr.bf16.mxu1 %v4296_v0  ;;  %173 = vmatprep.mubr.bf16.mxu0 %v4296_v0  ;;  %v3307_v2 = vld [vmem:[%s4290_s3 + $0x8] ss:$16 sps:$4 sm:$0xff]   ;;  %vm128_vm0 = vcmask 130048   ;;  %v3707_v5 = vld [vmem:[#allocation9 + $0xe4] ss:$16 sps:$4 sm:$0xff]   ;;  %v3322_v16 = vld [vmem:[%s4287_s0 + $0x10] sm:$0xff]  }
  0x29   :  { %228 = vmatprep.subr.bf16.mxu1 %v3305_v1  ;;  %v3705_v4 = vld [vmem:[#allocation9 + $0xe0] ss:$16 sps:$4 sm:$0xff]   ;;  %v3709_v6 = vld [vmem:[#allocation9 + $0xc4] ss:$16 sps:$4 sm:$0xff]   ;;  %v3333_v13 = vld [vmem:[%s4290_s3 + $0x4] ss:$16 sps:$4 sm:$0xff]  }
  0x2a   :  { %229 = vmatpush1.bf16.msra.mxu1 %v3307_v2  ;;  %v3714_v7 = vld [vmem:[#allocation9 + $0xc0] ss:$16 sps:$4 sm:$0xff]   ;;  %v3718_v8 = vld [vmem:[#allocation9 + $0xa4] ss:$16 sps:$4 sm:$0xff]   ;;  %155 = vmatprep.subr.bf16.mxu0 %v3333_v13  ;;  %v3338_v15 = vld [vmem:[%s4290_s3] ss:$16 sps:$4 sm:$0xff]  }
  0x2b   :  { %521 = vmatprep.subr.bf16.mxu1 %v3707_v5  ;;  %v3315_v9 = vld [vmem:[%s4287_s0 + $0x8] sm:$0xff]   ;;  %156 = vmatpush1.bf16.msra.mxu0 %v3338_v15  ;;  %v3329_v21 = vld [vmem:[%s4287_s0 + $0x18] sm:$0xff]   ;;  %v72_v25 = vld [vmem:[%s4288_s1] sm:$0xff]  ;;  %s3635_s0 = smov [#allocation13]  }
  0x2c   :  { %v3724_v10 = vld [vmem:[#allocation9 + $0xa0] ss:$16 sps:$4 sm:$0xff]   ;;  %v3727_v11 = vld [vmem:[#allocation9 + $0x84] ss:$16 sps:$4 sm:$0xff]   ;;  %826 = vmatprep.subr.bf16.mxu0 %v3707_v5  ;;  %v3782_v26 = vld [vmem:[#allocation9 + $0xec] ss:$16 sps:$4 sm:$0xff]   ;;  %v328_v28 = vpack.c.bf16 %v72_v25, %v72_v25 }
  0x2d   :  { %2988 = vmatmul.mubr.msk.bf16.vlgmr.msra.gmra.mxu1 %vm128_vm0, %v3308_v3  ;;  %v3730_v12 = vld [vmem:[#allocation9 + $0x80] ss:$16 sps:$4 sm:$0xff]   ;;  %v3738_v14 = vld [vmem:[#allocation9 + $0x64] ss:$16 sps:$4 sm:$0xff]   ;;  %v3789_v27 = vld [vmem:[#allocation9 + $0xe8] ss:$16 sps:$4 sm:$0xff]  }
  0x2e   :  { %522 = vmatpush1.bf16.msra.mxu1 %v3705_v4  ;;  %256 = vmatprep.mubr.bf16.mxu1 %v4296_v0  ;;  %v3747_v17 = vld [vmem:[#allocation9 + $0x60] ss:$16 sps:$4 sm:$0xff]   ;;  %v3750_v18 = vld [vmem:[#allocation9 + $0x44] ss:$16 sps:$4 sm:$0xff]   ;;  %v3793_v29 = vld [vmem:[#allocation9 + $0xcc] ss:$16 sps:$4 sm:$0xff]  }
  0x2f   :  { %523 = vmatprep.subr.bf16.mxu1 %v3709_v6  ;;  %2984 = vmatmul.mubr.msk.bf16.vlgmr.msra.gmra.mxu0 %vm128_vm0, %v3308_v3  ;;  %v3756_v19 = vld [vmem:[#allocation9 + $0x40] ss:$16 sps:$4 sm:$0xff]   ;;  %v3760_v20 = vld [vmem:[#allocation9 + $0x24] ss:$16 sps:$4 sm:$0xff]   ;;  %v3798_v30 = vld [vmem:[#allocation9 + $0xc8] ss:$16 sps:$4 sm:$0xff]  }
  0x30   :  { %827 = vmatpush1.bf16.msra.mxu0 %v3705_v4  ;;  %183 = vmatprep.mubr.bf16.mxu0 %v4296_v0  ;;  %v3769_v22 = vld [vmem:[#allocation9 + $0x20] ss:$16 sps:$4 sm:$0xff]   ;;  %v3772_v23 = vld [vmem:[#allocation9 + $0x4] ss:$16 sps:$4 sm:$0xff]   ;;  %v3801_v31 = vld [vmem:[#allocation9 + $0xac] ss:$16 sps:$4 sm:$0xff]  }
  0x31   :  { %828 = vmatprep.subr.bf16.mxu0 %v3709_v6  ;;  %v3775_v24 = vld [vmem:[#allocation9] ss:$16 sps:$4 sm:$0xff]   ;;  %v3808_v32 = vld [vmem:[#allocation9 + $0xa8] ss:$16 sps:$4 sm:$0xff]   ;;  %v3814_v33 = vld [vmem:[#allocation9 + $0x8c] ss:$16 sps:$4 sm:$0xff]  }
  0x32   :  { %524 = vmatpush1.bf16.msra.mxu1 %v3714_v7  ;;  %v3820_v34 = vld [vmem:[#allocation9 + $0x88] ss:$16 sps:$4 sm:$0xff]   ;;  %v3824_v35 = vld [vmem:[#allocation9 + $0x6c] ss:$16 sps:$4 sm:$0xff]   ;;  %s2942_s1 = sshll.u32 %s3635_s0, 4  ;;  %s2943_s1 = int_to_ptr.vmem [resolvable:$true] %s2942_s1 }
  0x33   :  { %525 = vmatprep.subr.bf16.mxu1 %v3718_v8  ;;  %v3829_v36 = vld [vmem:[#allocation9 + $0x68] ss:$16 sps:$4 sm:$0xff]   ;;  %v3832_v37 = vld [vmem:[#allocation9 + $0x4c] ss:$16 sps:$4 sm:$0xff]   ;;  %s3559_s16 = scalar_lea.vmem %s2943_s1, 128  ;;  %p3564_p2 = scmp.lt.s32.totalorder %s2943_s1, %s2943_s1 }
  0x34   :  { %829 = vmatpush1.bf16.msra.mxu0 %v3714_v7  ;;  %v3837_v38 = vld [vmem:[#allocation9 + $0x48] ss:$16 sps:$4 sm:$0xff]   ;;  %v3840_v39 = vld [vmem:[#allocation9 + $0x2c] ss:$16 sps:$4 sm:$0xff]   ;;  %p3560_p1 = scmp.ne.s32.totalorder %s2943_s1, %s3559_s16  ;;  %p3565_p3 = scmp.lt.s32.totalorder %s3559_s16, %s3559_s16 }
  0x35   :  { %2989 = vmatmul.mubr.msk.bf16.gmra.mxu1 %vm128_vm0, %v3315_v9  ;;  %830 = vmatprep.subr.bf16.mxu0 %v3718_v8  ;;  %v3843_v40 = vld [vmem:[#allocation9 + $0x28] ss:$16 sps:$4 sm:$0xff]   ;;  %v3846_v41 = vld [vmem:[#allocation9 + $0xc] ss:$16 sps:$4 sm:$0xff]  }
  0x36   :  { %526 = vmatpush1.bf16.msra.mxu1 %v3724_v10  ;;  %266 = vmatprep.mubr.bf16.mxu1 %v4296_v0  ;;  %v3849_v42 = vld [vmem:[#allocation9 + $0x8] ss:$16 sps:$4 sm:$0xff]   ;;  %p3566_p4 = por %p3565_p3, %p3564_p2 }
  0x37   :  { %527 = vmatprep.subr.bf16.mxu1 %v3727_v11  ;;  %2985 = vmatmul.mubr.msk.bf16.gmra.mxu0 %vm128_vm0, %v3315_v9 }
  0x38   :  { %831 = vmatpush1.bf16.msra.mxu0 %v3724_v10  ;;  %193 = vmatprep.mubr.bf16.mxu0 %v4296_v0  ;;  %p3567_p5 = pnand %p3566_p4, %p3560_p1 }
  0x39   :  { %832 = vmatprep.subr.bf16.mxu0 %v3727_v11 }
  0x3a   :  { %528 = vmatpush1.bf16.msra.mxu1 %v3730_v12 }
  0x3b   :  { %529 = vmatprep.subr.bf16.mxu1 %v3738_v14 }
  0x3c   :  { %833 = vmatpush1.bf16.msra.mxu0 %v3730_v12 }
  0x3d   :  { %2990 = vmatmul.mubr.msk.bf16.gmra.mxu1 %vm128_vm0, %v3322_v16  ;;  %834 = vmatprep.subr.bf16.mxu0 %v3738_v14 }
  0x3e   :  { %530 = vmatpush1.bf16.msra.mxu1 %v3747_v17  ;;  %276 = vmatprep.mubr.bf16.mxu1 %v4296_v0 }
  0x3f   :  { %531 = vmatprep.subr.bf16.mxu1 %v3750_v18  ;;  %2986 = vmatmul.mubr.msk.bf16.gmra.mxu0 %vm128_vm0, %v3322_v16 }
  0x40   :  { %835 = vmatpush1.bf16.msra.mxu0 %v3747_v17  ;;  %203 = vmatprep.mubr.bf16.mxu0 %v4296_v0 }
  0x41   :  { %836 = vmatprep.subr.bf16.mxu0 %v3750_v18 }
  0x42   :  { %532 = vmatpush1.bf16.msra.mxu1 %v3756_v19 }
  0x43   :  { %533 = vmatprep.subr.bf16.mxu1 %v3760_v20 }
  0x44   :  { %837 = vmatpush1.bf16.msra.mxu0 %v3756_v19 }
  0x45   :  { %2991 = vmatmul.mubr.msk.bf16.gmra.mxu1 %vm128_vm0, %v3329_v21  ;;  %838 = vmatprep.subr.bf16.mxu0 %v3760_v20 }
  0x46   :  { %534 = vmatpush1.bf16.msra.mxu1 %v3769_v22  ;;  %553 = vmatprep.mubr.bf16.mxu1 %v4296_v0 }
  0x47   :  { %535 = vmatprep.subr.bf16.mxu1 %v3772_v23  ;;  %2987 = vmatmul.mubr.msk.bf16.gmra.mxu0 %vm128_vm0, %v3329_v21 }
  0x48   :  { %858 = vmatprep.mubr.bf16.mxu0 %v4296_v0  ;;  %839 = vmatpush1.bf16.msra.mxu0 %v3769_v22 }
  0x49   :  { %840 = vmatprep.subr.bf16.mxu0 %v3772_v23 }
  0x4a   :  { %536 = vmatpush1.bf16.msra.mxu1 %v3775_v24 }
  0x4b   :  { %562 = vmatprep.subr.bf16.mxu1 %v3782_v26 }
  0x4c   :  { %841 = vmatpush1.bf16.msra.mxu0 %v3775_v24 }
  0x4d   :  { %554 = vmatmul.mubr.bf16.vlgmr.msra.gmra.mxu1 %v328_v28  ;;  %1132 = vmatprep.subr.bf16.mxu0 %v3707_v5 }
  0x4e   :  { %563 = vmatpush1.bf16.msra.mxu1 %v3789_v27  ;;  %594 = vmatprep.mubr.bf16.mxu1 %v4296_v0 }
  0x4f   :  { %564 = vmatprep.subr.bf16.mxu1 %v3793_v29 }
  0x52   :  { %565 = vmatpush1.bf16.msra.mxu1 %v3798_v30 }
  0x53   :  { %566 = vmatprep.subr.bf16.mxu1 %v3801_v31 }
  0x56   :  { %567 = vmatpush1.bf16.msra.mxu1 %v3808_v32 }
  0x57   :  { %568 = vmatprep.subr.bf16.mxu1 %v3814_v33 }
  0x5a   :  { %569 = vmatpush1.bf16.msra.mxu1 %v3820_v34 }
  0x5b   :  { %570 = vmatprep.subr.bf16.mxu1 %v3824_v35 }
  0x5e   :  { %571 = vmatpush1.bf16.msra.mxu1 %v3829_v36 }
  0x5f   :  { %572 = vmatprep.subr.bf16.mxu1 %v3832_v37 }
  0x62   :  { %573 = vmatpush1.bf16.msra.mxu1 %v3837_v38 }
  0x63   :  { %574 = vmatprep.subr.bf16.mxu1 %v3840_v39 }
  0x66   :  { %575 = vmatpush1.bf16.msra.mxu1 %v3843_v40 }
  0x67   :  { %576 = vmatprep.subr.bf16.mxu1 %v3846_v41 }
  0x6a   :  { %577 = vmatpush1.bf16.msra.mxu1 %v3849_v42 }
  0x6b   :  { %867 = vmatprep.subr.bf16.mxu1 %v3782_v26 }
  0x6d   :  { %595 = vmatmul.mubr.bf16.vlgmr.msra.gmra.mxu1 %v328_v28 }
  0x6e   :  { %868 = vmatpush1.bf16.msra.mxu1 %v3789_v27  ;;  %899 = vmatprep.mubr.bf16.mxu1 %v4296_v0 }
  0x6f   :  { %869 = vmatprep.subr.bf16.mxu1 %v3793_v29 }
  0x72   :  { %870 = vmatpush1.bf16.msra.mxu1 %v3798_v30 }
  0x73   :  { %871 = vmatprep.subr.bf16.mxu1 %v3801_v31 }
  0x76   :  { %872 = vmatpush1.bf16.msra.mxu1 %v3808_v32 }
  0x77   :  { %873 = vmatprep.subr.bf16.mxu1 %v3814_v33 }
  0x7a   :  { %874 = vmatpush1.bf16.msra.mxu1 %v3820_v34 }
  0x7b   :  { %875 = vmatprep.subr.bf16.mxu1 %v3824_v35 }
  0x7e   :  { %876 = vmatpush1.bf16.msra.mxu1 %v3829_v36 }
  0x7f   :  { %877 = vmatprep.subr.bf16.mxu1 %v3832_v37 }
  0x82   :  { %878 = vmatpush1.bf16.msra.mxu1 %v3837_v38 }
  0x83   :  { %879 = vmatprep.subr.bf16.mxu1 %v3840_v39 }
  0x86   :  { %880 = vmatpush1.bf16.msra.mxu1 %v3843_v40 }
  0x87   :  { %881 = vmatprep.subr.bf16.mxu1 %v3846_v41 }
  0x8a   :  { %882 = vmatpush1.bf16.msra.mxu1 %v3849_v42 }
  0x8b   :  { %1173 = vmatprep.subr.bf16.mxu1 %v3782_v26 }
  0xed   :  { %v248_v43 = vpop.f32.mrf.mxu1 }
  0xef   :  { %v250_v44 = vpop.f32.mrf.mxu1  ;;  %v175_v63 = vpop.f32.mrf.mxu0 }
  0xf1   :  { %v3871_v45 = vpop.f32.mrf.mxu1  ;;  %v177_v1 = vpop.f32.mrf.mxu0 }
  0xf3   :  { %v3873_v46 = vpop.f32.mrf.mxu1 }
  0xf5   :  { %v3875_v47 = vpop.f32.mrf.mxu1 }
  0xf7   :  { %v3877_v48 = vpop.f32.mrf.mxu1 }
  0xf9   :  { %v3879_v49 = vpop.f32.mrf.mxu1 }
  0xfb   :  { %v3881_v50 = vpop.f32.mrf.mxu1 }
  0xfd   :  { %v3883_v51 = vpop.f32.mrf.mxu1 }
  0xfe   :  { %4299 = vst [vmem:[#allocation20_spill] sm:$0xff] %v3883_v51 }
  0xff   :  { %v3885_v52 = vpop.f32.mrf.mxu1 }
 0x100   :  { %4300 = vst [vmem:[#allocation21_spill] sm:$0xff] %v3885_v52 }
 0x101   :  { %v3887_v53 = vpop.f32.mrf.mxu1 }
 0x102   :  { %4301 = vst [vmem:[#allocation22_spill] sm:$0xff] %v3887_v53 }
 0x103   :  { %v3889_v54 = vpop.f32.mrf.mxu1 }
 0x104   :  { %4302 = vst [vmem:[#allocation23_spill] sm:$0xff] %v3889_v54 }
 0x105   :  { %v3891_v55 = vpop.f32.mrf.mxu1 }
 0x106   :  { %4303 = vst [vmem:[#allocation24_spill] sm:$0xff] %v3891_v55 }
 0x107   :  { %v3893_v56 = vpop.f32.mrf.mxu1 }
 0x108   :  { %4304 = vst [vmem:[#allocation25_spill] sm:$0xff] %v3893_v56 }
 0x109   :  { %v3895_v57 = vpop.f32.mrf.mxu1 }
 0x10a   :  { %4305 = vst [vmem:[#allocation26_spill] sm:$0xff] %v3895_v57 }
 0x10b   :  { %v3897_v58 = vpop.f32.mrf.mxu1 }
 0x10c   :  { %4306 = vst [vmem:[#allocation27_spill] sm:$0xff] %v3897_v58 }
 0x10d   :  { %v555_v59 = vpop.f32.mrf.mxu1 }
 0x10e   :  { %v603_v3 = vadd.f32 %v555_v59, %v175_v63 }
 0x10f   :  { %v557_v60 = vpop.f32.mrf.mxu1 }
 0x110   :  { %v604_v2 = vadd.f32 %v557_v60, %v177_v1  ;;  %v607_v13 = vmul.f32 0.5, %v603_v3  ;;  %v74_v60 = vld [vmem:[#allocation6] sm:$0xff] }
 0x111   :  { %v559_v61 = vpop.f32.mrf.mxu1 }
 0x112   :  { %v611_v9 = vmul.f32 0.5, %v604_v2 }
 0x113   :  { %v560_v62 = vpop.f32.mrf.mxu1 }
 0x114   :  { %3419 = vtanh.f32 %v611_v9 }
 0x115   :  { %3421 = vtanh.f32 %v607_v13 }
 0x121   :  { %v3420_v0 = vpop.eup %3419 }
 0x122   :  { %v3422_v57 = vpop.eup %3421  ;;  %v613_v56 = vmul.f32 0.5, %v3420_v0 }
 0x123   :  { %v609_v62 = vmul.f32 0.5, %v3422_v57 }
 0x124   :  { %v614_v55 = vadd.f32 0.5, %v613_v56  ;;  %v179_v56 = vpop.f32.mrf.mxu0 }
 0x125   :  { %v610_v59 = vadd.f32 0.5, %v609_v62 }
 0x126   :  { %v620_v1 = vmul.f32 %v614_v55, %v74_v60  ;;  %v4308_v55 = vmov 0   ;;  %v181_v57 = vpop.f32.mrf.mxu0 }
 0x12d   :  { %v596_v15 = vpop.f32.mrf.mxu1 }
 0x12e   :  { %v605_v16 = vadd.f32 %v596_v15, %v248_v43  ;;  %v3940_v15 = vpop.f32.mrf.mxu0 }
 0x12f   :  { %v598_v21 = vpop.f32.mrf.mxu1 }
 0x130   :  { %3423 = vtanh.f32 %v605_v16  ;;  %v606_v28 = vadd.f32 %v598_v21, %v250_v44  ;;  %v3942_v16 = vpop.f32.mrf.mxu0 }
 0x131   :  { %v600_v25 = vpop.f32.mrf.mxu1 }
 0x132   :  { %v616_v61 = vmul.f32 0.5, %v606_v28  ;;  %v3944_v21 = vpop.f32.mrf.mxu0 }
 0x133   :  { %v601_v58 = vpop.f32.mrf.mxu1 }
 0x134   :  { %3425 = vtanh.f32 %v616_v61  ;;  %v3946_v25 = vpop.f32.mrf.mxu0 }
 0x136   :  { %v3948_v28 = vpop.f32.mrf.mxu0 }
 0x138   :  { %v3950_v61 = vpop.f32.mrf.mxu0 }
 0x13a   :  { %v3952_v62 = vpop.f32.mrf.mxu0 }
 0x13b   :  { %4309 = vst [vmem:[#allocation29_spill] sm:$0xff] %v3952_v62 }
 0x13c   :  { %v3954_v60 = vpop.f32.mrf.mxu0 }
 0x13d   :  { %v3424_v63 = vpop.eup %3423  ;;  %4310 = vst [vmem:[#allocation30_spill] sm:$0xff] %v3954_v60 }
 0x13e   :  { %v621_v2 = vmul.f32 %v3424_v63, %v610_v59 }
 0x140   :  { %v3899_v3 = vadd.f32 %v621_v2, %v620_v1 }
 0x141   :  { %v3426_v43 = vpop.eup %3425 }
 0x142   :  { %3427 = vtanh.f32 %v3899_v3  ;;  %v618_v9 = vmul.f32 0.5, %v3426_v43 }
 0x144   :  { %v619_v44 = vadd.f32 0.5, %v618_v9 }
 0x14f   :  { %v3428_v13 = vpop.eup %3427 }
 0x150   :  { %v3902_v58 = vmul.f32 %v3428_v13, %v619_v44 }
 0x152   :  { %4307 = vst [vmem:[#allocation28_spill] sm:$0xff] %v3902_v58  ;;  %v633_v0 = vpack.c.bf16 %v3902_v58, %v3902_v58 }
 0x154   :  { %859 = vmatmul.mubr.bf16.vlgmr.msra.gmra.mxu0 %v633_v0  ;;  %900 = vmatmul.mubr.bf16.vlgmr.msra.gmra.mxu1 %v633_v0 }
 0x155   :  { %1133 = vmatpush1.bf16.msra.mxu0 %v3705_v4  ;;  %1174 = vmatpush1.bf16.msra.mxu1 %v3789_v27 }
 0x156   :  { %1134 = vmatprep.subr.bf16.mxu0 %v3709_v6  ;;  %1175 = vmatprep.subr.bf16.mxu1 %v3793_v29 }
 0x157   :  { %1164 = vmatprep.mubr.bf16.mxu0 %v4308_v55  ;;  %1205 = vmatprep.mubr.bf16.mxu1 %v4308_v55 }
 0x159   :  { %1135 = vmatpush1.bf16.msra.mxu0 %v3714_v7  ;;  %1176 = vmatpush1.bf16.msra.mxu1 %v3798_v30 }
 0x15a   :  { %1136 = vmatprep.subr.bf16.mxu0 %v3718_v8  ;;  %1177 = vmatprep.subr.bf16.mxu1 %v3801_v31 }
 0x15d   :  { %1137 = vmatpush1.bf16.msra.mxu0 %v3724_v10  ;;  %1178 = vmatpush1.bf16.msra.mxu1 %v3808_v32 }
 0x15e   :  { %1138 = vmatprep.subr.bf16.mxu0 %v3727_v11  ;;  %1179 = vmatprep.subr.bf16.mxu1 %v3814_v33 }
 0x161   :  { %1139 = vmatpush1.bf16.msra.mxu0 %v3730_v12  ;;  %1180 = vmatpush1.bf16.msra.mxu1 %v3820_v34 }
 0x162   :  { %1140 = vmatprep.subr.bf16.mxu0 %v3738_v14  ;;  %1181 = vmatprep.subr.bf16.mxu1 %v3824_v35 }
 0x165   :  { %1141 = vmatpush1.bf16.msra.mxu0 %v3747_v17  ;;  %1182 = vmatpush1.bf16.msra.mxu1 %v3829_v36 }
 0x166   :  { %1142 = vmatprep.subr.bf16.mxu0 %v3750_v18  ;;  %1183 = vmatprep.subr.bf16.mxu1 %v3832_v37 }
 0x169   :  { %1143 = vmatpush1.bf16.msra.mxu0 %v3756_v19  ;;  %1184 = vmatpush1.bf16.msra.mxu1 %v3837_v38 }
 0x16a   :  { %1144 = vmatprep.subr.bf16.mxu0 %v3760_v20  ;;  %1185 = vmatprep.subr.bf16.mxu1 %v3840_v39 }
 0x16d   :  { %1145 = vmatpush1.bf16.msra.mxu0 %v3769_v22  ;;  %1186 = vmatpush1.bf16.msra.mxu1 %v3843_v40 }
 0x16e   :  { %1146 = vmatprep.subr.bf16.mxu0 %v3772_v23  ;;  %1187 = vmatprep.subr.bf16.mxu1 %v3846_v41 }
 0x171   :  { %1147 = vmatpush1.bf16.msra.mxu0 %v3775_v24  ;;  %1188 = vmatpush1.bf16.msra.mxu1 %v3849_v42 }
 0x172   :  { %1438 = vmatprep.subr.bf16.mxu0 %v3707_v5  ;;  %1479 = vmatprep.subr.bf16.mxu1 %v3782_v26  ;;  %v3956_v5 = vpop.f32.mrf.mxu0 }
 0x173   :  { %4311 = vst [vmem:[#allocation31_spill] sm:$0xff] %v3956_v5 }
 0x174   :  { %v3958_v26 = vpop.f32.mrf.mxu0 }
 0x175   :  { %4312 = vst [vmem:[#allocation32_spill] sm:$0xff] %v3958_v26 }
 0x176   :  { %v3960_v59 = vpop.f32.mrf.mxu0 }
 0x177   :  { %4313 = vst [vmem:[#allocation33_spill] sm:$0xff] %v3960_v59 }
 0x178   :  { %v3962_v63 = vpop.f32.mrf.mxu0 }
 0x179   :  { %4314 = vst [vmem:[#allocation34_spill] sm:$0xff] %v3962_v63 }
 0x214   :  { %v860_v1 = vpop.f32.mrf.mxu0  ;;  %v901_v2 = vpop.f32.mrf.mxu1 }
 0x215   :  { %v908_v43 = vadd.f32 %v860_v1, %v179_v56  ;;  %v910_v5 = vadd.f32 %v901_v2, %v3871_v45  ;;  %v4044_v2 = vld [vmem:[#allocation9 + $0xa4] ss:$16 sps:$4 sm:$0xff]  }
 0x216   :  { %v862_v9 = vpop.f32.mrf.mxu0  ;;  %v903_v44 = vpop.f32.mrf.mxu1 }
 0x217   :  { %v912_v13 = vmul.f32 0.5, %v908_v43  ;;  %v909_v0 = vadd.f32 %v862_v9, %v181_v57  ;;  %v911_v59 = vadd.f32 %v903_v44, %v3873_v46  ;;  %v4046_v9 = vld [vmem:[#allocation9 + $0xac] ss:$16 sps:$4 sm:$0xff]   ;;  %v4048_v44 = vld [vmem:[#allocation9 + $0xa0] ss:$16 sps:$4 sm:$0xff]  }
 0x218   :  { %v864_v58 = vpop.f32.mrf.mxu0  ;;  %v905_v54 = vpop.f32.mrf.mxu1 }
 0x219   :  { %3429 = vtanh.f32 %v912_v13  ;;  %v916_v53 = vmul.f32 0.5, %v909_v0  ;;  %v921_v63 = vmul.f32 0.5, %v911_v59  ;;  %v4036_v59 = vld [vmem:[#allocation9 + $0xc0] ss:$16 sps:$4 sm:$0xff]   ;;  %v4050_v13 = vld [vmem:[#allocation9 + $0xa8] ss:$16 sps:$4 sm:$0xff]  }
 0x21a   :  { %v865_v60 = vpop.f32.mrf.mxu0  ;;  %v906_v62 = vpop.f32.mrf.mxu1  ;;  %v4056_v0 = vld [vmem:[#allocation9 + $0x84] ss:$16 sps:$4 sm:$0xff]  }
 0x21b   :  { %3431 = vtanh.f32 %v916_v53 }
 0x21c   :  { %3433 = vtanh.f32 %v910_v5 }
 0x21d   :  { %3435 = vtanh.f32 %v921_v63  ;;  %v4038_v63 = vld [vmem:[#allocation9 + $0xc8] ss:$16 sps:$4 sm:$0xff]  }
 0x226   :  { %v3430_v26 = vpop.eup %3429 }
 0x227   :  { %v914_v52 = vmul.f32 0.5, %v3430_v26  ;;  %v4034_v26 = vld [vmem:[#allocation9 + $0xcc] ss:$16 sps:$4 sm:$0xff]  }
 0x228   :  { %v3432_v56 = vpop.eup %3431 }
 0x229   :  { %v915_v1 = vadd.f32 0.5, %v914_v52  ;;  %v918_v51 = vmul.f32 0.5, %v3432_v56  ;;  %v3434_v58 = vpop.eup %3433  ;;  %v4058_v56 = vld [vmem:[#allocation9 + $0x8c] ss:$16 sps:$4 sm:$0xff]  }
 0x22a   :  { %v3436_v45 = vpop.eup %3435 }
 0x22b   :  { %v919_v57 = vadd.f32 0.5, %v918_v51  ;;  %v926_v43 = vmul.f32 %v3434_v58, %v915_v1  ;;  %v923_v53 = vmul.f32 0.5, %v3436_v45  ;;  %v4022_v51 = vld [vmem:[#allocation9 + $0xec] ss:$16 sps:$4 sm:$0xff]   ;;  %v4060_v1 = vld [vmem:[#allocation9 + $0x80] ss:$16 sps:$4 sm:$0xff]  }
 0x22c   :  { %v4068_v58 = vld [vmem:[#allocation9 + $0x64] ss:$16 sps:$4 sm:$0xff]  }
 0x22d   :  { %v925_v54 = vmul.f32 %v919_v57, %v3899_v3  ;;  %v924_v62 = vadd.f32 0.5, %v923_v53  ;;  %v4024_v3 = vld [vmem:[#allocation9 + $0xe0] ss:$16 sps:$4 sm:$0xff]   ;;  %v4062_v57 = vld [vmem:[#allocation9 + $0x88] ss:$16 sps:$4 sm:$0xff]  }
 0x22e   :  { %v4080_v45 = vld [vmem:[#allocation9 + $0x44] ss:$16 sps:$4 sm:$0xff]   ;;  %v4082_v53 = vld [vmem:[#allocation9 + $0x4c] ss:$16 sps:$4 sm:$0xff]  }
 0x22f   :  { %v3967_v60 = vadd.f32 %v926_v43, %v925_v54  ;;  %v4070_v54 = vld [vmem:[#allocation9 + $0x6c] ss:$16 sps:$4 sm:$0xff]   ;;  %v4072_v43 = vld [vmem:[#allocation9 + $0x60] ss:$16 sps:$4 sm:$0xff]  }
 0x231   :  { %3437 = vtanh.f32 %v3967_v60 }
 0x23e   :  { %v3438_v46 = vpop.eup %3437 }
 0x23f   :  { %v3970_v5 = vmul.f32 %v3438_v46, %v924_v62  ;;  %v4084_v62 = vld [vmem:[#allocation9 + $0x40] ss:$16 sps:$4 sm:$0xff]   ;;  %v4086_v46 = vld [vmem:[#allocation9 + $0x48] ss:$16 sps:$4 sm:$0xff]  }
 0x241   :  { %v939_v52 = vpack.c.bf16 %v3970_v5, %v3970_v5 }
 0x243   :  { %1165 = vmatmul.mubr.bf16.vlgmr.msra.gmra.mxu0 %v939_v52  ;;  %1206 = vmatmul.mubr.bf16.vlgmr.msra.gmra.mxu1 %v939_v52  ;;  %v4092_v52 = vld [vmem:[#allocation9 + $0x24] ss:$16 sps:$4 sm:$0xff]  }
 0x244   :  { %1439 = vmatpush1.bf16.msra.mxu0 %v3705_v4  ;;  %1480 = vmatpush1.bf16.msra.mxu1 %v3789_v27 }
 0x245   :  { %1440 = vmatprep.subr.bf16.mxu0 %v3709_v6  ;;  %1481 = vmatprep.subr.bf16.mxu1 %v3793_v29 }
 0x246   :  { %1470 = vmatprep.mubr.bf16.mxu0 %v4308_v55  ;;  %1511 = vmatprep.mubr.bf16.mxu1 %v4308_v55 }
 0x248   :  { %1441 = vmatpush1.bf16.msra.mxu0 %v3714_v7  ;;  %1482 = vmatpush1.bf16.msra.mxu1 %v3798_v30 }
 0x249   :  { %1442 = vmatprep.subr.bf16.mxu0 %v3718_v8  ;;  %1483 = vmatprep.subr.bf16.mxu1 %v3801_v31 }
 0x24c   :  { %1443 = vmatpush1.bf16.msra.mxu0 %v3724_v10  ;;  %1484 = vmatpush1.bf16.msra.mxu1 %v3808_v32 }
 0x24d   :  { %1444 = vmatprep.subr.bf16.mxu0 %v3727_v11  ;;  %1485 = vmatprep.subr.bf16.mxu1 %v3814_v33 }
 0x250   :  { %1445 = vmatpush1.bf16.msra.mxu0 %v3730_v12  ;;  %1486 = vmatpush1.bf16.msra.mxu1 %v3820_v34 }
 0x251   :  { %1446 = vmatprep.subr.bf16.mxu0 %v3738_v14  ;;  %1487 = vmatprep.subr.bf16.mxu1 %v3824_v35 }
 0x254   :  { %1447 = vmatpush1.bf16.msra.mxu0 %v3747_v17  ;;  %1488 = vmatpush1.bf16.msra.mxu1 %v3829_v36 }
 0x255   :  { %1448 = vmatprep.subr.bf16.mxu0 %v3750_v18  ;;  %1489 = vmatprep.subr.bf16.mxu1 %v3832_v37 }
 0x258   :  { %1449 = vmatpush1.bf16.msra.mxu0 %v3756_v19  ;;  %1490 = vmatpush1.bf16.msra.mxu1 %v3837_v38 }
 0x259   :  { %1450 = vmatprep.subr.bf16.mxu0 %v3760_v20  ;;  %1491 = vmatprep.subr.bf16.mxu1 %v3840_v39 }
 0x25c   :  { %1451 = vmatpush1.bf16.msra.mxu0 %v3769_v22  ;;  %1492 = vmatpush1.bf16.msra.mxu1 %v3843_v40 }
 0x25d   :  { %1452 = vmatprep.subr.bf16.mxu0 %v3772_v23  ;;  %1493 = vmatprep.subr.bf16.mxu1 %v3846_v41 }
 0x260   :  { %1453 = vmatpush1.bf16.msra.mxu0 %v3775_v24  ;;  %1494 = vmatpush1.bf16.msra.mxu1 %v3849_v42 }
 0x261   :  { %1785 = vmatprep.subr.bf16.mxu1 %v4022_v51 }
 0x303   :  { %v1166_v4 = vpop.f32.mrf.mxu0  ;;  %v1207_v6 = vpop.f32.mrf.mxu1 }
 0x304   :  { %v1214_v7 = vadd.f32 %v1166_v4, %v3940_v15  ;;  %v1216_v22 = vadd.f32 %v1207_v6, %v3875_v47  ;;  %v4026_v15 = vld [vmem:[#allocation9 + $0xe8] ss:$16 sps:$4 sm:$0xff]   ;;  %v4094_v4 = vld [vmem:[#allocation9 + $0x2c] ss:$16 sps:$4 sm:$0xff]   ;;  %v4096_v6 = vld [vmem:[#allocation9 + $0x20] ss:$16 sps:$4 sm:$0xff]  }
 0x305   :  { %v1168_v8 = vpop.f32.mrf.mxu0  ;;  %v1209_v10 = vpop.f32.mrf.mxu1 }
 0x306   :  { %v1218_v11 = vmul.f32 0.5, %v1214_v7  ;;  %v1215_v12 = vadd.f32 %v1168_v8, %v3942_v16  ;;  %v1217_v23 = vadd.f32 %v1209_v10, %v3877_v48  ;;  %v4020_v48 = vld [vmem:[#allocation9 + $0xe4] ss:$16 sps:$4 sm:$0xff]   ;;  %v4098_v7 = vld [vmem:[#allocation9 + $0x28] ss:$16 sps:$4 sm:$0xff]  }
 0x307   :  { %v1170_v14 = vpop.f32.mrf.mxu0  ;;  %v1211_v17 = vpop.f32.mrf.mxu1  ;;  %1744 = vmatprep.subr.bf16.mxu0 %v4020_v48  ;;  %v4032_v16 = vld [vmem:[#allocation9 + $0xc4] ss:$16 sps:$4 sm:$0xff]   ;;  %v4106_v10 = vld [vmem:[#allocation9 + $0xc] ss:$16 sps:$4 sm:$0xff]  }
 0x308   :  { %3439 = vtanh.f32 %v1218_v11  ;;  %v1222_v18 = vmul.f32 0.5, %v1215_v12  ;;  %v1227_v24 = vmul.f32 0.5, %v1217_v23  ;;  %v4104_v8 = vld [vmem:[#allocation9 + $0x4] ss:$16 sps:$4 sm:$0xff]   ;;  %v4108_v11 = vld [vmem:[#allocation9] ss:$16 sps:$4 sm:$0xff]  }
 0x309   :  { %v1171_v19 = vpop.f32.mrf.mxu0  ;;  %v1212_v20 = vpop.f32.mrf.mxu1  ;;  %v4110_v12 = vld [vmem:[#allocation9 + $0x8] ss:$16 sps:$4 sm:$0xff]  }
 0x30a   :  { %3441 = vtanh.f32 %v1222_v18 }
 0x30b   :  { %3443 = vtanh.f32 %v1216_v22 }
 0x30c   :  { %3445 = vtanh.f32 %v1227_v24 }
 0x315   :  { %v3440_v27 = vpop.eup %3439 }
 0x316   :  { %v1220_v29 = vmul.f32 0.5, %v3440_v27 }
 0x317   :  { %v3442_v30 = vpop.eup %3441 }
 0x318   :  { %v1221_v31 = vadd.f32 0.5, %v1220_v29  ;;  %v1224_v32 = vmul.f32 0.5, %v3442_v30  ;;  %v3444_v34 = vpop.eup %3443 }
 0x319   :  { %v3446_v38 = vpop.eup %3445 }
 0x31a   :  { %v1225_v33 = vadd.f32 0.5, %v1224_v32  ;;  %v1232_v36 = vmul.f32 %v3444_v34, %v1221_v31  ;;  %v1229_v39 = vmul.f32 0.5, %v3446_v38 }
 0x31c   :  { %v1231_v35 = vmul.f32 %v1225_v33, %v3967_v60  ;;  %v1230_v40 = vadd.f32 0.5, %v1229_v39  ;;  %v4074_v60 = vld [vmem:[#allocation9 + $0x68] ss:$16 sps:$4 sm:$0xff]  }
 0x31e   :  { %v4011_v37 = vadd.f32 %v1232_v36, %v1231_v35 }
 0x320   :  { %3447 = vtanh.f32 %v4011_v37 }
 0x32d   :  { %v3448_v41 = vpop.eup %3447 }
 0x32e   :  { %v4014_v42 = vmul.f32 %v3448_v41, %v1230_v40 }
 0x330   :  { %v1245_v47 = vpack.c.bf16 %v4014_v42, %v4014_v42 }
 0x332   :  { %1471 = vmatmul.mubr.bf16.vlgmr.msra.gmra.mxu0 %v1245_v47  ;;  %1512 = vmatmul.mubr.bf16.vlgmr.msra.gmra.mxu1 %v1245_v47 }
 0x333   :  { %1776 = vmatprep.mubr.bf16.mxu0 %v4308_v55  ;;  %1817 = vmatprep.mubr.bf16.mxu1 %v4308_v55 }
 0x334   :  { %1745 = vmatpush1.bf16.msra.mxu0 %v4024_v3  ;;  %1786 = vmatpush1.bf16.msra.mxu1 %v4026_v15 }
 0x335   :  { %1746 = vmatprep.subr.bf16.mxu0 %v4032_v16  ;;  %1787 = vmatprep.subr.bf16.mxu1 %v4034_v26 }
 0x338   :  { %1747 = vmatpush1.bf16.msra.mxu0 %v4036_v59  ;;  %1788 = vmatpush1.bf16.msra.mxu1 %v4038_v63 }
 0x339   :  { %1748 = vmatprep.subr.bf16.mxu0 %v4044_v2  ;;  %1789 = vmatprep.subr.bf16.mxu1 %v4046_v9 }
 0x33c   :  { %1749 = vmatpush1.bf16.msra.mxu0 %v4048_v44  ;;  %1790 = vmatpush1.bf16.msra.mxu1 %v4050_v13 }
 0x33d   :  { %1750 = vmatprep.subr.bf16.mxu0 %v4056_v0  ;;  %1791 = vmatprep.subr.bf16.mxu1 %v4058_v56 }
 0x340   :  { %1751 = vmatpush1.bf16.msra.mxu0 %v4060_v1  ;;  %1792 = vmatpush1.bf16.msra.mxu1 %v4062_v57 }
 0x341   :  { %1752 = vmatprep.subr.bf16.mxu0 %v4068_v58  ;;  %1793 = vmatprep.subr.bf16.mxu1 %v4070_v54 }
 0x344   :  { %1753 = vmatpush1.bf16.msra.mxu0 %v4072_v43  ;;  %1794 = vmatpush1.bf16.msra.mxu1 %v4074_v60 }
 0x345   :  { %1754 = vmatprep.subr.bf16.mxu0 %v4080_v45  ;;  %1795 = vmatprep.subr.bf16.mxu1 %v4082_v53 }
 0x348   :  { %1755 = vmatpush1.bf16.msra.mxu0 %v4084_v62  ;;  %1796 = vmatpush1.bf16.msra.mxu1 %v4086_v46 }
 0x349   :  { %1756 = vmatprep.subr.bf16.mxu0 %v4092_v52  ;;  %1797 = vmatprep.subr.bf16.mxu1 %v4094_v4 }
 0x34c   :  { %1757 = vmatpush1.bf16.msra.mxu0 %v4096_v6  ;;  %1798 = vmatpush1.bf16.msra.mxu1 %v4098_v7 }
 0x34d   :  { %1758 = vmatprep.subr.bf16.mxu0 %v4104_v8  ;;  %1799 = vmatprep.subr.bf16.mxu1 %v4106_v10 }
 0x350   :  { %1759 = vmatpush1.bf16.msra.mxu0 %v4108_v11  ;;  %1800 = vmatpush1.bf16.msra.mxu1 %v4110_v12 }
 0x351   :  { %2050 = vmatprep.subr.bf16.mxu0 %v4020_v48  ;;  %2091 = vmatprep.subr.bf16.mxu1 %v4022_v51 }
 0x3f2   :  { %v1472_v14 = vpop.f32.mrf.mxu0  ;;  %v1513_v17 = vpop.f32.mrf.mxu1 }
 0x3f3   :  { %v1520_v18 = vadd.f32 %v1472_v14, %v3944_v21  ;;  %v1522_v32 = vadd.f32 %v1513_v17, %v3879_v49 }
 0x3f4   :  { %v1474_v19 = vpop.f32.mrf.mxu0  ;;  %v1515_v20 = vpop.f32.mrf.mxu1 }
 0x3f5   :  { %v1524_v22 = vmul.f32 0.5, %v1520_v18  ;;  %v1521_v23 = vadd.f32 %v1474_v19, %v3946_v25  ;;  %v1523_v33 = vadd.f32 %v1515_v20, %v3881_v50 }
 0x3f6   :  { %v1476_v24 = vpop.f32.mrf.mxu0  ;;  %v1517_v27 = vpop.f32.mrf.mxu1 }
 0x3f7   :  { %3449 = vtanh.f32 %v1524_v22  ;;  %v1528_v29 = vmul.f32 0.5, %v1521_v23  ;;  %v1533_v34 = vmul.f32 0.5, %v1523_v33 }
 0x3f8   :  { %v1477_v30 = vpop.f32.mrf.mxu0  ;;  %v1518_v31 = vpop.f32.mrf.mxu1 }
 0x3f9   :  { %3451 = vtanh.f32 %v1528_v29 }
 0x3fa   :  { %3453 = vtanh.f32 %v1522_v32 }
 0x3fb   :  { %3455 = vtanh.f32 %v1533_v34 }
 0x404   :  { %v3450_v35 = vpop.eup %3449 }
 0x405   :  { %v1526_v21 = vmul.f32 0.5, %v3450_v35 }
 0x406   :  { %v3452_v36 = vpop.eup %3451 }
 0x407   :  { %v1527_v38 = vadd.f32 0.5, %v1526_v21  ;;  %v1530_v39 = vmul.f32 0.5, %v3452_v36  ;;  %v3454_v40 = vpop.eup %3453  ;;  %v4315_v21 = vld [vmem:[#allocation20_spill] sm:$0xff] }
 0x408   :  { %v3456_v49 = vpop.eup %3455 }
 0x409   :  { %v1531_v25 = vadd.f32 0.5, %v1530_v39  ;;  %v1538_v47 = vmul.f32 %v3454_v40, %v1527_v38  ;;  %v1535_v17 = vmul.f32 0.5, %v3456_v49  ;;  %v4316_v38 = vld [vmem:[#allocation21_spill] sm:$0xff] }
 0x40b   :  { %v1537_v41 = vmul.f32 %v1531_v25, %v4011_v37  ;;  %v1536_v18 = vadd.f32 0.5, %v1535_v17 }
 0x40d   :  { %v4123_v14 = vadd.f32 %v1538_v47, %v1537_v41 }
 0x40f   :  { %3457 = vtanh.f32 %v4123_v14 }
 0x41c   :  { %v3458_v50 = vpop.eup %3457 }
 0x41d   :  { %v4126_v19 = vmul.f32 %v3458_v50, %v1536_v18 }
 0x41f   :  { %v1551_v20 = vpack.c.bf16 %v4126_v19, %v4126_v19 }
 0x421   :  { %1777 = vmatmul.mubr.bf16.vlgmr.msra.gmra.mxu0 %v1551_v20  ;;  %1818 = vmatmul.mubr.bf16.vlgmr.msra.gmra.mxu1 %v1551_v20 }
 0x422   :  { %2051 = vmatpush1.bf16.msra.mxu0 %v4024_v3  ;;  %2092 = vmatpush1.bf16.msra.mxu1 %v4026_v15 }
 0x423   :  { %2052 = vmatprep.subr.bf16.mxu0 %v4032_v16  ;;  %2093 = vmatprep.subr.bf16.mxu1 %v4034_v26 }
 0x424   :  { %2082 = vmatprep.mubr.bf16.mxu0 %v4308_v55  ;;  %2123 = vmatprep.mubr.bf16.mxu1 %v4308_v55 }
 0x426   :  { %2053 = vmatpush1.bf16.msra.mxu0 %v4036_v59  ;;  %2094 = vmatpush1.bf16.msra.mxu1 %v4038_v63 }
 0x427   :  { %2054 = vmatprep.subr.bf16.mxu0 %v4044_v2  ;;  %2095 = vmatprep.subr.bf16.mxu1 %v4046_v9 }
 0x42a   :  { %2055 = vmatpush1.bf16.msra.mxu0 %v4048_v44  ;;  %2096 = vmatpush1.bf16.msra.mxu1 %v4050_v13 }
 0x42b   :  { %2056 = vmatprep.subr.bf16.mxu0 %v4056_v0  ;;  %2097 = vmatprep.subr.bf16.mxu1 %v4058_v56 }
 0x42e   :  { %2057 = vmatpush1.bf16.msra.mxu0 %v4060_v1  ;;  %2098 = vmatpush1.bf16.msra.mxu1 %v4062_v57 }
 0x42f   :  { %2058 = vmatprep.subr.bf16.mxu0 %v4068_v58  ;;  %2099 = vmatprep.subr.bf16.mxu1 %v4070_v54 }
 0x432   :  { %2059 = vmatpush1.bf16.msra.mxu0 %v4072_v43  ;;  %2100 = vmatpush1.bf16.msra.mxu1 %v4074_v60 }
 0x433   :  { %2060 = vmatprep.subr.bf16.mxu0 %v4080_v45  ;;  %2101 = vmatprep.subr.bf16.mxu1 %v4082_v53 }
 0x436   :  { %2061 = vmatpush1.bf16.msra.mxu0 %v4084_v62  ;;  %2102 = vmatpush1.bf16.msra.mxu1 %v4086_v46 }
 0x437   :  { %2062 = vmatprep.subr.bf16.mxu0 %v4092_v52  ;;  %2103 = vmatprep.subr.bf16.mxu1 %v4094_v4 }
 0x43a   :  { %2063 = vmatpush1.bf16.msra.mxu0 %v4096_v6  ;;  %2104 = vmatpush1.bf16.msra.mxu1 %v4098_v7 }
 0x43b   :  { %2064 = vmatprep.subr.bf16.mxu0 %v4104_v8  ;;  %2105 = vmatprep.subr.bf16.mxu1 %v4106_v10 }
 0x43e   :  { %2065 = vmatpush1.bf16.msra.mxu0 %v4108_v11  ;;  %2106 = vmatpush1.bf16.msra.mxu1 %v4110_v12 }
 0x43f   :  { %2356 = vmatprep.subr.bf16.mxu0 %v4020_v48  ;;  %2397 = vmatprep.subr.bf16.mxu1 %v4022_v51 }
 0x4e1   :  { %v1778_v37 = vpop.f32.mrf.mxu0  ;;  %v1819_v22 = vpop.f32.mrf.mxu1 }
 0x4e2   :  { %v1826_v23 = vadd.f32 %v1778_v37, %v3948_v28  ;;  %v1828_v36 = vadd.f32 %v1819_v22, %v4315_v21  ;;  %v4318_v21 = vld [vmem:[#allocation30_spill] sm:$0xff] }
 0x4e3   :  { %v1780_v24 = vpop.f32.mrf.mxu0  ;;  %v1821_v27 = vpop.f32.mrf.mxu1 }
 0x4e4   :  { %v1830_v29 = vmul.f32 0.5, %v1826_v23  ;;  %v1827_v30 = vadd.f32 %v1780_v24, %v3950_v61  ;;  %v1829_v39 = vadd.f32 %v1821_v27, %v4316_v38 }
 0x4e5   :  { %v1782_v31 = vpop.f32.mrf.mxu0  ;;  %v1823_v32 = vpop.f32.mrf.mxu1 }
 0x4e6   :  { %3459 = vtanh.f32 %v1830_v29  ;;  %v1834_v33 = vmul.f32 0.5, %v1827_v30  ;;  %v1839_v25 = vmul.f32 0.5, %v1829_v39  ;;  %v4317_v31 = vld [vmem:[#allocation29_spill] sm:$0xff] }
 0x4e7   :  { %v1783_v34 = vpop.f32.mrf.mxu0  ;;  %v1824_v35 = vpop.f32.mrf.mxu1 }
 0x4e8   :  { %3461 = vtanh.f32 %v1834_v33 }
 0x4e9   :  { %3463 = vtanh.f32 %v1828_v36 }
 0x4ea   :  { %3465 = vtanh.f32 %v1839_v25 }
 0x4f3   :  { %v3460_v40 = vpop.eup %3459 }
 0x4f4   :  { %v1832_v28 = vmul.f32 0.5, %v3460_v40 }
 0x4f5   :  { %v3462_v41 = vpop.eup %3461 }
 0x4f6   :  { %v1833_v47 = vadd.f32 0.5, %v1832_v28  ;;  %v1836_v49 = vmul.f32 0.5, %v3462_v41  ;;  %v3464_v17 = vpop.eup %3463  ;;  %v4319_v41 = vld [vmem:[#allocation22_spill] sm:$0xff] }
 0x4f7   :  { %v3466_v37 = vpop.eup %3465 }
 0x4f8   :  { %v1837_v61 = vadd.f32 0.5, %v1836_v49  ;;  %v1844_v50 = vmul.f32 %v3464_v17, %v1833_v47  ;;  %v1841_v22 = vmul.f32 0.5, %v3466_v37 }
 0x4fa   :  { %v1843_v18 = vmul.f32 %v1837_v61, %v4123_v14  ;;  %v1842_v23 = vadd.f32 0.5, %v1841_v22 }
 0x4fc   :  { %v4169_v20 = vadd.f32 %v1844_v50, %v1843_v18 }
 0x4fe   :  { %3467 = vtanh.f32 %v4169_v20 }
 0x50b   :  { %v3468_v24 = vpop.eup %3467 }
 0x50c   :  { %v4172_v27 = vmul.f32 %v3468_v24, %v1842_v23 }
 0x50e   :  { %v1857_v29 = vpack.c.bf16 %v4172_v27, %v4172_v27 }
 0x510   :  { %2083 = vmatmul.mubr.bf16.vlgmr.msra.gmra.mxu0 %v1857_v29  ;;  %2124 = vmatmul.mubr.bf16.vlgmr.msra.gmra.mxu1 %v1857_v29 }
 0x511   :  { %2357 = vmatpush1.bf16.msra.mxu0 %v4024_v3  ;;  %2398 = vmatpush1.bf16.msra.mxu1 %v4026_v15 }
 0x512   :  { %2358 = vmatprep.subr.bf16.mxu0 %v4032_v16  ;;  %2399 = vmatprep.subr.bf16.mxu1 %v4034_v26 }
 0x513   :  { %2388 = vmatprep.mubr.bf16.mxu0 %v4308_v55  ;;  %2429 = vmatprep.mubr.bf16.mxu1 %v4308_v55 }
 0x515   :  { %2359 = vmatpush1.bf16.msra.mxu0 %v4036_v59  ;;  %2400 = vmatpush1.bf16.msra.mxu1 %v4038_v63 }
 0x516   :  { %2360 = vmatprep.subr.bf16.mxu0 %v4044_v2  ;;  %2401 = vmatprep.subr.bf16.mxu1 %v4046_v9 }
 0x519   :  { %2361 = vmatpush1.bf16.msra.mxu0 %v4048_v44  ;;  %2402 = vmatpush1.bf16.msra.mxu1 %v4050_v13 }
 0x51a   :  { %2362 = vmatprep.subr.bf16.mxu0 %v4056_v0  ;;  %2403 = vmatprep.subr.bf16.mxu1 %v4058_v56 }
 0x51d   :  { %2363 = vmatpush1.bf16.msra.mxu0 %v4060_v1  ;;  %2404 = vmatpush1.bf16.msra.mxu1 %v4062_v57 }
 0x51e   :  { %2364 = vmatprep.subr.bf16.mxu0 %v4068_v58  ;;  %2405 = vmatprep.subr.bf16.mxu1 %v4070_v54 }
 0x521   :  { %2365 = vmatpush1.bf16.msra.mxu0 %v4072_v43  ;;  %2406 = vmatpush1.bf16.msra.mxu1 %v4074_v60 }
 0x522   :  { %2366 = vmatprep.subr.bf16.mxu0 %v4080_v45  ;;  %2407 = vmatprep.subr.bf16.mxu1 %v4082_v53 }
 0x525   :  { %2367 = vmatpush1.bf16.msra.mxu0 %v4084_v62  ;;  %2408 = vmatpush1.bf16.msra.mxu1 %v4086_v46 }
 0x526   :  { %2368 = vmatprep.subr.bf16.mxu0 %v4092_v52  ;;  %2409 = vmatprep.subr.bf16.mxu1 %v4094_v4 }
 0x529   :  { %2369 = vmatpush1.bf16.msra.mxu0 %v4096_v6  ;;  %2410 = vmatpush1.bf16.msra.mxu1 %v4098_v7 }
 0x52a   :  { %2370 = vmatprep.subr.bf16.mxu0 %v4104_v8  ;;  %2411 = vmatprep.subr.bf16.mxu1 %v4106_v10 }
 0x52d   :  { %2371 = vmatpush1.bf16.msra.mxu0 %v4108_v11  ;;  %2412 = vmatpush1.bf16.msra.mxu1 %v4110_v12 }
 0x52e   :  { %2662 = vmatprep.subr.bf16.mxu0 %v4020_v48  ;;  %2703 = vmatprep.subr.bf16.mxu1 %v4022_v51  ;;  %v4320_v48 = vld [vmem:[#allocation23_spill] sm:$0xff] }
 0x5d0   :  { %v2084_v14 = vpop.f32.mrf.mxu0  ;;  %v2125_v30 = vpop.f32.mrf.mxu1 }
 0x5d1   :  { %v2132_v32 = vadd.f32 %v2084_v14, %v4317_v31  ;;  %v2134_v47 = vadd.f32 %v2125_v30, %v4319_v41  ;;  %v3413_v41 = vld [vmem:[#allocation11 + $0x28] sm:$0xff]  }
 0x5d2   :  { %v2086_v33 = vpop.f32.mrf.mxu0  ;;  %v2127_v34 = vpop.f32.mrf.mxu1 }
 0x5d3   :  { %v2136_v35 = vmul.f32 0.5, %v2132_v32  ;;  %v2133_v36 = vadd.f32 %v2086_v33, %v4318_v21  ;;  %v2135_v51 = vadd.f32 %v2127_v34, %v4320_v48  ;;  %v3415_v48 = vld [vmem:[#allocation11 + $0x18] sm:$0xff]  }
 0x5d4   :  { %v2088_v38 = vpop.f32.mrf.mxu0  ;;  %v2129_v39 = vpop.f32.mrf.mxu1 }
 0x5d5   :  { %3469 = vtanh.f32 %v2136_v35  ;;  %v2140_v25 = vmul.f32 0.5, %v2133_v36  ;;  %v2145_v49 = vmul.f32 0.5, %v2135_v51  ;;  %v3416_v51 = vld [vmem:[#allocation11 + $0x10] sm:$0xff]  }
 0x5d6   :  { %v2089_v40 = vpop.f32.mrf.mxu0  ;;  %v2130_v28 = vpop.f32.mrf.mxu1 }
 0x5d7   :  { %3471 = vtanh.f32 %v2140_v25  ;;  %v3412_v25 = vld [vmem:[#allocation11 + $0x30] sm:$0xff]  }
 0x5d8   :  { %3473 = vtanh.f32 %v2134_v47  ;;  %v4325_v40 = vld [vmem:[#allocation28_spill] sm:$0xff]  ;;  %v3414_v47 = vld [vmem:[#allocation11 + $0x20] sm:$0xff]  }
 0x5d9   :  { %3475 = vtanh.f32 %v2145_v49  ;;  %v2778_v28 = vpack.c.bf16 %v3970_v5, %v4325_v40  ;;  %v3417_v49 = vld [vmem:[#allocation11 + $0x8] sm:$0xff]   ;;  %v3418_v5 = vld [vmem:[#allocation11] sm:$0xff]  }
 0x5e2   :  { %v3470_v61 = vpop.eup %3469 }
 0x5e3   :  { %v2138_v17 = vmul.f32 0.5, %v3470_v61  ;;  %v2779_v61 = vpack.c.bf16 %v4126_v19, %v4014_v42  ;;  %v4328_v19 = vld [vmem:[#allocation26_spill] sm:$0xff] }
 0x5e4   :  { %v3472_v18 = vpop.eup %3471 }
 0x5e5   :  { %v2139_v50 = vadd.f32 0.5, %v2138_v17  ;;  %v2142_v37 = vmul.f32 0.5, %v3472_v18  ;;  %v3474_v23 = vpop.eup %3473 }
 0x5e6   :  { %v3476_v30 = vpop.eup %3475 }
 0x5e7   :  { %v2143_v22 = vadd.f32 0.5, %v2142_v37  ;;  %v2150_v29 = vmul.f32 %v3474_v23, %v2139_v50  ;;  %v2147_v31 = vmul.f32 0.5, %v3476_v30  ;;  %v4326_v37 = vld [vmem:[#allocation33_spill] sm:$0xff] }
 0x5e9   :  { %v2149_v24 = vmul.f32 %v2143_v22, %v4169_v20  ;;  %v2148_v32 = vadd.f32 0.5, %v2147_v31 }
 0x5eb   :  { %v4215_v14 = vadd.f32 %v2150_v29, %v2149_v24 }
 0x5ed   :  { %3477 = vtanh.f32 %v4215_v14 }
 0x5fa   :  { %v3478_v33 = vpop.eup %3477 }
 0x5fb   :  { %v4218_v34 = vmul.f32 %v3478_v33, %v2148_v32 }
 0x5fd   :  { %v2163_v35 = vpack.c.bf16 %v4218_v34, %v4218_v34  ;;  %v2780_v17 = vpack.c.bf16 %v4218_v34, %v4172_v27  ;;  %v4329_v27 = vld [vmem:[#allocation27_spill] sm:$0xff] }
 0x5ff   :  { %2389 = vmatmul.mubr.bf16.vlgmr.msra.gmra.mxu0 %v2163_v35  ;;  %2430 = vmatmul.mubr.bf16.vlgmr.msra.gmra.mxu1 %v2163_v35 }
 0x600   :  { %2663 = vmatpush1.bf16.msra.mxu0 %v4024_v3  ;;  %2704 = vmatpush1.bf16.msra.mxu1 %v4026_v15 }
 0x601   :  { %2664 = vmatprep.subr.bf16.mxu0 %v4032_v16  ;;  %2705 = vmatprep.subr.bf16.mxu1 %v4034_v26  ;;  %v4321_v16 = vld [vmem:[#allocation31_spill] sm:$0xff] }
 0x602   :  { %2694 = vmatprep.mubr.bf16.mxu0 %v4308_v55  ;;  %2735 = vmatprep.mubr.bf16.mxu1 %v4308_v55  ;;  %v3411_v55 = vld [vmem:[#allocation11 + $0x38] sm:$0xff]  }
 0x604   :  { %2665 = vmatpush1.bf16.msra.mxu0 %v4036_v59  ;;  %2706 = vmatpush1.bf16.msra.mxu1 %v4038_v63 }
 0x605   :  { %2666 = vmatprep.subr.bf16.mxu0 %v4044_v2  ;;  %2707 = vmatprep.subr.bf16.mxu1 %v4046_v9  ;;  %v4322_v9 = vld [vmem:[#allocation32_spill] sm:$0xff] }
 0x608   :  { %2667 = vmatpush1.bf16.msra.mxu0 %v4048_v44  ;;  %2708 = vmatpush1.bf16.msra.mxu1 %v4050_v13 }
 0x609   :  { %2668 = vmatprep.subr.bf16.mxu0 %v4056_v0  ;;  %2709 = vmatprep.subr.bf16.mxu1 %v4058_v56 }
 0x60c   :  { %2669 = vmatpush1.bf16.msra.mxu0 %v4060_v1  ;;  %2710 = vmatpush1.bf16.msra.mxu1 %v4062_v57 }
 0x60d   :  { %2670 = vmatprep.subr.bf16.mxu0 %v4068_v58  ;;  %2711 = vmatprep.subr.bf16.mxu1 %v4070_v54  ;;  %v4323_v58 = vld [vmem:[#allocation24_spill] sm:$0xff] }
 0x610   :  { %2671 = vmatpush1.bf16.msra.mxu0 %v4072_v43  ;;  %2712 = vmatpush1.bf16.msra.mxu1 %v4074_v60  ;;  %v4324_v43 = vld [vmem:[#allocation25_spill] sm:$0xff] }
 0x611   :  { %2672 = vmatprep.subr.bf16.mxu0 %v4080_v45  ;;  %2713 = vmatprep.subr.bf16.mxu1 %v4082_v53 }
 0x614   :  { %2673 = vmatpush1.bf16.msra.mxu0 %v4084_v62  ;;  %2714 = vmatpush1.bf16.msra.mxu1 %v4086_v46 }
 0x615   :  { %2674 = vmatprep.subr.bf16.mxu0 %v4092_v52  ;;  %2715 = vmatprep.subr.bf16.mxu1 %v4094_v4 }
 0x618   :  { %2675 = vmatpush1.bf16.msra.mxu0 %v4096_v6  ;;  %2716 = vmatpush1.bf16.msra.mxu1 %v4098_v7 }
 0x619   :  { %2676 = vmatprep.subr.bf16.mxu0 %v4104_v8  ;;  %2717 = vmatprep.subr.bf16.mxu1 %v4106_v10 }
 0x61c   :  { %2677 = vmatpush1.bf16.msra.mxu0 %v4108_v11  ;;  %2718 = vmatpush1.bf16.msra.mxu1 %v4110_v12 }
 0x61d   :  { %3268 = vmatprep.subr.bf16.mxu0 %v3411_v55 }
 0x6bf   :  { %v2390_v3 = vpop.f32.mrf.mxu0  ;;  %v2431_v15 = vpop.f32.mrf.mxu1 }
 0x6c0   :  { %v2438_v26 = vadd.f32 %v2390_v3, %v4321_v16  ;;  %v2440_v54 = vadd.f32 %v2431_v15, %v4323_v58 }
 0x6c1   :  { %v2392_v59 = vpop.f32.mrf.mxu0  ;;  %v2433_v63 = vpop.f32.mrf.mxu1 }
 0x6c2   :  { %v2442_v2 = vmul.f32 0.5, %v2438_v26  ;;  %v2439_v44 = vadd.f32 %v2392_v59, %v4322_v9  ;;  %v2441_v60 = vadd.f32 %v2433_v63, %v4324_v43 }
 0x6c3   :  { %v2394_v13 = vpop.f32.mrf.mxu0  ;;  %v2435_v0 = vpop.f32.mrf.mxu1 }
 0x6c4   :  { %3479 = vtanh.f32 %v2442_v2  ;;  %v2446_v56 = vmul.f32 0.5, %v2439_v44  ;;  %v2451_v45 = vmul.f32 0.5, %v2441_v60 }
 0x6c5   :  { %v2395_v1 = vpop.f32.mrf.mxu0  ;;  %v2436_v57 = vpop.f32.mrf.mxu1 }
 0x6c6   :  { %3481 = vtanh.f32 %v2446_v56 }
 0x6c7   :  { %3483 = vtanh.f32 %v2440_v54 }
 0x6c8   :  { %3485 = vtanh.f32 %v2451_v45 }
 0x6d1   :  { %v3480_v53 = vpop.eup %3479 }
 0x6d2   :  { %v2444_v62 = vmul.f32 0.5, %v3480_v53 }
 0x6d3   :  { %v3482_v46 = vpop.eup %3481 }
 0x6d4   :  { %v2445_v52 = vadd.f32 0.5, %v2444_v62  ;;  %v2448_v4 = vmul.f32 0.5, %v3482_v46  ;;  %v3484_v7 = vpop.eup %3483 }
 0x6d5   :  { %v3486_v12 = vpop.eup %3485 }
 0x6d6   :  { %v2449_v6 = vadd.f32 0.5, %v2448_v4  ;;  %v2456_v10 = vmul.f32 %v3484_v7, %v2445_v52  ;;  %v2453_v20 = vmul.f32 0.5, %v3486_v12 }
 0x6d8   :  { %v2455_v8 = vmul.f32 %v2449_v6, %v4215_v14  ;;  %v2454_v21 = vadd.f32 0.5, %v2453_v20  ;;  %v4327_v14 = vld [vmem:[#allocation34_spill] sm:$0xff] }
 0x6da   :  { %v4259_v11 = vadd.f32 %v2456_v10, %v2455_v8 }
 0x6dc   :  { %3487 = vtanh.f32 %v4259_v11 }
 0x6e9   :  { %v3488_v36 = vpop.eup %3487 }
 0x6ea   :  { %v4262_v38 = vmul.f32 %v3488_v36, %v2454_v21 }
 0x6ec   :  { %v2469_v39 = vpack.c.bf16 %v4262_v38, %v4262_v38 }
 0x6ee   :  { %2695 = vmatmul.mubr.bf16.vlgmr.msra.gmra.mxu0 %v2469_v39  ;;  %2736 = vmatmul.mubr.bf16.vlgmr.msra.gmra.mxu1 %v2469_v39 }
 0x6ef   :  { %3269 = vmatpush3.bf16.msra.mxu0 %v3411_v55  ;;  %3284 = vmatprep.mubr.bf16.mxu0 %v2778_v28 }
 0x6f0   :  { %3270 = vmatprep.subr.bf16.mxu0 %v3412_v25 }
 0x6f3   :  { %3271 = vmatpush3.bf16.msra.mxu0 %v3412_v25 }
 0x6f4   :  { %3272 = vmatprep.subr.bf16.mxu0 %v3413_v41 }
 0x6f7   :  { %3273 = vmatpush3.bf16.msra.mxu0 %v3413_v41 }
 0x6f8   :  { %3274 = vmatprep.subr.bf16.mxu0 %v3414_v47 }
 0x6fb   :  { %3275 = vmatpush3.bf16.msra.mxu0 %v3414_v47 }
 0x6fc   :  { %3276 = vmatprep.subr.bf16.mxu0 %v3415_v48 }
 0x6ff   :  { %3277 = vmatpush3.bf16.msra.mxu0 %v3415_v48 }
 0x700   :  { %3278 = vmatprep.subr.bf16.mxu0 %v3416_v51 }
 0x703   :  { %3279 = vmatpush3.bf16.msra.mxu0 %v3416_v51 }
 0x704   :  { %3280 = vmatprep.subr.bf16.mxu0 %v3417_v49 }
 0x707   :  { %3281 = vmatpush3.bf16.msra.mxu0 %v3417_v49 }
 0x708   :  { %3282 = vmatprep.subr.bf16.mxu0 %v3418_v5 }
 0x70b   :  { %3283 = vmatpush3.bf16.msra.mxu0 %v3418_v5 }
 0x70e   :  { %3285 = vmatmul.mubr.bf16.vlgmr.msra.gmra.mxu0 %v2779_v61 }
 0x70f   :  { %3288 = vmatprep.mubr.bf16.mxu0 %v2780_v17 }
 0x7ae   :  { %v2696_v18 = vpop.f32.mrf.mxu0  ;;  %v2737_v50 = vpop.f32.mrf.mxu1 }
 0x7af   :  { %v2744_v22 = vadd.f32 %v2696_v18, %v4326_v37  ;;  %v2746_v55 = vadd.f32 %v2737_v50, %v4328_v19 }
 0x7b0   :  { %v2698_v23 = vpop.f32.mrf.mxu0  ;;  %v2739_v24 = vpop.f32.mrf.mxu1 }
 0x7b1   :  { %v2748_v29 = vmul.f32 0.5, %v2744_v22  ;;  %v2745_v30 = vadd.f32 %v2698_v23, %v4327_v14  ;;  %v2747_v34 = vadd.f32 %v2739_v24, %v4329_v27 }
 0x7b2   :  { %v2700_v31 = vpop.f32.mrf.mxu0  ;;  %v2741_v32 = vpop.f32.mrf.mxu1 }
 0x7b3   :  { %3489 = vtanh.f32 %v2748_v29  ;;  %v2752_v33 = vmul.f32 0.5, %v2745_v30  ;;  %v2757_v3 = vmul.f32 0.5, %v2747_v34 }
 0x7b4   :  { %v2701_v35 = vpop.f32.mrf.mxu0  ;;  %v2742_v42 = vpop.f32.mrf.mxu1 }
 0x7b5   :  { %3491 = vtanh.f32 %v2752_v33 }
 0x7b6   :  { %3493 = vtanh.f32 %v2746_v55 }
 0x7b7   :  { %3495 = vtanh.f32 %v2757_v3 }
 0x7c0   :  { %v3490_v15 = vpop.eup %3489 }
 0x7c1   :  { %v2750_v16 = vmul.f32 0.5, %v3490_v15 }
 0x7c2   :  { %v3492_v26 = vpop.eup %3491 }
 0x7c3   :  { %v2751_v59 = vadd.f32 0.5, %v2750_v16  ;;  %v2754_v63 = vmul.f32 0.5, %v3492_v26  ;;  %v3494_v9 = vpop.eup %3493 }
 0x7c4   :  { %v3496_v1 = vpop.eup %3495 }
 0x7c5   :  { %v2755_v2 = vadd.f32 0.5, %v2754_v63  ;;  %v2762_v13 = vmul.f32 %v3494_v9, %v2751_v59  ;;  %v2759_v54 = vmul.f32 0.5, %v3496_v1 }
 0x7c7   :  { %v2761_v44 = vmul.f32 %v2755_v2, %v4259_v11  ;;  %v2760_v60 = vadd.f32 0.5, %v2759_v54 }
 0x7c9   :  { %v2763_v0 = vadd.f32 %v2762_v13, %v2761_v44 }
 0x7cb   :  { %3497 = vtanh.f32 %v2763_v0  ;;  %2923 = vst [vmem:[#allocation15] sm:$0xff] %v2763_v0 }
 0x7ce   :  { %v3286_v56 = vpop.f32.mrf.mxu0 }
 0x7cf   :  { %2913 = vst [vmem:[#allocation12 + $0x10] sm:$0xff] %v3286_v56 }
 0x7d0   :  { %v2880_v57 = vpop.f32.mrf.mxu0 }
 0x7d1   :  { %2911 = vst [vmem:[#allocation12] sm:$0xff] %v2880_v57 }
 0x7d2   :  { %v3287_v58 = vpop.f32.mrf.mxu0 }
 0x7d3   :  { %2914 = vst [vmem:[#allocation12 + $0x18] sm:$0xff] %v3287_v58 }
 0x7d4   :  { %v2883_v43 = vpop.f32.mrf.mxu0 }
 0x7d5   :  { %2912 = vst [vmem:[#allocation12 + $0x8] sm:$0xff] %v2883_v43 }
 0x7d8   :  { %v3498_v45 = vpop.eup %3497 }
 0x7d9   :  { %v2765_v53 = vmul.f32 %v3498_v45, %v2760_v60 }
 0x7db   :  { %v2781_v62 = vpack.c.bf16 %v2765_v53, %v4262_v38  ;;  %2922 = vst [vmem:[#allocation13] sm:$0xff] %v2765_v53 }
 0x7dd   :  { %3289 = vmatmul.mubr.bf16.gmra.mxu0 %v2781_v62 }
 0x7de   :  { %3570 = shalt.err (!%p3567_p5)
}
 0x7df   :  { %2945 = dma.vmem_to_hbm [thread:$0]  %s2943_s1, 128, %s4294_s7, [#allocation14]  }
 0x7e0   :  { %s3636_s19 = smov [#allocation15]  }
 0x7e1   :  { %s2952_s4 = sshll.u32 %s3636_s19, 4  ;;  %s2953_s4 = int_to_ptr.vmem [resolvable:$true] %s2952_s4 }
 0x7e2   :  { %s3579_s20 = scalar_lea.vmem %s2953_s4, 128  ;;  %p3584_p7 = scmp.lt.s32.totalorder %s2953_s4, %s2953_s4 }
 0x7e3   :  { %p3580_p6 = scmp.ne.s32.totalorder %s2953_s4, %s3579_s20  ;;  %p3585_p8 = scmp.lt.s32.totalorder %s3579_s20, %s3579_s20 }
 0x7e5   :  { %p3586_p9 = por %p3585_p8, %p3584_p7 }
 0x7e7   :  { %p3587_p10 = pnand %p3586_p9, %p3580_p6 }
 0x7e9   :  { %3590 = shalt.err (!%p3587_p10)
}
 0x7ea   :  { %2955 = dma.vmem_to_hbm [thread:$0]  %s2953_s4, 128, %s4295_s8, [#allocation14]  }
 0x7eb   :  { %s3637_s2 = smov [#allocation12]  }
 0x7ec   :  { %s2929_s23 = sshll.u32 %s3637_s2, 4  ;;  %s2930_s23 = int_to_ptr.vmem [resolvable:$true] %s2929_s23 }
 0x7ed   :  { %s3599_s7 = scalar_lea.vmem %s2930_s23, 1024  ;;  %p3604_p12 = scmp.lt.s32.totalorder %s2930_s23, %s2930_s23 }
 0x7ee   :  { %p3600_p11 = scmp.ne.s32.totalorder %s2930_s23, %s3599_s7  ;;  %p3605_p13 = scmp.lt.s32.totalorder %s3599_s7, %s3599_s7 }
 0x7f0   :  { %p3606_p0 = por %p3605_p13, %p3604_p12 }
 0x7f2   :  { %p3607_p1 = pnand %p3606_p0, %p3600_p11 }
 0x89d   :  { %v3290_v46 = vpop.f32.mrf.mxu0 }
 0x89e   :  { %2917 = vst [vmem:[#allocation12 + $0x30] sm:$0xff] %v3290_v46 }
 0x89f   :  { %v2896_v52 = vpop.f32.mrf.mxu0 }
 0x8a0   :  { %2915 = vst [vmem:[#allocation12 + $0x20] sm:$0xff] %v2896_v52 }
 0x8a1   :  { %v3291_v4 = vpop.f32.mrf.mxu0 }
 0x8a2   :  { %2918 = vst [vmem:[#allocation12 + $0x38] sm:$0xff] %v3291_v4 }
 0x8a3   :  { %v2899_v6 = vpop.f32.mrf.mxu0 }
 0x8a4   :  { %2916 = vst [vmem:[#allocation12 + $0x28] sm:$0xff] %v2899_v6 }
 0x8a5   :  { %3610 = shalt.err (!%p3607_p1)
}
 0x8a6   :  { %s3638_s24 = smov 128   ;;  %s3639_s8 = smov 8  }
 0x8a7   :  { %2935 = dma.vmem_to_hbm [thread:$0]  %s2930_s23, 1024, %s4293_s6, [#allocation8], %s3638_s24, %s3638_s24, %s3639_s8  }
 0x8a8   :  { %3623 = dma.done.wait [#allocation8], 1024  }
 0x8a9   :  { %3624 = vsyncadd [#allocation8], 4294966272 }
 0x8aa   :  { %3625 = dma.done.wait [#allocation14], 256  }
 0x8ab   :  { %3626 = vsyncadd [#allocation14], 4294967040 }
 0x8ac   :  { %2965 = vsyncpa [#allocation7], 1 }
 0x8ad   :  { %2966 = vsyncpa [#allocation10], 1 }
 0x8ae   :  { %2967 = vsyncpa [#allocation8], 1 }
 0x8af   :  { %2968 = vsyncpa [#allocation14], 1 }

</bundles_post_ra>
